<compile_context>
chip_gen: v6e
topology: v6e:2x2x1
jax: 0.10.0
libtpu: 0.0.40
codegen_flags: <defaults>
</compile_context>

<pallas_src>
import functools

import numpy as np

import jax
import jax.numpy as jnp
from jax.experimental import pallas as pl
from jax.experimental.pallas import tpu as pltpu


# --------------------------- Pallas kernel -----------------------------------

def _dyn_kernel(x_ref, smat_ref, wstem_ref, sstem_ref, bstem_ref,
                w1_ref, s1_ref, b1_ref, w2_ref, s2_ref, b2_ref,
                rww_ref, rws_ref, rwb_ref,
                fw1_ref, fb1_ref, fs1_ref, ft1_ref, fw2_ref, fb2_ref,
                lat_ref, out_ref, *, num_res_blocks):
    """Fused DynamicsNetwork forward for one batch block (grid axis = batch).

    x_ref    : (Bb, C, HW)      NCHW state-action encoding (spatial flattened)
    smat_ref : (9, HW, HW)      constant shift-and-mask matrices (zero padding)
    wstem_ref: (9, Cl, C)       stem conv taps (tap = ky*3+kx), (Cout, Cin)
    sstem/bstem: (Cl, 1)        folded BN scale / bias (column vectors)
    w1/w2    : (R, 9, Cl, Cl)   res-block conv taps
    s1/b1/s2/b2: (R, Cl, 1)     folded BN affines
    rww      : (Cr, Cl)         1x1 reward conv weights
    rws/rwb  : (Cr, 1)          folded (conv-bias + BN) affine
    fw1      : (Cr, HW, hidden) fc_reward_head layer-1 (channel-major rows)
    fb1/fs1/ft1: (1, hidden)    layer-1 bias, folded BN1d scale/bias
    fw2      : (hidden, S)      final linear
    fb2      : (1, S)           final bias
    lat_ref  : (Bb, Cl, HW)     next latent state, NCHW-flat (lane-dense)
    out_ref  : (Bb, 1, S)       categorical reward logits
    """
    Bb, C, HW = x_ref.shape
    Cl = lat_ref.shape[1]
    Cr = rww_ref.shape[0]

    def conv3x3(cur, wget, scale, bias, residual=None):
        """3x3 conv (stride 1, zero pad) + folded BN (+ residual) + ReLU.

        cur: (Cin, HW) value; wget(t) -> (Cout, Cin) tap weights. Tap shifts
        (and the zero-pad mask) are applied by multiplying with the constant
        (HW, HW) matrices on the idle MXU — no scratch, no masked stores, no
        XLU relayouts.
        """
        acc = None
        for t in range(9):
            tap = jnp.dot(wget(t), cur, preferred_element_type=jnp.float32)
            tap = jnp.dot(tap, smat_ref[t], preferred_element_type=jnp.float32)
            acc = tap if acc is None else acc + tap
        y = acc * scale + bias
        if residual is not None:
            y = y + residual
        return jnp.maximum(y, 0.0)                      # (Cout, HW)

    # TODO(synk): switch to lax.fori_loop over res blocks for large R.
    for b in range(Bb):
        xb = x_ref[b]                                   # (C, HW)
        # stem: conv3x3 -> BN -> += latent_state -> ReLU
        y = conv3x3(xb, lambda t: wstem_ref[t],
                    sstem_ref[...], bstem_ref[...], residual=xb[:Cl, :])
        # res blocks (basic): conv+BN+ReLU, conv+BN, +identity, ReLU
        for r in range(num_res_blocks):
            h = conv3x3(y, lambda t, r=r: w1_ref[r, t], s1_ref[r], b1_ref[r])
            y = conv3x3(h, lambda t, r=r: w2_ref[r, t], s2_ref[r], b2_ref[r],
                        residual=y)
        lat_ref[b] = y                                  # (Cl, HW), lane-dense

        # reward path, fully fused: 1x1 conv -> BN -> ReLU -> MLP head
        rw = jnp.dot(rww_ref[...], y, preferred_element_type=jnp.float32)
        rw = jnp.maximum(rw * rws_ref[...] + rwb_ref[...], 0.0)     # (Cr, HW)
        # First Linear over PyTorch's channel-major flatten: contract each
        # channel's HW row against its (HW, hidden) slab of fc_w1.
        hvec = fb1_ref[...]                             # (1, hidden)
        for c in range(Cr):
            hvec = hvec + jnp.dot(rw[c:c + 1, :], fw1_ref[c],
                                  preferred_element_type=jnp.float32)
        hvec = jnp.maximum(hvec * fs1_ref[...] + ft1_ref[...], 0.0)
        out_ref[b] = jnp.dot(hvec, fw2_ref[...],
                             preferred_element_type=jnp.float32) + fb2_ref[...]


# --------------------------- parameters --------------------------------------

def _bn_fold(gamma, beta, mean, var, eps=1e-5):
    scale = gamma / jnp.sqrt(var + eps)
    return scale, beta - mean * scale


def init_params(key, num_channels, num_res_blocks, reward_head_channels,
                reward_head_hidden_channels, output_support_size, H, W,
                last_linear_layer_init_zero=True):
    """PyTorch-convention parameters (conv weights OIHW, channel-major fc_w1)."""
    C, Cl = num_channels, num_channels - 1
    Cr = reward_head_channels
    keys = iter(jax.random.split(key, 128))

    def nrm(shape, s=0.1):
        return s * jax.random.normal(next(keys), shape, jnp.float32)

    def bn(c):
        gamma = 1.0 + 0.1 * jax.random.normal(next(keys), (c,), jnp.float32)
        beta = 0.05 * jax.random.normal(next(keys), (c,), jnp.float32)
        mean = 0.05 * jax.random.normal(next(keys), (c,), jnp.float32)
        var = jax.random.uniform(next(keys), (c,), jnp.float32, 0.5, 1.5)
        return _bn_fold(gamma, beta, mean, var)

    p = {}
    p['conv_w'] = nrm((Cl, C, 3, 3))                 # self.conv (no bias)
    p['conv_s'], p['conv_b'] = bn(Cl)                # self.bn (folded)
    p['resblocks'] = []
    for _ in range(num_res_blocks):
        blk = {'w1': nrm((Cl, Cl, 3, 3)), 'w2': nrm((Cl, Cl, 3, 3))}
        blk['s1'], blk['b1'] = bn(Cl)
        blk['s2'], blk['b2'] = bn(Cl)
        p['resblocks'].append(blk)
    p['rw_w'] = nrm((Cr, Cl))                        # conv1x1_reward weight
    rw_bias = nrm((Cr,))                             # conv1x1_reward bias
    s, t = bn(Cr)                                    # bn_reward (folded)
    p['rw_s'], p['rw_b'] = s, t + s * rw_bias
    flatten = Cr * H * W
    hidden = reward_head_hidden_channels[0]
    p['fc_w1'] = nrm((flatten, hidden))
    p['fc_b1'] = nrm((hidden,))
    p['fc_s1'], p['fc_t1'] = bn(hidden)              # BN1d in the MLP (folded)
    if last_linear_layer_init_zero:
        p['fc_w2'] = jnp.zeros((hidden, output_support_size), jnp.float32)
        p['fc_b2'] = jnp.zeros((output_support_size,), jnp.float32)
    else:
        p['fc_w2'] = nrm((hidden, output_support_size))
        p['fc_b2'] = nrm((output_support_size,))
    return p


def _prepare_kernel_params(p, H, W):
    """Reshape/stack params into kernel-friendly NCHW-oriented forms."""
    Cl, C = p['conv_w'].shape[:2]
    Cr = p['rw_w'].shape[0]
    hidden = p['fc_w1'].shape[1]
    HW = H * W
    R = len(p['resblocks'])

    def taps(w):  # (Cout, Cin, 3, 3) -> (9, Cout, Cin), tap index = ky*3 + kx
        return jnp.transpose(w, (2, 3, 0, 1)).reshape(9, w.shape[0], w.shape[1])

    kp = {}
    kp['wstem'] = taps(p['conv_w'])
    kp['sstem'] = p['conv_s'].reshape(Cl, 1)
    kp['bstem'] = p['conv_b'].reshape(Cl, 1)
    if R > 0:
        kp['w1'] = jnp.stack([taps(b['w1']) for b in p['resblocks']])
        kp['s1'] = jnp.stack([b['s1'].reshape(Cl, 1) for b in p['resblocks']])
        kp['b1'] = jnp.stack([b['b1'].reshape(Cl, 1) for b in p['resblocks']])
        kp['w2'] = jnp.stack([taps(b['w2']) for b in p['resblocks']])
        kp['s2'] = jnp.stack([b['s2'].reshape(Cl, 1) for b in p['resblocks']])
        kp['b2'] = jnp.stack([b['b2'].reshape(Cl, 1) for b in p['resblocks']])
    else:  # dummies (never read: the kernel's static res-block loop is empty)
        kp['w1'] = jnp.zeros((1, 9, Cl, Cl), jnp.float32)
        kp['s1'] = jnp.zeros((1, Cl, 1), jnp.float32)
        kp['b1'] = jnp.zeros((1, Cl, 1), jnp.float32)
        kp['w2'] = jnp.zeros((1, 9, Cl, Cl), jnp.float32)
        kp['s2'] = jnp.zeros((1, Cl, 1), jnp.float32)
        kp['b2'] = jnp.zeros((1, Cl, 1), jnp.float32)
    kp['rww'] = p['rw_w']                            # (Cr, Cl)
    kp['rws'] = p['rw_s'].reshape(Cr, 1)
    kp['rwb'] = p['rw_b'].reshape(Cr, 1)
    # fc_w1 rows are indexed by PyTorch's channel-major flatten (c*HW + p):
    # reshape to (Cr, HW, hidden) so the kernel contracts channel rows directly.
    kp['fw1'] = p['fc_w1'].reshape(Cr, HW, hidden)
    kp['fb1'] = p['fc_b1'].reshape(1, hidden)
    kp['fs1'] = p['fc_s1'].reshape(1, hidden)
    kp['ft1'] = p['fc_t1'].reshape(1, hidden)
    kp['fw2'] = p['fc_w2']
    kp['fb2'] = p['fc_b2'].reshape(1, -1)
    return kp


def _shift_mask_mats(H, W):
    """(9, HW, HW) 0/1 matrices: column p of tap (oy, ox) selects source pixel
    (h+oy, w+ox) when it is inside the image, else the column is all-zero
    (implements the conv's zero padding)."""
    HW = H * W
    p = np.arange(HW)
    h, w = p // W, p % W
    mats = []
    for oy in (-1, 0, 1):
        for ox in (-1, 0, 1):
            hh, ww = h + oy, w + ox
            valid = (hh >= 0) & (hh < H) & (ww >= 0) & (ww < W)
            src = hh * W + ww
            m = np.zeros((HW, HW), np.float32)
            m[src[valid], p[valid]] = 1.0
            mats.append(m)
    return jnp.asarray(np.stack(mats))


def _pick_batch_block(B):
    """Batch items per grid step: amortize per-step overhead, but keep the
    grid length >= 2 so both v7x TensorCores get work."""
    if B <= 1:
        return 1
    target = max(1, min(8, B // 2))
    for bb in range(target, 0, -1):
        if B % bb == 0:
            return bb
    return 1


def _const_spec(a):
    zeros = (0,) * a.ndim
    return pl.BlockSpec(a.shape, lambda i, _z=zeros: _z)


# --------------------------- forward pass -------------------------------------

def dynamics_forward(params, state_action_encoding):
    B, C, H, W = state_action_encoding.shape
    Cl = C - 1
    HW = H * W
    R = len(params['resblocks'])
    kp = _prepare_kernel_params(params, H, W)
    S = kp['fw2'].shape[1]

    smats = _shift_mask_mats(H, W)
    Bb = _pick_batch_block(B)

    # NCHW kept end-to-end: only free metadata reshapes, no transposes.
    x = state_action_encoding.reshape(B, C, HW).astype(jnp.float32)

    weights = (smats, kp['wstem'], kp['sstem'], kp['bstem'],
               kp['w1'], kp['s1'], kp['b1'], kp['w2'], kp['s2'], kp['b2'],
               kp['rww'], kp['rws'], kp['rwb'],
               kp['fw1'], kp['fb1'], kp['fs1'], kp['ft1'],
               kp['fw2'], kp['fb2'])

    lat, reward = pl.pallas_call(
        functools.partial(_dyn_kernel, num_res_blocks=R),
        out_shape=(jax.ShapeDtypeStruct((B, Cl, HW), jnp.float32),
                   jax.ShapeDtypeStruct((B, 1, S), jnp.float32)),
        grid=(B // Bb,),
        in_specs=[pl.BlockSpec((Bb, C, HW), lambda i: (i, 0, 0))]
                + [_const_spec(a) for a in weights],
        out_specs=(pl.BlockSpec((Bb, Cl, HW), lambda i: (i, 0, 0)),
                   pl.BlockSpec((Bb, 1, S), lambda i: (i, 0, 0))),
        compiler_params=pltpu.CompilerParams(
            dimension_semantics=("parallel",)),
    )(x, *weights)

    next_latent = lat.reshape(B, Cl, H, W)            # free: already NCHW-flat
    return next_latent, reward.reshape(B, S)


# --------------------------- pure-JAX reference -------------------------------

def _reference_forward(params, x):
    x = x.astype(jnp.float32)
    latent = x[:, :-1]

    def conv3(inp, w):
        return jax.lax.conv_general_dilated(
            inp, w, window_strides=(1, 1), padding='SAME',
            dimension_numbers=('NCHW', 'OIHW', 'NCHW'))

    def aff(v):
        return v[None, :, None, None]

    y = jnp.maximum(conv3(x, params['conv_w']) * aff(params['conv_s'])
                    + aff(params['conv_b']) + latent, 0.0)
    for blk in params['resblocks']:
        h = jnp.maximum(conv3(y, blk['w1']) * aff(blk['s1']) + aff(blk['b1']), 0.0)
        y = jnp.maximum(conv3(h, blk['w2']) * aff(blk['s2']) + aff(blk['b2']) + y, 0.0)
    next_latent = y
    r = jnp.einsum('oc,bchw->bohw', params['rw_w'], y)
    r = jnp.maximum(r * aff(params['rw_s']) + aff(params['rw_b']), 0.0)
    B = x.shape[0]
    rflat = r.reshape(B, -1)                           # PyTorch channel-major view
    h = jnp.maximum((rflat @ params['fc_w1'] + params['fc_b1'])
                    * params['fc_s1'] + params['fc_t1'], 0.0)
    reward = h @ params['fc_w2'] + params['fc_b2']
    return next_latent, reward


# --------------------------- main ---------------------------------------------

if __name__ == "__main__":
    B, C, H, W = 2, 8, 8, 8          # num_channels=8 (7 latent planes + 1 action)
    num_res_blocks = 1
    reward_head_channels = 4
    reward_head_hidden_channels = [32]
    output_support_size = 21
    # flatten_input_size_for_reward_head = reward_head_channels * H * W = 256

    key = jax.random.PRNGKey(0)
    kx, kparam = jax.random.split(key)
    x = jax.random.normal(kx, (B, C, H, W), jnp.float32)
    # last_linear_layer_init_zero=False so the reward check is non-trivial.
    params = init_params(kparam, C, num_res_blocks, reward_head_channels,
                         reward_head_hidden_channels, output_support_size, H, W,
                         last_linear_layer_init_zero=False)

    fwd = jax.jit(dynamics_forward)
    next_latent, reward = fwd(params, x)
    jax.block_until_ready((next_latent, reward))

    assert next_latent.shape == (B, C - 1, H, W)
    assert reward.shape == (B, output_support_size)

    ref_latent, ref_reward = _reference_forward(params, x)
    assert jnp.allclose(next_latent, ref_latent, atol=1e-4, rtol=1e-4), (
        float(jnp.max(jnp.abs(next_latent - ref_latent))))
    assert jnp.allclose(reward, ref_reward, atol=1e-4, rtol=1e-4), (
        float(jnp.max(jnp.abs(reward - ref_reward))))

    print("KERNEL_OK")
</pallas_src>

<mosaic_0001>
module attributes {stable_mosaic.version = 11 : i64} {
  func.func @_dyn_kernel(%arg0: i32, %arg1: memref<1x8x64xf32, #tpu.memory_space<vmem>>, %arg2: memref<9x64x64xf32, #tpu.memory_space<vmem>>, %arg3: memref<9x7x8xf32, #tpu.memory_space<vmem>>, %arg4: memref<7x1xf32, #tpu.memory_space<vmem>>, %arg5: memref<7x1xf32, #tpu.memory_space<vmem>>, %arg6: memref<1x9x7x7xf32, #tpu.memory_space<vmem>>, %arg7: memref<1x7x1xf32, #tpu.memory_space<vmem>>, %arg8: memref<1x7x1xf32, #tpu.memory_space<vmem>>, %arg9: memref<1x9x7x7xf32, #tpu.memory_space<vmem>>, %arg10: memref<1x7x1xf32, #tpu.memory_space<vmem>>, %arg11: memref<1x7x1xf32, #tpu.memory_space<vmem>>, %arg12: memref<4x7xf32, #tpu.memory_space<vmem>>, %arg13: memref<4x1xf32, #tpu.memory_space<vmem>>, %arg14: memref<4x1xf32, #tpu.memory_space<vmem>>, %arg15: memref<4x64x32xf32, #tpu.memory_space<vmem>>, %arg16: memref<1x32xf32, #tpu.memory_space<vmem>>, %arg17: memref<1x32xf32, #tpu.memory_space<vmem>>, %arg18: memref<1x32xf32, #tpu.memory_space<vmem>>, %arg19: memref<32x21xf32, #tpu.memory_space<vmem>>, %arg20: memref<1x21xf32, #tpu.memory_space<vmem>>, %arg21: memref<1x7x64xf32, #tpu.memory_space<vmem>>, %arg22: memref<1x1x21xf32, #tpu.memory_space<vmem>>) attributes {dimension_semantics = [#tpu.dimension_semantics<parallel>], iteration_bounds = array<i64: 2>, scalar_prefetch = 0 : i64, scratch_operands = 0 : i64, tpu.core_type = #tpu.core_type<tc>, window_params = [{transform_indices = @transform_0, window_bounds = array<i64: 1, 8, 64>}, {pipeline_mode = #tpu.pipeline_mode<synchronous>, transform_indices = @transform_1, window_bounds = array<i64: 9, 64, 64>}, {pipeline_mode = #tpu.pipeline_mode<synchronous>, transform_indices = @transform_2, window_bounds = array<i64: 9, 7, 8>}, {pipeline_mode = #tpu.pipeline_mode<synchronous>, transform_indices = @transform_3, window_bounds = array<i64: 7, 1>}, {pipeline_mode = #tpu.pipeline_mode<synchronous>, transform_indices = @transform_4, window_bounds = array<i64: 7, 1>}, {pipeline_mode = #tpu.pipeline_mode<synchronous>, transform_indices = @transform_5, window_bounds = array<i64: 1, 9, 7, 7>}, {pipeline_mode = #tpu.pipeline_mode<synchronous>, transform_indices = @transform_6, window_bounds = array<i64: 1, 7, 1>}, {pipeline_mode = #tpu.pipeline_mode<synchronous>, transform_indices = @transform_7, window_bounds = array<i64: 1, 7, 1>}, {pipeline_mode = #tpu.pipeline_mode<synchronous>, transform_indices = @transform_8, window_bounds = array<i64: 1, 9, 7, 7>}, {pipeline_mode = #tpu.pipeline_mode<synchronous>, transform_indices = @transform_9, window_bounds = array<i64: 1, 7, 1>}, {pipeline_mode = #tpu.pipeline_mode<synchronous>, transform_indices = @transform_10, window_bounds = array<i64: 1, 7, 1>}, {pipeline_mode = #tpu.pipeline_mode<synchronous>, transform_indices = @transform_11, window_bounds = array<i64: 4, 7>}, {pipeline_mode = #tpu.pipeline_mode<synchronous>, transform_indices = @transform_12, window_bounds = array<i64: 4, 1>}, {pipeline_mode = #tpu.pipeline_mode<synchronous>, transform_indices = @transform_13, window_bounds = array<i64: 4, 1>}, {pipeline_mode = #tpu.pipeline_mode<synchronous>, transform_indices = @transform_14, window_bounds = array<i64: 4, 64, 32>}, {pipeline_mode = #tpu.pipeline_mode<synchronous>, transform_indices = @transform_15, window_bounds = array<i64: 1, 32>}, {pipeline_mode = #tpu.pipeline_mode<synchronous>, transform_indices = @transform_16, window_bounds = array<i64: 1, 32>}, {pipeline_mode = #tpu.pipeline_mode<synchronous>, transform_indices = @transform_17, window_bounds = array<i64: 1, 32>}, {pipeline_mode = #tpu.pipeline_mode<synchronous>, transform_indices = @transform_18, window_bounds = array<i64: 32, 21>}, {pipeline_mode = #tpu.pipeline_mode<synchronous>, transform_indices = @transform_19, window_bounds = array<i64: 1, 21>}, {transform_indices = @transform_20, window_bounds = array<i64: 1, 7, 64>}, {transform_indices = @transform_21, window_bounds = array<i64: 1, 1, 21>}]} {
    %c0 = arith.constant 0 : index
    %c0_0 = arith.constant 0 : index
    %c0_1 = arith.constant 0 : index
    %0 = vector.load %arg1[%c0, %c0_0, %c0_1] : memref<1x8x64xf32, #tpu.memory_space<vmem>>, vector<1x8x64xf32>
    %1 = vector.shape_cast %0 : vector<1x8x64xf32> to vector<8x64xf32>
    %c0_2 = arith.constant 0 : index
    %c0_3 = arith.constant 0 : index
    %2 = vector.load %arg4[%c0_2, %c0_3] : memref<7x1xf32, #tpu.memory_space<vmem>>, vector<7x1xf32>
    %c0_4 = arith.constant 0 : index
    %c0_5 = arith.constant 0 : index
    %3 = vector.load %arg5[%c0_4, %c0_5] : memref<7x1xf32, #tpu.memory_space<vmem>>, vector<7x1xf32>
    %4 = vector.extract_strided_slice %1 {offsets = [0, 0], sizes = [7, 64], strides = [1, 1]} : vector<8x64xf32> to vector<7x64xf32>
    %c0_6 = arith.constant 0 : index
    %c0_7 = arith.constant 0 : index
    %c0_8 = arith.constant 0 : index
    %5 = vector.load %arg3[%c0_6, %c0_7, %c0_8] : memref<9x7x8xf32, #tpu.memory_space<vmem>>, vector<1x7x8xf32>
    %6 = vector.shape_cast %5 : vector<1x7x8xf32> to vector<7x8xf32>
    %cst = arith.constant dense<0.000000e+00> : vector<7x64xf32>
    %7 = tpu.matmul %6, %1, %cst {dimension_numbers = #tpu.dot_dimension_numbers<[1], [0], [0], [1], [0, 0, 1, 1], [], []>} : vector<7x8xf32>, vector<8x64xf32>, vector<7x64xf32> -> vector<7x64xf32>
    %c0_9 = arith.constant 0 : index
    %c0_10 = arith.constant 0 : index
    %c0_11 = arith.constant 0 : index
    %8 = vector.load %arg2[%c0_9, %c0_10, %c0_11] : memref<9x64x64xf32, #tpu.memory_space<vmem>>, vector<1x64x64xf32>
    %9 = vector.shape_cast %8 : vector<1x64x64xf32> to vector<64x64xf32>
    %cst_12 = arith.constant dense<0.000000e+00> : vector<7x64xf32>
    %10 = tpu.matmul %7, %9, %cst_12 {dimension_numbers = #tpu.dot_dimension_numbers<[1], [0], [0], [1], [0, 0, 1, 1], [], []>} : vector<7x64xf32>, vector<64x64xf32>, vector<7x64xf32> -> vector<7x64xf32>
    %c1 = arith.constant 1 : index
    %c0_13 = arith.constant 0 : index
    %c0_14 = arith.constant 0 : index
    %11 = vector.load %arg3[%c1, %c0_13, %c0_14] : memref<9x7x8xf32, #tpu.memory_space<vmem>>, vector<1x7x8xf32>
    %12 = vector.shape_cast %11 : vector<1x7x8xf32> to vector<7x8xf32>
    %cst_15 = arith.constant dense<0.000000e+00> : vector<7x64xf32>
    %13 = tpu.matmul %12, %1, %cst_15 {dimension_numbers = #tpu.dot_dimension_numbers<[1], [0], [0], [1], [0, 0, 1, 1], [], []>} : vector<7x8xf32>, vector<8x64xf32>, vector<7x64xf32> -> vector<7x64xf32>
    %c1_16 = arith.constant 1 : index
    %c0_17 = arith.constant 0 : index
    %c0_18 = arith.constant 0 : index
    %14 = vector.load %arg2[%c1_16, %c0_17, %c0_18] : memref<9x64x64xf32, #tpu.memory_space<vmem>>, vector<1x64x64xf32>
    %15 = vector.shape_cast %14 : vector<1x64x64xf32> to vector<64x64xf32>
    %cst_19 = arith.constant dense<0.000000e+00> : vector<7x64xf32>
    %16 = tpu.matmul %13, %15, %cst_19 {dimension_numbers = #tpu.dot_dimension_numbers<[1], [0], [0], [1], [0, 0, 1, 1], [], []>} : vector<7x64xf32>, vector<64x64xf32>, vector<7x64xf32> -> vector<7x64xf32>
    %17 = arith.addf %10, %16 : vector<7x64xf32>
    %c2 = arith.constant 2 : index
    %c0_20 = arith.constant 0 : index
    %c0_21 = arith.constant 0 : index
    %18 = vector.load %arg3[%c2, %c0_20, %c0_21] : memref<9x7x8xf32, #tpu.memory_space<vmem>>, vector<1x7x8xf32>
    %19 = vector.shape_cast %18 : vector<1x7x8xf32> to vector<7x8xf32>
    %cst_22 = arith.constant dense<0.000000e+00> : vector<7x64xf32>
    %20 = tpu.matmul %19, %1, %cst_22 {dimension_numbers = #tpu.dot_dimension_numbers<[1], [0], [0], [1], [0, 0, 1, 1], [], []>} : vector<7x8xf32>, vector<8x64xf32>, vector<7x64xf32> -> vector<7x64xf32>
    %c2_23 = arith.constant 2 : index
    %c0_24 = arith.constant 0 : index
    %c0_25 = arith.constant 0 : index
    %21 = vector.load %arg2[%c2_23, %c0_24, %c0_25] : memref<9x64x64xf32, #tpu.memory_space<vmem>>, vector<1x64x64xf32>
    %22 = vector.shape_cast %21 : vector<1x64x64xf32> to vector<64x64xf32>
    %cst_26 = arith.constant dense<0.000000e+00> : vector<7x64xf32>
    %23 = tpu.matmul %20, %22, %cst_26 {dimension_numbers = #tpu.dot_dimension_numbers<[1], [0], [0], [1], [0, 0, 1, 1], [], []>} : vector<7x64xf32>, vector<64x64xf32>, vector<7x64xf32> -> vector<7x64xf32>
    %24 = arith.addf %17, %23 : vector<7x64xf32>
    %c3 = arith.constant 3 : index
    %c0_27 = arith.constant 0 : index
    %c0_28 = arith.constant 0 : index
    %25 = vector.load %arg3[%c3, %c0_27, %c0_28] : memref<9x7x8xf32, #tpu.memory_space<vmem>>, vector<1x7x8xf32>
    %26 = vector.shape_cast %25 : vector<1x7x8xf32> to vector<7x8xf32>
    %cst_29 = arith.constant dense<0.000000e+00> : vector<7x64xf32>
    %27 = tpu.matmul %26, %1, %cst_29 {dimension_numbers = #tpu.dot_dimension_numbers<[1], [0], [0], [1], [0, 0, 1, 1], [], []>} : vector<7x8xf32>, vector<8x64xf32>, vector<7x64xf32> -> vector<7x64xf32>
    %c3_30 = arith.constant 3 : index
    %c0_31 = arith.constant 0 : index
    %c0_32 = arith.constant 0 : index
    %28 = vector.load %arg2[%c3_30, %c0_31, %c0_32] : memref<9x64x64xf32, #tpu.memory_space<vmem>>, vector<1x64x64xf32>
    %29 = vector.shape_cast %28 : vector<1x64x64xf32> to vector<64x64xf32>
    %cst_33 = arith.constant dense<0.000000e+00> : vector<7x64xf32>
    %30 = tpu.matmul %27, %29, %cst_33 {dimension_numbers = #tpu.dot_dimension_numbers<[1], [0], [0], [1], [0, 0, 1, 1], [], []>} : vector<7x64xf32>, vector<64x64xf32>, vector<7x64xf32> -> vector<7x64xf32>
    %31 = arith.addf %24, %30 : vector<7x64xf32>
    %c4 = arith.constant 4 : index
    %c0_34 = arith.constant 0 : index
    %c0_35 = arith.constant 0 : index
    %32 = vector.load %arg3[%c4, %c0_34, %c0_35] : memref<9x7x8xf32, #tpu.memory_space<vmem>>, vector<1x7x8xf32>
    %33 = vector.shape_cast %32 : vector<1x7x8xf32> to vector<7x8xf32>
    %cst_36 = arith.constant dense<0.000000e+00> : vector<7x64xf32>
    %34 = tpu.matmul %33, %1, %cst_36 {dimension_numbers = #tpu.dot_dimension_numbers<[1], [0], [0], [1], [0, 0, 1, 1], [], []>} : vector<7x8xf32>, vector<8x64xf32>, vector<7x64xf32> -> vector<7x64xf32>
    %c4_37 = arith.constant 4 : index
    %c0_38 = arith.constant 0 : index
    %c0_39 = arith.constant 0 : index
    %35 = vector.load %arg2[%c4_37, %c0_38, %c0_39] : memref<9x64x64xf32, #tpu.memory_space<vmem>>, vector<1x64x64xf32>
    %36 = vector.shape_cast %35 : vector<1x64x64xf32> to vector<64x64xf32>
    %cst_40 = arith.constant dense<0.000000e+00> : vector<7x64xf32>
    %37 = tpu.matmul %34, %36, %cst_40 {dimension_numbers = #tpu.dot_dimension_numbers<[1], [0], [0], [1], [0, 0, 1, 1], [], []>} : vector<7x64xf32>, vector<64x64xf32>, vector<7x64xf32> -> vector<7x64xf32>
    %38 = arith.addf %31, %37 : vector<7x64xf32>
    %c5 = arith.constant 5 : index
    %c0_41 = arith.constant 0 : index
    %c0_42 = arith.constant 0 : index
    %39 = vector.load %arg3[%c5, %c0_41, %c0_42] : memref<9x7x8xf32, #tpu.memory_space<vmem>>, vector<1x7x8xf32>
    %40 = vector.shape_cast %39 : vector<1x7x8xf32> to vector<7x8xf32>
    %cst_43 = arith.constant dense<0.000000e+00> : vector<7x64xf32>
    %41 = tpu.matmul %40, %1, %cst_43 {dimension_numbers = #tpu.dot_dimension_numbers<[1], [0], [0], [1], [0, 0, 1, 1], [], []>} : vector<7x8xf32>, vector<8x64xf32>, vector<7x64xf32> -> vector<7x64xf32>
    %c5_44 = arith.constant 5 : index
    %c0_45 = arith.constant 0 : index
    %c0_46 = arith.constant 0 : index
    %42 = vector.load %arg2[%c5_44, %c0_45, %c0_46] : memref<9x64x64xf32, #tpu.memory_space<vmem>>, vector<1x64x64xf32>
    %43 = vector.shape_cast %42 : vector<1x64x64xf32> to vector<64x64xf32>
    %cst_47 = arith.constant dense<0.000000e+00> : vector<7x64xf32>
    %44 = tpu.matmul %41, %43, %cst_47 {dimension_numbers = #tpu.dot_dimension_numbers<[1], [0], [0], [1], [0, 0, 1, 1], [], []>} : vector<7x64xf32>, vector<64x64xf32>, vector<7x64xf32> -> vector<7x64xf32>
    %45 = arith.addf %38, %44 : vector<7x64xf32>
    %c6 = arith.constant 6 : index
    %c0_48 = arith.constant 0 : index
    %c0_49 = arith.constant 0 : index
    %46 = vector.load %arg3[%c6, %c0_48, %c0_49] : memref<9x7x8xf32, #tpu.memory_space<vmem>>, vector<1x7x8xf32>
    %47 = vector.shape_cast %46 : vector<1x7x8xf32> to vector<7x8xf32>
    %cst_50 = arith.constant dense<0.000000e+00> : vector<7x64xf32>
    %48 = tpu.matmul %47, %1, %cst_50 {dimension_numbers = #tpu.dot_dimension_numbers<[1], [0], [0], [1], [0, 0, 1, 1], [], []>} : vector<7x8xf32>, vector<8x64xf32>, vector<7x64xf32> -> vector<7x64xf32>
    %c6_51 = arith.constant 6 : index
    %c0_52 = arith.constant 0 : index
    %c0_53 = arith.constant 0 : index
    %49 = vector.load %arg2[%c6_51, %c0_52, %c0_53] : memref<9x64x64xf32, #tpu.memory_space<vmem>>, vector<1x64x64xf32>
    %50 = vector.shape_cast %49 : vector<1x64x64xf32> to vector<64x64xf32>
    %cst_54 = arith.constant dense<0.000000e+00> : vector<7x64xf32>
    %51 = tpu.matmul %48, %50, %cst_54 {dimension_numbers = #tpu.dot_dimension_numbers<[1], [0], [0], [1], [0, 0, 1, 1], [], []>} : vector<7x64xf32>, vector<64x64xf32>, vector<7x64xf32> -> vector<7x64xf32>
    %52 = arith.addf %45, %51 : vector<7x64xf32>
    %c7 = arith.constant 7 : index
    %c0_55 = arith.constant 0 : index
    %c0_56 = arith.constant 0 : index
    %53 = vector.load %arg3[%c7, %c0_55, %c0_56] : memref<9x7x8xf32, #tpu.memory_space<vmem>>, vector<1x7x8xf32>
    %54 = vector.shape_cast %53 : vector<1x7x8xf32> to vector<7x8xf32>
    %cst_57 = arith.constant dense<0.000000e+00> : vector<7x64xf32>
    %55 = tpu.matmul %54, %1, %cst_57 {dimension_numbers = #tpu.dot_dimension_numbers<[1], [0], [0], [1], [0, 0, 1, 1], [], []>} : vector<7x8xf32>, vector<8x64xf32>, vector<7x64xf32> -> vector<7x64xf32>
    %c7_58 = arith.constant 7 : index
    %c0_59 = arith.constant 0 : index
    %c0_60 = arith.constant 0 : index
    %56 = vector.load %arg2[%c7_58, %c0_59, %c0_60] : memref<9x64x64xf32, #tpu.memory_space<vmem>>, vector<1x64x64xf32>
    %57 = vector.shape_cast %56 : vector<1x64x64xf32> to vector<64x64xf32>
    %cst_61 = arith.constant dense<0.000000e+00> : vector<7x64xf32>
    %58 = tpu.matmul %55, %57, %cst_61 {dimension_numbers = #tpu.dot_dimension_numbers<[1], [0], [0], [1], [0, 0, 1, 1], [], []>} : vector<7x64xf32>, vector<64x64xf32>, vector<7x64xf32> -> vector<7x64xf32>
    %59 = arith.addf %52, %58 : vector<7x64xf32>
    %c8 = arith.constant 8 : index
    %c0_62 = arith.constant 0 : index
    %c0_63 = arith.constant 0 : index
    %60 = vector.load %arg3[%c8, %c0_62, %c0_63] : memref<9x7x8xf32, #tpu.memory_space<vmem>>, vector<1x7x8xf32>
    %61 = vector.shape_cast %60 : vector<1x7x8xf32> to vector<7x8xf32>
    %cst_64 = arith.constant dense<0.000000e+00> : vector<7x64xf32>
    %62 = tpu.matmul %61, %1, %cst_64 {dimension_numbers = #tpu.dot_dimension_numbers<[1], [0], [0], [1], [0, 0, 1, 1], [], []>} : vector<7x8xf32>, vector<8x64xf32>, vector<7x64xf32> -> vector<7x64xf32>
    %c8_65 = arith.constant 8 : index
    %c0_66 = arith.constant 0 : index
    %c0_67 = arith.constant 0 : index
    %63 = vector.load %arg2[%c8_65, %c0_66, %c0_67] : memref<9x64x64xf32, #tpu.memory_space<vmem>>, vector<1x64x64xf32>
    %64 = vector.shape_cast %63 : vector<1x64x64xf32> to vector<64x64xf32>
    %cst_68 = arith.constant dense<0.000000e+00> : vector<7x64xf32>
    %65 = tpu.matmul %62, %64, %cst_68 {dimension_numbers = #tpu.dot_dimension_numbers<[1], [0], [0], [1], [0, 0, 1, 1], [], []>} : vector<7x64xf32>, vector<64x64xf32>, vector<7x64xf32> -> vector<7x64xf32>
    %66 = arith.addf %59, %65 : vector<7x64xf32>
    %67 = vector.broadcast %2 : vector<7x1xf32> to vector<7x64xf32>
    %68 = arith.mulf %66, %67 : vector<7x64xf32>
    %69 = vector.broadcast %3 : vector<7x1xf32> to vector<7x64xf32>
    %70 = arith.addf %68, %69 : vector<7x64xf32>
    %71 = arith.addf %70, %4 : vector<7x64xf32>
    %cst_69 = arith.constant 0.000000e+00 : f32
    %72 = vector.broadcast %cst_69 : f32 to vector<7x64xf32>
    %73 = arith.maximumf %71, %72 : vector<7x64xf32>
    %c0_70 = arith.constant 0 : index
    %c0_71 = arith.constant 0 : index
    %c0_72 = arith.constant 0 : index
    %74 = vector.load %arg7[%c0_70, %c0_71, %c0_72] : memref<1x7x1xf32, #tpu.memory_space<vmem>>, vector<1x7x1xf32>
    %75 = vector.shape_cast %74 : vector<1x7x1xf32> to vector<7x1xf32>
    %c0_73 = arith.constant 0 : index
    %c0_74 = arith.constant 0 : index
    %c0_75 = arith.constant 0 : index
    %76 = vector.load %arg8[%c0_73, %c0_74, %c0_75] : memref<1x7x1xf32, #tpu.memory_space<vmem>>, vector<1x7x1xf32>
    %77 = vector.shape_cast %76 : vector<1x7x1xf32> to vector<7x1xf32>
    %c0_76 = arith.constant 0 : index
    %c0_77 = arith.constant 0 : index
    %c0_78 = arith.constant 0 : index
    %c0_79 = arith.constant 0 : index
    %78 = vector.load %arg6[%c0_76, %c0_77, %c0_78, %c0_79] : memref<1x9x7x7xf32, #tpu.memory_space<vmem>>, vector<1x1x7x7xf32>
    %79 = vector.shape_cast %78 : vector<1x1x7x7xf32> to vector<7x7xf32>
    %cst_80 = arith.constant dense<0.000000e+00> : vector<7x64xf32>
    %80 = tpu.matmul %79, %73, %cst_80 {dimension_numbers = #tpu.dot_dimension_numbers<[1], [0], [0], [1], [0, 0, 1, 1], [], []>} : vector<7x7xf32>, vector<7x64xf32>, vector<7x64xf32> -> vector<7x64xf32>
    %c0_81 = arith.constant 0 : index
    %c0_82 = arith.constant 0 : index
    %c0_83 = arith.constant 0 : index
    %81 = vector.load %arg2[%c0_81, %c0_82, %c0_83] : memref<9x64x64xf32, #tpu.memory_space<vmem>>, vector<1x64x64xf32>
    %82 = vector.shape_cast %81 : vector<1x64x64xf32> to vector<64x64xf32>
    %cst_84 = arith.constant dense<0.000000e+00> : vector<7x64xf32>
    %83 = tpu.matmul %80, %82, %cst_84 {dimension_numbers = #tpu.dot_dimension_numbers<[1], [0], [0], [1], [0, 0, 1, 1], [], []>} : vector<7x64xf32>, vector<64x64xf32>, vector<7x64xf32> -> vector<7x64xf32>
    %c0_85 = arith.constant 0 : index
    %c1_86 = arith.constant 1 : index
    %c0_87 = arith.constant 0 : index
    %c0_88 = arith.constant 0 : index
    %84 = vector.load %arg6[%c0_85, %c1_86, %c0_87, %c0_88] : memref<1x9x7x7xf32, #tpu.memory_space<vmem>>, vector<1x1x7x7xf32>
    %85 = vector.shape_cast %84 : vector<1x1x7x7xf32> to vector<7x7xf32>
    %cst_89 = arith.constant dense<0.000000e+00> : vector<7x64xf32>
    %86 = tpu.matmul %85, %73, %cst_89 {dimension_numbers = #tpu.dot_dimension_numbers<[1], [0], [0], [1], [0, 0, 1, 1], [], []>} : vector<7x7xf32>, vector<7x64xf32>, vector<7x64xf32> -> vector<7x64xf32>
    %c1_90 = arith.constant 1 : index
    %c0_91 = arith.constant 0 : index
    %c0_92 = arith.constant 0 : index
    %87 = vector.load %arg2[%c1_90, %c0_91, %c0_92] : memref<9x64x64xf32, #tpu.memory_space<vmem>>, vector<1x64x64xf32>
    %88 = vector.shape_cast %87 : vector<1x64x64xf32> to vector<64x64xf32>
    %cst_93 = arith.constant dense<0.000000e+00> : vector<7x64xf32>
    %89 = tpu.matmul %86, %88, %cst_93 {dimension_numbers = #tpu.dot_dimension_numbers<[1], [0], [0], [1], [0, 0, 1, 1], [], []>} : vector<7x64xf32>, vector<64x64xf32>, vector<7x64xf32> -> vector<7x64xf32>
    %90 = arith.addf %83, %89 : vector<7x64xf32>
    %c0_94 = arith.constant 0 : index
    %c2_95 = arith.constant 2 : index
    %c0_96 = arith.constant 0 : index
    %c0_97 = arith.constant 0 : index
    %91 = vector.load %arg6[%c0_94, %c2_95, %c0_96, %c0_97] : memref<1x9x7x7xf32, #tpu.memory_space<vmem>>, vector<1x1x7x7xf32>
    %92 = vector.shape_cast %91 : vector<1x1x7x7xf32> to vector<7x7xf32>
    %cst_98 = arith.constant dense<0.000000e+00> : vector<7x64xf32>
    %93 = tpu.matmul %92, %73, %cst_98 {dimension_numbers = #tpu.dot_dimension_numbers<[1], [0], [0], [1], [0, 0, 1, 1], [], []>} : vector<7x7xf32>, vector<7x64xf32>, vector<7x64xf32> -> vector<7x64xf32>
    %c2_99 = arith.constant 2 : index
    %c0_100 = arith.constant 0 : index
    %c0_101 = arith.constant 0 : index
    %94 = vector.load %arg2[%c2_99, %c0_100, %c0_101] : memref<9x64x64xf32, #tpu.memory_space<vmem>>, vector<1x64x64xf32>
    %95 = vector.shape_cast %94 : vector<1x64x64xf32> to vector<64x64xf32>
    %cst_102 = arith.constant dense<0.000000e+00> : vector<7x64xf32>
    %96 = tpu.matmul %93, %95, %cst_102 {dimension_numbers = #tpu.dot_dimension_numbers<[1], [0], [0], [1], [0, 0, 1, 1], [], []>} : vector<7x64xf32>, vector<64x64xf32>, vector<7x64xf32> -> vector<7x64xf32>
    %97 = arith.addf %90, %96 : vector<7x64xf32>
    %c0_103 = arith.constant 0 : index
    %c3_104 = arith.constant 3 : index
    %c0_105 = arith.constant 0 : index
    %c0_106 = arith.constant 0 : index
    %98 = vector.load %arg6[%c0_103, %c3_104, %c0_105, %c0_106] : memref<1x9x7x7xf32, #tpu.memory_space<vmem>>, vector<1x1x7x7xf32>
    %99 = vector.shape_cast %98 : vector<1x1x7x7xf32> to vector<7x7xf32>
    %cst_107 = arith.constant dense<0.000000e+00> : vector<7x64xf32>
    %100 = tpu.matmul %99, %73, %cst_107 {dimension_numbers = #tpu.dot_dimension_numbers<[1], [0], [0], [1], [0, 0, 1, 1], [], []>} : vector<7x7xf32>, vector<7x64xf32>, vector<7x64xf32> -> vector<7x64xf32>
    %c3_108 = arith.constant 3 : index
    %c0_109 = arith.constant 0 : index
    %c0_110 = arith.constant 0 : index
    %101 = vector.load %arg2[%c3_108, %c0_109, %c0_110] : memref<9x64x64xf32, #tpu.memory_space<vmem>>, vector<1x64x64xf32>
    %102 = vector.shape_cast %101 : vector<1x64x64xf32> to vector<64x64xf32>
    %cst_111 = arith.constant dense<0.000000e+00> : vector<7x64xf32>
    %103 = tpu.matmul %100, %102, %cst_111 {dimension_numbers = #tpu.dot_dimension_numbers<[1], [0], [0], [1], [0, 0, 1, 1], [], []>} : vector<7x64xf32>, vector<64x64xf32>, vector<7x64xf32> -> vector<7x64xf32>
    %104 = arith.addf %97, %103 : vector<7x64xf32>
    %c0_112 = arith.constant 0 : index
    %c4_113 = arith.constant 4 : index
    %c0_114 = arith.constant 0 : index
    %c0_115 = arith.constant 0 : index
    %105 = vector.load %arg6[%c0_112, %c4_113, %c0_114, %c0_115] : memref<1x9x7x7xf32, #tpu.memory_space<vmem>>, vector<1x1x7x7xf32>
    %106 = vector.shape_cast %105 : vector<1x1x7x7xf32> to vector<7x7xf32>
    %cst_116 = arith.constant dense<0.000000e+00> : vector<7x64xf32>
    %107 = tpu.matmul %106, %73, %cst_116 {dimension_numbers = #tpu.dot_dimension_numbers<[1], [0], [0], [1], [0, 0, 1, 1], [], []>} : vector<7x7xf32>, vector<7x64xf32>, vector<7x64xf32> -> vector<7x64xf32>
    %c4_117 = arith.constant 4 : index
    %c0_118 = arith.constant 0 : index
    %c0_119 = arith.constant 0 : index
    %108 = vector.load %arg2[%c4_117, %c0_118, %c0_119] : memref<9x64x64xf32, #tpu.memory_space<vmem>>, vector<1x64x64xf32>
    %109 = vector.shape_cast %108 : vector<1x64x64xf32> to vector<64x64xf32>
    %cst_120 = arith.constant dense<0.000000e+00> : vector<7x64xf32>
    %110 = tpu.matmul %107, %109, %cst_120 {dimension_numbers = #tpu.dot_dimension_numbers<[1], [0], [0], [1], [0, 0, 1, 1], [], []>} : vector<7x64xf32>, vector<64x64xf32>, vector<7x64xf32> -> vector<7x64xf32>
    %111 = arith.addf %104, %110 : vector<7x64xf32>
    %c0_121 = arith.constant 0 : index
    %c5_122 = arith.constant 5 : index
    %c0_123 = arith.constant 0 : index
    %c0_124 = arith.constant 0 : index
    %112 = vector.load %arg6[%c0_121, %c5_122, %c0_123, %c0_124] : memref<1x9x7x7xf32, #tpu.memory_space<vmem>>, vector<1x1x7x7xf32>
    %113 = vector.shape_cast %112 : vector<1x1x7x7xf32> to vector<7x7xf32>
    %cst_125 = arith.constant dense<0.000000e+00> : vector<7x64xf32>
    %114 = tpu.matmul %113, %73, %cst_125 {dimension_numbers = #tpu.dot_dimension_numbers<[1], [0], [0], [1], [0, 0, 1, 1], [], []>} : vector<7x7xf32>, vector<7x64xf32>, vector<7x64xf32> -> vector<7x64xf32>
    %c5_126 = arith.constant 5 : index
    %c0_127 = arith.constant 0 : index
    %c0_128 = arith.constant 0 : index
    %115 = vector.load %arg2[%c5_126, %c0_127, %c0_128] : memref<9x64x64xf32, #tpu.memory_space<vmem>>, vector<1x64x64xf32>
    %116 = vector.shape_cast %115 : vector<1x64x64xf32> to vector<64x64xf32>
    %cst_129 = arith.constant dense<0.000000e+00> : vector<7x64xf32>
    %117 = tpu.matmul %114, %116, %cst_129 {dimension_numbers = #tpu.dot_dimension_numbers<[1], [0], [0], [1], [0, 0, 1, 1], [], []>} : vector<7x64xf32>, vector<64x64xf32>, vector<7x64xf32> -> vector<7x64xf32>
    %118 = arith.addf %111, %117 : vector<7x64xf32>
    %c0_130 = arith.constant 0 : index
    %c6_131 = arith.constant 6 : index
    %c0_132 = arith.constant 0 : index
    %c0_133 = arith.constant 0 : index
    %119 = vector.load %arg6[%c0_130, %c6_131, %c0_132, %c0_133] : memref<1x9x7x7xf32, #tpu.memory_space<vmem>>, vector<1x1x7x7xf32>
    %120 = vector.shape_cast %119 : vector<1x1x7x7xf32> to vector<7x7xf32>
    %cst_134 = arith.constant dense<0.000000e+00> : vector<7x64xf32>
    %121 = tpu.matmul %120, %73, %cst_134 {dimension_numbers = #tpu.dot_dimension_numbers<[1], [0], [0], [1], [0, 0, 1, 1], [], []>} : vector<7x7xf32>, vector<7x64xf32>, vector<7x64xf32> -> vector<7x64xf32>
    %c6_135 = arith.constant 6 : index
    %c0_136 = arith.constant 0 : index
    %c0_137 = arith.constant 0 : index
    %122 = vector.load %arg2[%c6_135, %c0_136, %c0_137] : memref<9x64x64xf32, #tpu.memory_space<vmem>>, vector<1x64x64xf32>
    %123 = vector.shape_cast %122 : vector<1x64x64xf32> to vector<64x64xf32>
    %cst_138 = arith.constant dense<0.000000e+00> : vector<7x64xf32>
    %124 = tpu.matmul %121, %123, %cst_138 {dimension_numbers = #tpu.dot_dimension_numbers<[1], [0], [0], [1], [0, 0, 1, 1], [], []>} : vector<7x64xf32>, vector<64x64xf32>, vector<7x64xf32> -> vector<7x64xf32>
    %125 = arith.addf %118, %124 : vector<7x64xf32>
    %c0_139 = arith.constant 0 : index
    %c7_140 = arith.constant 7 : index
    %c0_141 = arith.constant 0 : index
    %c0_142 = arith.constant 0 : index
    %126 = vector.load %arg6[%c0_139, %c7_140, %c0_141, %c0_142] : memref<1x9x7x7xf32, #tpu.memory_space<vmem>>, vector<1x1x7x7xf32>
    %127 = vector.shape_cast %126 : vector<1x1x7x7xf32> to vector<7x7xf32>
    %cst_143 = arith.constant dense<0.000000e+00> : vector<7x64xf32>
    %128 = tpu.matmul %127, %73, %cst_143 {dimension_numbers = #tpu.dot_dimension_numbers<[1], [0], [0], [1], [0, 0, 1, 1], [], []>} : vector<7x7xf32>, vector<7x64xf32>, vector<7x64xf32> -> vector<7x64xf32>
    %c7_144 = arith.constant 7 : index
    %c0_145 = arith.constant 0 : index
    %c0_146 = arith.constant 0 : index
    %129 = vector.load %arg2[%c7_144, %c0_145, %c0_146] : memref<9x64x64xf32, #tpu.memory_space<vmem>>, vector<1x64x64xf32>
    %130 = vector.shape_cast %129 : vector<1x64x64xf32> to vector<64x64xf32>
    %cst_147 = arith.constant dense<0.000000e+00> : vector<7x64xf32>
    %131 = tpu.matmul %128, %130, %cst_147 {dimension_numbers = #tpu.dot_dimension_numbers<[1], [0], [0], [1], [0, 0, 1, 1], [], []>} : vector<7x64xf32>, vector<64x64xf32>, vector<7x64xf32> -> vector<7x64xf32>
    %132 = arith.addf %125, %131 : vector<7x64xf32>
    %c0_148 = arith.constant 0 : index
    %c8_149 = arith.constant 8 : index
    %c0_150 = arith.constant 0 : index
    %c0_151 = arith.constant 0 : index
    %133 = vector.load %arg6[%c0_148, %c8_149, %c0_150, %c0_151] : memref<1x9x7x7xf32, #tpu.memory_space<vmem>>, vector<1x1x7x7xf32>
    %134 = vector.shape_cast %133 : vector<1x1x7x7xf32> to vector<7x7xf32>
    %cst_152 = arith.constant dense<0.000000e+00> : vector<7x64xf32>
    %135 = tpu.matmul %134, %73, %cst_152 {dimension_numbers = #tpu.dot_dimension_numbers<[1], [0], [0], [1], [0, 0, 1, 1], [], []>} : vector<7x7xf32>, vector<7x64xf32>, vector<7x64xf32> -> vector<7x64xf32>
    %c8_153 = arith.constant 8 : index
    %c0_154 = arith.constant 0 : index
    %c0_155 = arith.constant 0 : index
    %136 = vector.load %arg2[%c8_153, %c0_154, %c0_155] : memref<9x64x64xf32, #tpu.memory_space<vmem>>, vector<1x64x64xf32>
    %137 = vector.shape_cast %136 : vector<1x64x64xf32> to vector<64x64xf32>
    %cst_156 = arith.constant dense<0.000000e+00> : vector<7x64xf32>
    %138 = tpu.matmul %135, %137, %cst_156 {dimension_numbers = #tpu.dot_dimension_numbers<[1], [0], [0], [1], [0, 0, 1, 1], [], []>} : vector<7x64xf32>, vector<64x64xf32>, vector<7x64xf32> -> vector<7x64xf32>
    %139 = arith.addf %132, %138 : vector<7x64xf32>
    %140 = vector.broadcast %75 : vector<7x1xf32> to vector<7x64xf32>
    %141 = arith.mulf %139, %140 : vector<7x64xf32>
    %142 = vector.broadcast %77 : vector<7x1xf32> to vector<7x64xf32>
    %143 = arith.addf %141, %142 : vector<7x64xf32>
    %cst_157 = arith.constant 0.000000e+00 : f32
    %144 = vector.broadcast %cst_157 : f32 to vector<7x64xf32>
    %145 = arith.maximumf %143, %144 : vector<7x64xf32>
    %c0_158 = arith.constant 0 : index
    %c0_159 = arith.constant 0 : index
    %c0_160 = arith.constant 0 : index
    %146 = vector.load %arg10[%c0_158, %c0_159, %c0_160] : memref<1x7x1xf32, #tpu.memory_space<vmem>>, vector<1x7x1xf32>
    %147 = vector.shape_cast %146 : vector<1x7x1xf32> to vector<7x1xf32>
    %c0_161 = arith.constant 0 : index
    %c0_162 = arith.constant 0 : index
    %c0_163 = arith.constant 0 : index
    %148 = vector.load %arg11[%c0_161, %c0_162, %c0_163] : memref<1x7x1xf32, #tpu.memory_space<vmem>>, vector<1x7x1xf32>
    %149 = vector.shape_cast %148 : vector<1x7x1xf32> to vector<7x1xf32>
    %c0_164 = arith.constant 0 : index
    %c0_165 = arith.constant 0 : index
    %c0_166 = arith.constant 0 : index
    %c0_167 = arith.constant 0 : index
    %150 = vector.load %arg9[%c0_164, %c0_165, %c0_166, %c0_167] : memref<1x9x7x7xf32, #tpu.memory_space<vmem>>, vector<1x1x7x7xf32>
    %151 = vector.shape_cast %150 : vector<1x1x7x7xf32> to vector<7x7xf32>
    %cst_168 = arith.constant dense<0.000000e+00> : vector<7x64xf32>
    %152 = tpu.matmul %151, %145, %cst_168 {dimension_numbers = #tpu.dot_dimension_numbers<[1], [0], [0], [1], [0, 0, 1, 1], [], []>} : vector<7x7xf32>, vector<7x64xf32>, vector<7x64xf32> -> vector<7x64xf32>
    %c0_169 = arith.constant 0 : index
    %c0_170 = arith.constant 0 : index
    %c0_171 = arith.constant 0 : index
    %153 = vector.load %arg2[%c0_169, %c0_170, %c0_171] : memref<9x64x64xf32, #tpu.memory_space<vmem>>, vector<1x64x64xf32>
    %154 = vector.shape_cast %153 : vector<1x64x64xf32> to vector<64x64xf32>
    %cst_172 = arith.constant dense<0.000000e+00> : vector<7x64xf32>
    %155 = tpu.matmul %152, %154, %cst_172 {dimension_numbers = #tpu.dot_dimension_numbers<[1], [0], [0], [1], [0, 0, 1, 1], [], []>} : vector<7x64xf32>, vector<64x64xf32>, vector<7x64xf32> -> vector<7x64xf32>
    %c0_173 = arith.constant 0 : index
    %c1_174 = arith.constant 1 : index
    %c0_175 = arith.constant 0 : index
    %c0_176 = arith.constant 0 : index
    %156 = vector.load %arg9[%c0_173, %c1_174, %c0_175, %c0_176] : memref<1x9x7x7xf32, #tpu.memory_space<vmem>>, vector<1x1x7x7xf32>
    %157 = vector.shape_cast %156 : vector<1x1x7x7xf32> to vector<7x7xf32>
    %cst_177 = arith.constant dense<0.000000e+00> : vector<7x64xf32>
    %158 = tpu.matmul %157, %145, %cst_177 {dimension_numbers = #tpu.dot_dimension_numbers<[1], [0], [0], [1], [0, 0, 1, 1], [], []>} : vector<7x7xf32>, vector<7x64xf32>, vector<7x64xf32> -> vector<7x64xf32>
    %c1_178 = arith.constant 1 : index
    %c0_179 = arith.constant 0 : index
    %c0_180 = arith.constant 0 : index
    %159 = vector.load %arg2[%c1_178, %c0_179, %c0_180] : memref<9x64x64xf32, #tpu.memory_space<vmem>>, vector<1x64x64xf32>
    %160 = vector.shape_cast %159 : vector<1x64x64xf32> to vector<64x64xf32>
    %cst_181 = arith.constant dense<0.000000e+00> : vector<7x64xf32>
    %161 = tpu.matmul %158, %160, %cst_181 {dimension_numbers = #tpu.dot_dimension_numbers<[1], [0], [0], [1], [0, 0, 1, 1], [], []>} : vector<7x64xf32>, vector<64x64xf32>, vector<7x64xf32> -> vector<7x64xf32>
    %162 = arith.addf %155, %161 : vector<7x64xf32>
    %c0_182 = arith.constant 0 : index
    %c2_183 = arith.constant 2 : index
    %c0_184 = arith.constant 0 : index
    %c0_185 = arith.constant 0 : index
    %163 = vector.load %arg9[%c0_182, %c2_183, %c0_184, %c0_185] : memref<1x9x7x7xf32, #tpu.memory_space<vmem>>, vector<1x1x7x7xf32>
    %164 = vector.shape_cast %163 : vector<1x1x7x7xf32> to vector<7x7xf32>
    %cst_186 = arith.constant dense<0.000000e+00> : vector<7x64xf32>
    %165 = tpu.matmul %164, %145, %cst_186 {dimension_numbers = #tpu.dot_dimension_numbers<[1], [0], [0], [1], [0, 0, 1, 1], [], []>} : vector<7x7xf32>, vector<7x64xf32>, vector<7x64xf32> -> vector<7x64xf32>
    %c2_187 = arith.constant 2 : index
    %c0_188 = arith.constant 0 : index
    %c0_189 = arith.constant 0 : index
    %166 = vector.load %arg2[%c2_187, %c0_188, %c0_189] : memref<9x64x64xf32, #tpu.memory_space<vmem>>, vector<1x64x64xf32>
    %167 = vector.shape_cast %166 : vector<1x64x64xf32> to vector<64x64xf32>
    %cst_190 = arith.constant dense<0.000000e+00> : vector<7x64xf32>
    %168 = tpu.matmul %165, %167, %cst_190 {dimension_numbers = #tpu.dot_dimension_numbers<[1], [0], [0], [1], [0, 0, 1, 1], [], []>} : vector<7x64xf32>, vector<64x64xf32>, vector<7x64xf32> -> vector<7x64xf32>
    %169 = arith.addf %162, %168 : vector<7x64xf32>
    %c0_191 = arith.constant 0 : index
    %c3_192 = arith.constant 3 : index
    %c0_193 = arith.constant 0 : index
    %c0_194 = arith.constant 0 : index
    %170 = vector.load %arg9[%c0_191, %c3_192, %c0_193, %c0_194] : memref<1x9x7x7xf32, #tpu.memory_space<vmem>>, vector<1x1x7x7xf32>
    %171 = vector.shape_cast %170 : vector<1x1x7x7xf32> to vector<7x7xf32>
    %cst_195 = arith.constant dense<0.000000e+00> : vector<7x64xf32>
    %172 = tpu.matmul %171, %145, %cst_195 {dimension_numbers = #tpu.dot_dimension_numbers<[1], [0], [0], [1], [0, 0, 1, 1], [], []>} : vector<7x7xf32>, vector<7x64xf32>, vector<7x64xf32> -> vector<7x64xf32>
    %c3_196 = arith.constant 3 : index
    %c0_197 = arith.constant 0 : index
    %c0_198 = arith.constant 0 : index
    %173 = vector.load %arg2[%c3_196, %c0_197, %c0_198] : memref<9x64x64xf32, #tpu.memory_space<vmem>>, vector<1x64x64xf32>
    %174 = vector.shape_cast %173 : vector<1x64x64xf32> to vector<64x64xf32>
    %cst_199 = arith.constant dense<0.000000e+00> : vector<7x64xf32>
    %175 = tpu.matmul %172, %174, %cst_199 {dimension_numbers = #tpu.dot_dimension_numbers<[1], [0], [0], [1], [0, 0, 1, 1], [], []>} : vector<7x64xf32>, vector<64x64xf32>, vector<7x64xf32> -> vector<7x64xf32>
    %176 = arith.addf %169, %175 : vector<7x64xf32>
    %c0_200 = arith.constant 0 : index
    %c4_201 = arith.constant 4 : index
    %c0_202 = arith.constant 0 : index
    %c0_203 = arith.constant 0 : index
    %177 = vector.load %arg9[%c0_200, %c4_201, %c0_202, %c0_203] : memref<1x9x7x7xf32, #tpu.memory_space<vmem>>, vector<1x1x7x7xf32>
    %178 = vector.shape_cast %177 : vector<1x1x7x7xf32> to vector<7x7xf32>
    %cst_204 = arith.constant dense<0.000000e+00> : vector<7x64xf32>
    %179 = tpu.matmul %178, %145, %cst_204 {dimension_numbers = #tpu.dot_dimension_numbers<[1], [0], [0], [1], [0, 0, 1, 1], [], []>} : vector<7x7xf32>, vector<7x64xf32>, vector<7x64xf32> -> vector<7x64xf32>
    %c4_205 = arith.constant 4 : index
    %c0_206 = arith.constant 0 : index
    %c0_207 = arith.constant 0 : index
    %180 = vector.load %arg2[%c4_205, %c0_206, %c0_207] : memref<9x64x64xf32, #tpu.memory_space<vmem>>, vector<1x64x64xf32>
    %181 = vector.shape_cast %180 : vector<1x64x64xf32> to vector<64x64xf32>
    %cst_208 = arith.constant dense<0.000000e+00> : vector<7x64xf32>
    %182 = tpu.matmul %179, %181, %cst_208 {dimension_numbers = #tpu.dot_dimension_numbers<[1], [0], [0], [1], [0, 0, 1, 1], [], []>} : vector<7x64xf32>, vector<64x64xf32>, vector<7x64xf32> -> vector<7x64xf32>
    %183 = arith.addf %176, %182 : vector<7x64xf32>
    %c0_209 = arith.constant 0 : index
    %c5_210 = arith.constant 5 : index
    %c0_211 = arith.constant 0 : index
    %c0_212 = arith.constant 0 : index
    %184 = vector.load %arg9[%c0_209, %c5_210, %c0_211, %c0_212] : memref<1x9x7x7xf32, #tpu.memory_space<vmem>>, vector<1x1x7x7xf32>
    %185 = vector.shape_cast %184 : vector<1x1x7x7xf32> to vector<7x7xf32>
    %cst_213 = arith.constant dense<0.000000e+00> : vector<7x64xf32>
    %186 = tpu.matmul %185, %145, %cst_213 {dimension_numbers = #tpu.dot_dimension_numbers<[1], [0], [0], [1], [0, 0, 1, 1], [], []>} : vector<7x7xf32>, vector<7x64xf32>, vector<7x64xf32> -> vector<7x64xf32>
    %c5_214 = arith.constant 5 : index
    %c0_215 = arith.constant 0 : index
    %c0_216 = arith.constant 0 : index
    %187 = vector.load %arg2[%c5_214, %c0_215, %c0_216] : memref<9x64x64xf32, #tpu.memory_space<vmem>>, vector<1x64x64xf32>
    %188 = vector.shape_cast %187 : vector<1x64x64xf32> to vector<64x64xf32>
    %cst_217 = arith.constant dense<0.000000e+00> : vector<7x64xf32>
    %189 = tpu.matmul %186, %188, %cst_217 {dimension_numbers = #tpu.dot_dimension_numbers<[1], [0], [0], [1], [0, 0, 1, 1], [], []>} : vector<7x64xf32>, vector<64x64xf32>, vector<7x64xf32> -> vector<7x64xf32>
    %190 = arith.addf %183, %189 : vector<7x64xf32>
    %c0_218 = arith.constant 0 : index
    %c6_219 = arith.constant 6 : index
    %c0_220 = arith.constant 0 : index
    %c0_221 = arith.constant 0 : index
    %191 = vector.load %arg9[%c0_218, %c6_219, %c0_220, %c0_221] : memref<1x9x7x7xf32, #tpu.memory_space<vmem>>, vector<1x1x7x7xf32>
    %192 = vector.shape_cast %191 : vector<1x1x7x7xf32> to vector<7x7xf32>
    %cst_222 = arith.constant dense<0.000000e+00> : vector<7x64xf32>
    %193 = tpu.matmul %192, %145, %cst_222 {dimension_numbers = #tpu.dot_dimension_numbers<[1], [0], [0], [1], [0, 0, 1, 1], [], []>} : vector<7x7xf32>, vector<7x64xf32>, vector<7x64xf32> -> vector<7x64xf32>
    %c6_223 = arith.constant 6 : index
    %c0_224 = arith.constant 0 : index
    %c0_225 = arith.constant 0 : index
    %194 = vector.load %arg2[%c6_223, %c0_224, %c0_225] : memref<9x64x64xf32, #tpu.memory_space<vmem>>, vector<1x64x64xf32>
    %195 = vector.shape_cast %194 : vector<1x64x64xf32> to vector<64x64xf32>
    %cst_226 = arith.constant dense<0.000000e+00> : vector<7x64xf32>
    %196 = tpu.matmul %193, %195, %cst_226 {dimension_numbers = #tpu.dot_dimension_numbers<[1], [0], [0], [1], [0, 0, 1, 1], [], []>} : vector<7x64xf32>, vector<64x64xf32>, vector<7x64xf32> -> vector<7x64xf32>
    %197 = arith.addf %190, %196 : vector<7x64xf32>
    %c0_227 = arith.constant 0 : index
    %c7_228 = arith.constant 7 : index
    %c0_229 = arith.constant 0 : index
    %c0_230 = arith.constant 0 : index
    %198 = vector.load %arg9[%c0_227, %c7_228, %c0_229, %c0_230] : memref<1x9x7x7xf32, #tpu.memory_space<vmem>>, vector<1x1x7x7xf32>
    %199 = vector.shape_cast %198 : vector<1x1x7x7xf32> to vector<7x7xf32>
    %cst_231 = arith.constant dense<0.000000e+00> : vector<7x64xf32>
    %200 = tpu.matmul %199, %145, %cst_231 {dimension_numbers = #tpu.dot_dimension_numbers<[1], [0], [0], [1], [0, 0, 1, 1], [], []>} : vector<7x7xf32>, vector<7x64xf32>, vector<7x64xf32> -> vector<7x64xf32>
    %c7_232 = arith.constant 7 : index
    %c0_233 = arith.constant 0 : index
    %c0_234 = arith.constant 0 : index
    %201 = vector.load %arg2[%c7_232, %c0_233, %c0_234] : memref<9x64x64xf32, #tpu.memory_space<vmem>>, vector<1x64x64xf32>
    %202 = vector.shape_cast %201 : vector<1x64x64xf32> to vector<64x64xf32>
    %cst_235 = arith.constant dense<0.000000e+00> : vector<7x64xf32>
    %203 = tpu.matmul %200, %202, %cst_235 {dimension_numbers = #tpu.dot_dimension_numbers<[1], [0], [0], [1], [0, 0, 1, 1], [], []>} : vector<7x64xf32>, vector<64x64xf32>, vector<7x64xf32> -> vector<7x64xf32>
    %204 = arith.addf %197, %203 : vector<7x64xf32>
    %c0_236 = arith.constant 0 : index
    %c8_237 = arith.constant 8 : index
    %c0_238 = arith.constant 0 : index
    %c0_239 = arith.constant 0 : index
    %205 = vector.load %arg9[%c0_236, %c8_237, %c0_238, %c0_239] : memref<1x9x7x7xf32, #tpu.memory_space<vmem>>, vector<1x1x7x7xf32>
    %206 = vector.shape_cast %205 : vector<1x1x7x7xf32> to vector<7x7xf32>
    %cst_240 = arith.constant dense<0.000000e+00> : vector<7x64xf32>
    %207 = tpu.matmul %206, %145, %cst_240 {dimension_numbers = #tpu.dot_dimension_numbers<[1], [0], [0], [1], [0, 0, 1, 1], [], []>} : vector<7x7xf32>, vector<7x64xf32>, vector<7x64xf32> -> vector<7x64xf32>
    %c8_241 = arith.constant 8 : index
    %c0_242 = arith.constant 0 : index
    %c0_243 = arith.constant 0 : index
    %208 = vector.load %arg2[%c8_241, %c0_242, %c0_243] : memref<9x64x64xf32, #tpu.memory_space<vmem>>, vector<1x64x64xf32>
    %209 = vector.shape_cast %208 : vector<1x64x64xf32> to vector<64x64xf32>
    %cst_244 = arith.constant dense<0.000000e+00> : vector<7x64xf32>
    %210 = tpu.matmul %207, %209, %cst_244 {dimension_numbers = #tpu.dot_dimension_numbers<[1], [0], [0], [1], [0, 0, 1, 1], [], []>} : vector<7x64xf32>, vector<64x64xf32>, vector<7x64xf32> -> vector<7x64xf32>
    %211 = arith.addf %204, %210 : vector<7x64xf32>
    %212 = vector.broadcast %147 : vector<7x1xf32> to vector<7x64xf32>
    %213 = arith.mulf %211, %212 : vector<7x64xf32>
    %214 = vector.broadcast %149 : vector<7x1xf32> to vector<7x64xf32>
    %215 = arith.addf %213, %214 : vector<7x64xf32>
    %216 = arith.addf %215, %73 : vector<7x64xf32>
    %cst_245 = arith.constant 0.000000e+00 : f32
    %217 = vector.broadcast %cst_245 : f32 to vector<7x64xf32>
    %218 = arith.maximumf %216, %217 : vector<7x64xf32>
    %c0_246 = arith.constant 0 : index
    %c0_247 = arith.constant 0 : index
    %c0_248 = arith.constant 0 : index
    %219 = vector.load %arg21[%c0_246, %c0_247, %c0_248] : memref<1x7x64xf32, #tpu.memory_space<vmem>>, vector<1x7x64xf32>
    %220 = vector.shape_cast %219 : vector<1x7x64xf32> to vector<7x64xf32>
    %221 = vector.shape_cast %218 : vector<7x64xf32> to vector<1x7x64xf32>
    tpu.vector_store %arg21[%c0_246, %c0_247, %c0_248], %221 {strides = array<i32>} : memref<1x7x64xf32, #tpu.memory_space<vmem>>, vector<1x7x64xf32>,
    %c0_249 = arith.constant 0 : index
    %c0_250 = arith.constant 0 : index
    %222 = vector.load %arg12[%c0_249, %c0_250] : memref<4x7xf32, #tpu.memory_space<vmem>>, vector<4x7xf32>
    %cst_251 = arith.constant dense<0.000000e+00> : vector<4x64xf32>
    %223 = tpu.matmul %222, %218, %cst_251 {dimension_numbers = #tpu.dot_dimension_numbers<[1], [0], [0], [1], [0, 0, 1, 1], [], []>} : vector<4x7xf32>, vector<7x64xf32>, vector<4x64xf32> -> vector<4x64xf32>
    %c0_252 = arith.constant 0 : index
    %c0_253 = arith.constant 0 : index
    %224 = vector.load %arg13[%c0_252, %c0_253] : memref<4x1xf32, #tpu.memory_space<vmem>>, vector<4x1xf32>
    %225 = vector.broadcast %224 : vector<4x1xf32> to vector<4x64xf32>
    %226 = arith.mulf %223, %225 : vector<4x64xf32>
    %c0_254 = arith.constant 0 : index
    %c0_255 = arith.constant 0 : index
    %227 = vector.load %arg14[%c0_254, %c0_255] : memref<4x1xf32, #tpu.memory_space<vmem>>, vector<4x1xf32>
    %228 = vector.broadcast %227 : vector<4x1xf32> to vector<4x64xf32>
    %229 = arith.addf %226, %228 : vector<4x64xf32>
    %cst_256 = arith.constant 0.000000e+00 : f32
    %230 = vector.broadcast %cst_256 : f32 to vector<4x64xf32>
    %231 = arith.maximumf %229, %230 : vector<4x64xf32>
    %c0_257 = arith.constant 0 : index
    %c0_258 = arith.constant 0 : index
    %232 = vector.load %arg16[%c0_257, %c0_258] : memref<1x32xf32, #tpu.memory_space<vmem>>, vector<1x32xf32>
    %233 = vector.extract_strided_slice %231 {offsets = [0, 0], sizes = [1, 64], strides = [1, 1]} : vector<4x64xf32> to vector<1x64xf32>
    %c0_259 = arith.constant 0 : index
    %c0_260 = arith.constant 0 : index
    %c0_261 = arith.constant 0 : index
    %234 = vector.load %arg15[%c0_259, %c0_260, %c0_261] : memref<4x64x32xf32, #tpu.memory_space<vmem>>, vector<1x64x32xf32>
    %235 = vector.shape_cast %234 : vector<1x64x32xf32> to vector<64x32xf32>
    %cst_262 = arith.constant dense<0.000000e+00> : vector<1x32xf32>
    %236 = tpu.matmul %233, %235, %cst_262 {dimension_numbers = #tpu.dot_dimension_numbers<[1], [0], [0], [1], [0, 0, 1, 1], [], []>} : vector<1x64xf32>, vector<64x32xf32>, vector<1x32xf32> -> vector<1x32xf32>
    %237 = arith.addf %232, %236 : vector<1x32xf32>
    %238 = vector.extract_strided_slice %231 {offsets = [1, 0], sizes = [1, 64], strides = [1, 1]} : vector<4x64xf32> to vector<1x64xf32>
    %c1_263 = arith.constant 1 : index
    %c0_264 = arith.constant 0 : index
    %c0_265 = arith.constant 0 : index
    %239 = vector.load %arg15[%c1_263, %c0_264, %c0_265] : memref<4x64x32xf32, #tpu.memory_space<vmem>>, vector<1x64x32xf32>
    %240 = vector.shape_cast %239 : vector<1x64x32xf32> to vector<64x32xf32>
    %cst_266 = arith.constant dense<0.000000e+00> : vector<1x32xf32>
    %241 = tpu.matmul %238, %240, %cst_266 {dimension_numbers = #tpu.dot_dimension_numbers<[1], [0], [0], [1], [0, 0, 1, 1], [], []>} : vector<1x64xf32>, vector<64x32xf32>, vector<1x32xf32> -> vector<1x32xf32>
    %242 = arith.addf %237, %241 : vector<1x32xf32>
    %243 = vector.extract_strided_slice %231 {offsets = [2, 0], sizes = [1, 64], strides = [1, 1]} : vector<4x64xf32> to vector<1x64xf32>
    %c2_267 = arith.constant 2 : index
    %c0_268 = arith.constant 0 : index
    %c0_269 = arith.constant 0 : index
    %244 = vector.load %arg15[%c2_267, %c0_268, %c0_269] : memref<4x64x32xf32, #tpu.memory_space<vmem>>, vector<1x64x32xf32>
    %245 = vector.shape_cast %244 : vector<1x64x32xf32> to vector<64x32xf32>
    %cst_270 = arith.constant dense<0.000000e+00> : vector<1x32xf32>
    %246 = tpu.matmul %243, %245, %cst_270 {dimension_numbers = #tpu.dot_dimension_numbers<[1], [0], [0], [1], [0, 0, 1, 1], [], []>} : vector<1x64xf32>, vector<64x32xf32>, vector<1x32xf32> -> vector<1x32xf32>
    %247 = arith.addf %242, %246 : vector<1x32xf32>
    %248 = vector.extract_strided_slice %231 {offsets = [3, 0], sizes = [1, 64], strides = [1, 1]} : vector<4x64xf32> to vector<1x64xf32>
    %c3_271 = arith.constant 3 : index
    %c0_272 = arith.constant 0 : index
    %c0_273 = arith.constant 0 : index
    %249 = vector.load %arg15[%c3_271, %c0_272, %c0_273] : memref<4x64x32xf32, #tpu.memory_space<vmem>>, vector<1x64x32xf32>
    %250 = vector.shape_cast %249 : vector<1x64x32xf32> to vector<64x32xf32>
    %cst_274 = arith.constant dense<0.000000e+00> : vector<1x32xf32>
    %251 = tpu.matmul %248, %250, %cst_274 {dimension_numbers = #tpu.dot_dimension_numbers<[1], [0], [0], [1], [0, 0, 1, 1], [], []>} : vector<1x64xf32>, vector<64x32xf32>, vector<1x32xf32> -> vector<1x32xf32>
    %252 = arith.addf %247, %251 : vector<1x32xf32>
    %c0_275 = arith.constant 0 : index
    %c0_276 = arith.constant 0 : index
    %253 = vector.load %arg17[%c0_275, %c0_276] : memref<1x32xf32, #tpu.memory_space<vmem>>, vector<1x32xf32>
    %254 = arith.mulf %252, %253 : vector<1x32xf32>
    %c0_277 = arith.constant 0 : index
    %c0_278 = arith.constant 0 : index
    %255 = vector.load %arg18[%c0_277, %c0_278] : memref<1x32xf32, #tpu.memory_space<vmem>>, vector<1x32xf32>
    %256 = arith.addf %254, %255 : vector<1x32xf32>
    %cst_279 = arith.constant 0.000000e+00 : f32
    %257 = vector.broadcast %cst_279 : f32 to vector<1x32xf32>
    %258 = arith.maximumf %256, %257 : vector<1x32xf32>
    %c0_280 = arith.constant 0 : index
    %c0_281 = arith.constant 0 : index
    %259 = vector.load %arg19[%c0_280, %c0_281] : memref<32x21xf32, #tpu.memory_space<vmem>>, vector<32x21xf32>
    %cst_282 = arith.constant dense<0.000000e+00> : vector<1x21xf32>
    %260 = tpu.matmul %258, %259, %cst_282 {dimension_numbers = #tpu.dot_dimension_numbers<[1], [0], [0], [1], [0, 0, 1, 1], [], []>} : vector<1x32xf32>, vector<32x21xf32>, vector<1x21xf32> -> vector<1x21xf32>
    %c0_283 = arith.constant 0 : index
    %c0_284 = arith.constant 0 : index
    %261 = vector.load %arg20[%c0_283, %c0_284] : memref<1x21xf32, #tpu.memory_space<vmem>>, vector<1x21xf32>
    %262 = arith.addf %260, %261 : vector<1x21xf32>
    %c0_285 = arith.constant 0 : index
    %c0_286 = arith.constant 0 : index
    %c0_287 = arith.constant 0 : index
    %263 = vector.load %arg22[%c0_285, %c0_286, %c0_287] : memref<1x1x21xf32, #tpu.memory_space<vmem>>, vector<1x1x21xf32>
    %264 = vector.shape_cast %263 : vector<1x1x21xf32> to vector<1x21xf32>
    %265 = vector.shape_cast %262 : vector<1x21xf32> to vector<1x1x21xf32>
    tpu.vector_store %arg22[%c0_285, %c0_286, %c0_287], %265 {strides = array<i32>} : memref<1x1x21xf32, #tpu.memory_space<vmem>>, vector<1x1x21xf32>,
    return
  }
  func.func @transform_0(%arg0: i32) -> (i32, i32, i32) {
    %c0_i32 = arith.constant 0 : i32
    %c0_i32_0 = arith.constant 0 : i32
    %c0_i32_1 = arith.constant 0 : i32
    return %arg0, %c0_i32, %c0_i32_0 : i32, i32, i32
  }
  func.func @transform_1(%arg0: i32) -> (i32, i32, i32) {
    %c0_i32 = arith.constant 0 : i32
    %c0_i32_0 = arith.constant 0 : i32
    %c0_i32_1 = arith.constant 0 : i32
    %c0_i32_2 = arith.constant 0 : i32
    return %c0_i32, %c0_i32_0, %c0_i32_1 : i32, i32, i32
  }
  func.func @transform_2(%arg0: i32) -> (i32, i32, i32) {
    %c0_i32 = arith.constant 0 : i32
    %c0_i32_0 = arith.constant 0 : i32
    %c0_i32_1 = arith.constant 0 : i32
    %c0_i32_2 = arith.constant 0 : i32
    return %c0_i32, %c0_i32_0, %c0_i32_1 : i32, i32, i32
  }
  func.func @transform_3(%arg0: i32) -> (i32, i32) {
    %c0_i32 = arith.constant 0 : i32
    %c0_i32_0 = arith.constant 0 : i32
    %c0_i32_1 = arith.constant 0 : i32
    return %c0_i32, %c0_i32_0 : i32, i32
  }
  func.func @transform_4(%arg0: i32) -> (i32, i32) {
    %c0_i32 = arith.constant 0 : i32
    %c0_i32_0 = arith.constant 0 : i32
    %c0_i32_1 = arith.constant 0 : i32
    return %c0_i32, %c0_i32_0 : i32, i32
  }
  func.func @transform_5(%arg0: i32) -> (i32, i32, i32, i32) {
    %c0_i32 = arith.constant 0 : i32
    %c0_i32_0 = arith.constant 0 : i32
    %c0_i32_1 = arith.constant 0 : i32
    %c0_i32_2 = arith.constant 0 : i32
    %c0_i32_3 = arith.constant 0 : i32
    return %c0_i32, %c0_i32_0, %c0_i32_1, %c0_i32_2 : i32, i32, i32, i32
  }
  func.func @transform_6(%arg0: i32) -> (i32, i32, i32) {
    %c0_i32 = arith.constant 0 : i32
    %c0_i32_0 = arith.constant 0 : i32
    %c0_i32_1 = arith.constant 0 : i32
    %c0_i32_2 = arith.constant 0 : i32
    return %c0_i32, %c0_i32_0, %c0_i32_1 : i32, i32, i32
  }
  func.func @transform_7(%arg0: i32) -> (i32, i32, i32) {
    %c0_i32 = arith.constant 0 : i32
    %c0_i32_0 = arith.constant 0 : i32
    %c0_i32_1 = arith.constant 0 : i32
    %c0_i32_2 = arith.constant 0 : i32
    return %c0_i32, %c0_i32_0, %c0_i32_1 : i32, i32, i32
  }
  func.func @transform_8(%arg0: i32) -> (i32, i32, i32, i32) {
    %c0_i32 = arith.constant 0 : i32
    %c0_i32_0 = arith.constant 0 : i32
    %c0_i32_1 = arith.constant 0 : i32
    %c0_i32_2 = arith.constant 0 : i32
    %c0_i32_3 = arith.constant 0 : i32
    return %c0_i32, %c0_i32_0, %c0_i32_1, %c0_i32_2 : i32, i32, i32, i32
  }
  func.func @transform_9(%arg0: i32) -> (i32, i32, i32) {
    %c0_i32 = arith.constant 0 : i32
    %c0_i32_0 = arith.constant 0 : i32
    %c0_i32_1 = arith.constant 0 : i32
    %c0_i32_2 = arith.constant 0 : i32
    return %c0_i32, %c0_i32_0, %c0_i32_1 : i32, i32, i32
  }
  func.func @transform_10(%arg0: i32) -> (i32, i32, i32) {
    %c0_i32 = arith.constant 0 : i32
    %c0_i32_0 = arith.constant 0 : i32
    %c0_i32_1 = arith.constant 0 : i32
    %c0_i32_2 = arith.constant 0 : i32
    return %c0_i32, %c0_i32_0, %c0_i32_1 : i32, i32, i32
  }
  func.func @transform_11(%arg0: i32) -> (i32, i32) {
    %c0_i32 = arith.constant 0 : i32
    %c0_i32_0 = arith.constant 0 : i32
    %c0_i32_1 = arith.constant 0 : i32
    return %c0_i32, %c0_i32_0 : i32, i32
  }
  func.func @transform_12(%arg0: i32) -> (i32, i32) {
    %c0_i32 = arith.constant 0 : i32
    %c0_i32_0 = arith.constant 0 : i32
    %c0_i32_1 = arith.constant 0 : i32
    return %c0_i32, %c0_i32_0 : i32, i32
  }
  func.func @transform_13(%arg0: i32) -> (i32, i32) {
    %c0_i32 = arith.constant 0 : i32
    %c0_i32_0 = arith.constant 0 : i32
    %c0_i32_1 = arith.constant 0 : i32
    return %c0_i32, %c0_i32_0 : i32, i32
  }
  func.func @transform_14(%arg0: i32) -> (i32, i32, i32) {
    %c0_i32 = arith.constant 0 : i32
    %c0_i32_0 = arith.constant 0 : i32
    %c0_i32_1 = arith.constant 0 : i32
    %c0_i32_2 = arith.constant 0 : i32
    return %c0_i32, %c0_i32_0, %c0_i32_1 : i32, i32, i32
  }
  func.func @transform_15(%arg0: i32) -> (i32, i32) {
    %c0_i32 = arith.constant 0 : i32
    %c0_i32_0 = arith.constant 0 : i32
    %c0_i32_1 = arith.constant 0 : i32
    return %c0_i32, %c0_i32_0 : i32, i32
  }
  func.func @transform_16(%arg0: i32) -> (i32, i32) {
    %c0_i32 = arith.constant 0 : i32
    %c0_i32_0 = arith.constant 0 : i32
    %c0_i32_1 = arith.constant 0 : i32
    return %c0_i32, %c0_i32_0 : i32, i32
  }
  func.func @transform_17(%arg0: i32) -> (i32, i32) {
    %c0_i32 = arith.constant 0 : i32
    %c0_i32_0 = arith.constant 0 : i32
    %c0_i32_1 = arith.constant 0 : i32
    return %c0_i32, %c0_i32_0 : i32, i32
  }
  func.func @transform_18(%arg0: i32) -> (i32, i32) {
    %c0_i32 = arith.constant 0 : i32
    %c0_i32_0 = arith.constant 0 : i32
    %c0_i32_1 = arith.constant 0 : i32
    return %c0_i32, %c0_i32_0 : i32, i32
  }
  func.func @transform_19(%arg0: i32) -> (i32, i32) {
    %c0_i32 = arith.constant 0 : i32
    %c0_i32_0 = arith.constant 0 : i32
    %c0_i32_1 = arith.constant 0 : i32
    return %c0_i32, %c0_i32_0 : i32, i32
  }
  func.func @transform_20(%arg0: i32) -> (i32, i32, i32) {
    %c0_i32 = arith.constant 0 : i32
    %c0_i32_0 = arith.constant 0 : i32
    %c0_i32_1 = arith.constant 0 : i32
    return %arg0, %c0_i32, %c0_i32_0 : i32, i32, i32
  }
  func.func @transform_21(%arg0: i32) -> (i32, i32, i32) {
    %c0_i32 = arith.constant 0 : i32
    %c0_i32_0 = arith.constant 0 : i32
    %c0_i32_1 = arith.constant 0 : i32
    return %arg0, %c0_i32, %c0_i32_0 : i32, i32, i32
  }
}

</mosaic_0001>

<bundles_post_ra>
// kernel: dynamics_forward.1
= control target key start
LH: loop header
LB: loop body
LE: loop exit
PB: predicated region body
PF: predicated region fallthrough
CT: control target
= control target key end

     0   :  { %s8722_s0 = inlined_call_operand.vmem [shape: f32[2,8,64], index: 0, kind: input, shape index: {}]   ;;  %s8723_s1 = inlined_call_operand.vmem [shape: f32[9,64,64], index: 1, kind: input, shape index: {}]   ;;  %s8724_s2 = inlined_call_operand.hbm [shape: f32[9,7,8], index: 2, kind: input, shape index: {}]   ;;  %s8725_s3 = inlined_call_operand.vmem [shape: f32[7,1], index: 3, kind: input, shape index: {}]   ;;  %s8726_s4 = inlined_call_operand.vmem [shape: f32[7,1], index: 4, kind: input, shape index: {}]   ;;  %s8727_s5 = inlined_call_operand.hbm [shape: f32[1,9,7,7], index: 5, kind: input, shape index: {}]   ;;  %s8728_s6 = inlined_call_operand.vmem [shape: f32[1,7,1], index: 6, kind: input, shape index: {}]   ;;  %s8729_s7 = inlined_call_operand.vmem [shape: f32[1,7,1], index: 7, kind: input, shape index: {}]   ;;  %s8730_s8 = inlined_call_operand.hbm [shape: f32[1,9,7,7], index: 8, kind: input, shape index: {}]   ;;  %s8731_s9 = inlined_call_operand.vmem [shape: f32[1,7,1], index: 9, kind: input, shape index: {}]   ;;  %s8732_s10 = inlined_call_operand.vmem [shape: f32[1,7,1], index: 10, kind: input, shape index: {}]   ;;  %s8733_s11 = inlined_call_operand.vmem [shape: f32[4,7], index: 11, kind: input, shape index: {}]   ;;  %s8734_s12 = inlined_call_operand.vmem [shape: f32[4,1], index: 12, kind: input, shape index: {}]   ;;  %s8735_s13 = inlined_call_operand.vmem [shape: f32[4,1], index: 13, kind: input, shape index: {}]   ;;  %s8736_s14 = inlined_call_operand.vmem [shape: f32[4,64,32], index: 14, kind: input, shape index: {}]   ;;  %s8737_s15 = inlined_call_operand.vmem [shape: f32[1,32], index: 15, kind: input, shape index: {}]   ;;  %s8738_s16 = inlined_call_operand.vmem [shape: f32[1,32], index: 16, kind: input, shape index: {}]   ;;  %s8739_s17 = inlined_call_operand.vmem [shape: f32[1,32], index: 17, kind: input, shape index: {}]   ;;  %s8740_s18 = inlined_call_operand.vmem [shape: f32[32,21], index: 18, kind: input, shape index: {}]   ;;  %s8741_s19 = inlined_call_operand.vmem [shape: f32[1,21], index: 19, kind: input, shape index: {}]   ;;  %s8742_s20 = inlined_call_operand.vmem [shape: f32[2,7,64], index: 20, kind: output, shape index: {0}]   ;;  %s8743_s21 = inlined_call_operand.hbm [shape: f32[2,1,21], index: 21, kind: output, shape index: {1}]  }
   0x1   :  { %8777 = sst [smem:[#allocation39_spill]] %s8722_s0 }
   0x2   :  { %8778 = sst [smem:[#allocation40_spill]] %s8723_s1 }
   0x3   :  { %8779 = sst [smem:[#allocation41_spill]] %s8724_s2 }
   0x4   :  { %8780 = sst [smem:[#allocation42_spill]] %s8725_s3 }
   0x5   :  { %8781 = sst [smem:[#allocation43_spill]] %s8726_s4 }
   0x6   :  { %8782 = sst [smem:[#allocation44_spill]] %s8727_s5 }
   0x7   :  { %8783 = sst [smem:[#allocation45_spill]] %s8741_s19 }
   0x8   :  { %8784 = sst [smem:[#allocation46_spill]] %s8743_s21 }
   0x9   :  { %27 = vsyncpa [#allocation3], 0 }
   0xa   :  { %28 = vsyncpa [#allocation6], 0 }
   0xb   :  { %29 = vsyncpa [#allocation4], 0 }
   0xc   :  { %31 = vsyncpa [#allocation4 + $0x1], 0  ;;  %s7178_s2 = smov 0   ;;  %s7180_s25 = smov 0  }
   0xd   :  { %s7182_s26 = smov 0   ;;  %s7184_s27 = smov 0  }
   0xe LB: > { %8785 = sst [smem:[#allocation12_spill]] %s7045_s2  ;;  %s7199_s3 = sadd.s32 4294967295, %s7057_s27   ;;  %s7057_s27 = sphi %s7184_s27, %s8855_s27   ;;  %s7053_s26 = sphi %s7182_s26, %s8857_s26   ;;  %s7049_s25 = sphi %s7180_s25, %s8859_s25   ;;  %s7045_s2 = sphi %s7178_s2, %s8858_s2  }
   0xf   : > { %8786 = sst [smem:[#allocation13_spill]] %s7053_s26  ;;  %s5500_s28 = sadd.s32 4294967294, %s7057_s27  }
  0x10   : > { %8787 = sst [smem:[#allocation14_spill]] %s7057_s27  ;;  %s7203_s29 = sadd.s32 1, %s7057_s27  }
  0x11   : > { %8788 = sst [smem:[#allocation15_spill]] %s7203_s29  ;;  %s495_s0 = sadd.s32 1, %s7053_s26 }
  0x12   : > { %s492_s4 = ssub.s32 %s7057_s27, %s7203_s29  ;;  %p505_p0 = scmp.ne.s32.totalorder %s7053_s26, %s7049_s25 }
  0x13   : > { %p493_p1 = scmp.eq.s32.totalorder %s492_s4, 0  ;;  %p506_p2 = scmp.eq.s32.totalorder %s7199_s3, 1 }
  0x14   : > { %p511_p3 = scmp.ne.s32.totalorder %s7049_s25, %s7045_s2  ;;  %p512_p4 = scmp.eq.s32.totalorder %s5500_s28, 1 }
  0x15   : > { %s7214_s30 = scalar_select %p493_p1, %s7053_s26, %s495_s0  }
  0x16   : > { %p7216_p5 = por %p506_p2, %p505_p0  ;;  %p7220_p6 = por %p512_p4, %p511_p3 }
  0x17   : > { %8789 = sst [smem:[#allocation16_spill]] %s7214_s30  ;;  %p5501_p7 = scmp.ge.s32.totalorder %s7057_s27, 1 }
  0x18   : > { %s8790_s5 = scalar_select %p7216_p5, 1, 0 }
  0x19   : > { %s8791_s22 = scalar_select %p7220_p6, 1, 0 }
  0x1a   : > { %p519_p8 = scmp.lt.s32.totalorder %s7057_s27, 3  ;;  %p8751_p9 = scmp.eq.s32.totalorder %s7199_s3, 0 }
  0x1b   : > { %8792 = sst [smem:[#allocation17_spill]] %s8791_s22  ;;  %s7059_s1 = smov [#allocation5]  }
  0x1c   : > { %p7227_p10 = pnand %p5501_p7, %p519_p8  ;;  %s553_s24 = sshll.u32 %s7059_s1, 4  ;;  %s554_s24 = int_to_ptr.vmem [resolvable:$true] %s553_s24 }
  0x1d   : > { %s7060_s0 = smov [#allocation2]   ;;  %s7061_s30 = smov [#allocation7]  }
  0x1e   : > { %p6776_p11 = pneg %p7227_p10  ;;  %s534_s4 = sshll.u32 %s7060_s0, 4  ;;  %s535_s4 = int_to_ptr.vmem [resolvable:$true] %s534_s4 }
  0x1f   : > { %s572_s26 = sshll.u32 %s7061_s30, 4  ;;  %s6922_s29 = scalar_lea.vmem %s554_s24, 1152  ;;  %s573_s26 = int_to_ptr.vmem [resolvable:$true] %s572_s26 }
  0x20   : > { %p7235_p12 = pnand %p8751_p9, %p6776_p11  ;;  %p6923_p0 = scmp.ne.s32.totalorder %s554_s24, %s6922_s29 }
  0x21   : > { %p6930_p3 = scmp.lt.s32.totalorder %s554_s24, %s554_s24  ;;  %p6931_p4 = scmp.lt.s32.totalorder %s6922_s29, %s6922_s29 }
  0x22   : > { %p6913_p13 = pneg %p7235_p12 }
  0x23   : > { %p6932_p7 = por %p6931_p4, %p6930_p3 }
  0x24   : > { %p6925_p1 = pnand %p6923_p0, %p6913_p13 }
  0x26   : > { %p6926_p2 = pneg %p6925_p1 }
  0x28   : > { %p6933_p8 = pnand %p6932_p7, %p6926_p2 }
  0x2a   : > { %6936 = shalt.err (!%p6933_p8)
}
  0x2b   : > { %s7062_s1 = smov 128   ;;  %s7063_s0 = smov 8  }
  0x2c   : > { %s8795_s2 = sld [smem:[#allocation44_spill]]  ;;  %s6948_s27 = scalar_lea.vmem %s535_s4, 1152 }
  0x2d   : > { %p6949_p11 = scmp.ne.s32.totalorder %s535_s4, %s6948_s27  ;;  %p6956_p9 = scmp.lt.s32.totalorder %s535_s4, %s535_s4 }
  0x2e   : > { %p6957_p6 = scmp.lt.s32.totalorder %s6948_s27, %s6948_s27 }
  0x2f   : > { %p6951_p0 = pnand %p6949_p11, %p6913_p13 }
  0x30   : > { %p6958_p3 = por %p6957_p6, %p6956_p9 }
  0x31   : > { %p6952_p1 = pneg %p6951_p0 }
  0x32   : > { %6782 = dma.hbm_to_vmem [thread:$0]  (!%p7235_p12), %s8795_s2, 1152, %s554_s24, [#allocation6], %s7062_s1, %s7062_s1, %s7063_s0  }
  0x33   : > { %p6959_p2 = pnand %p6958_p3, %p6952_p1 }
  0x35   : > { %6962 = shalt.err (!%p6959_p2)
}
  0x36   : > { %s8796_s19 = sld [smem:[#allocation41_spill]]  ;;  %s6974_s2 = scalar_lea.vmem %s573_s26, 1152 }
  0x37   : > { %p6975_p4 = scmp.ne.s32.totalorder %s573_s26, %s6974_s2  ;;  %p6982_p11 = scmp.lt.s32.totalorder %s573_s26, %s573_s26 }
  0x38   : > { %p6983_p0 = scmp.lt.s32.totalorder %s6974_s2, %s6974_s2 }
  0x39   : > { %p6977_p7 = pnand %p6975_p4, %p6913_p13 }
  0x3a   : > { %p6984_p5 = por %p6983_p0, %p6982_p11 }
  0x3b   : > { %p6978_p8 = pneg %p6977_p7 }
  0x3c   : > { %6779 = dma.hbm_to_vmem [thread:$0]  (!%p7235_p12), %s8796_s19, 1152, %s535_s4, [#allocation3], %s7062_s1, %s7062_s1, %s7063_s0  }
  0x3d   : > { %p6985_p6 = pnand %p6984_p5, %p6978_p8 }
  0x3f   : > { %6988 = shalt.err (!%p6985_p6)
}
  0x40   : > { %6785 = dma.hbm_to_vmem [thread:$0]  (!%p7235_p12), %s8730_s8, 1152, %s573_s26, [#allocation6], %s7062_s1, %s7062_s1, %s7063_s0  }
  0x41   : > { %628 = sbr.rel (%p7227_p10) target bundleno = 4272 (0x10b0), region = 100 }
  0x46   : > { %p8797_p9 = scmp.eq.s32.totalorder %s7199_s3, 0 }
  0x48   : > { %7032 = dma.done.wait (%p8797_p9), [#allocation3], 1152   ;;  %p8798_p13 = pmov %p8797_p9 }
  0x49   : > { %p8799_p1 = pmov %p8797_p9 }
  0x4a   : > { %7034 = vsyncadd (%p8798_p13), [#allocation3], 4294966144 }
  0x4b   : > { %7036 = dma.done.wait (%p8799_p1), [#allocation6], 2304   ;;  %p8800_p5 = pmov %p8799_p1 }
  0x4c   : > { %p698_p3 = scmp.lt.s32.totalorder %s7199_s3, 1  ;;  %v8769_v0 = vmov 0.0   ;;  %vm7065_vm0 = vmmov 0   ;;  %s8801_s24 = sld [smem:[#allocation39_spill]]  ;;  %vm710_vm1 = vcmask 64512   ;;  %vm876_vm2 = vcmask 523264  }
  0x4d   : > { %7038 = vsyncadd (%p8800_p5), [#allocation6], 4294964992  ;;  %6022 = vmatprep.subr.mxu0 %v8769_v0  ;;  %6027 = vmatprep.subr.mxu1 %v8769_v0  ;;  %v709_v2 = vld [vmem:[#allocation2] sm:$0x7f]  ;;  %v793_v3 = vld [vmem:[#allocation2 + $0x8] sm:$0x7f] }
  0x4e   : > { %s7279_s19 = scalar_select %p698_p3, %s7199_s3, 1  ;;  %6024 = vmatprep.mubr.msk.f32.mxu0 %vm7065_vm0, %v8769_v0  ;;  %6029 = vmatprep.mubr.msk.f32.mxu1 %vm7065_vm0, %v8769_v0  ;;  %v1024_v24 = vld [vmem:[#allocation2 + $0x10] sm:$0x7f]  ;;  %v1182_v28 = vld [vmem:[#allocation2 + $0x18] sm:$0x7f]  ;;  %vm2150_vm3 = vcmask 1046528  }
  0x4f   : > { %s8802_s0 = sld [smem:[#allocation40_spill]]  ;;  %v1340_v49 = vld [vmem:[#allocation2 + $0x20] sm:$0x7f]  ;;  %v1498_v52 = vld [vmem:[#allocation2 + $0x28] sm:$0x7f]  ;;  %vm2146_vm4 = vcmask 56320  }
  0x50   : > { %s5510_s21 = sshll.u32 %s7279_s19, 3  ;;  %s8824_s29 = sld [smem:[#allocation42_spill]]  ;;  %vm4858_vm5 = vcmask 522240   ;;  %vm5294_vm6 = vcmask 261120   ;;  %vm5368_vm7 = vcmask 163840  }
  0x51   : > { %s8825_s22 = sld [smem:[#allocation43_spill]]  ;;  %s705_s23 = scalar_lea.vmem %s8742_s20, %s5510_s21 }
  0x52   : > { %s701_s28 = scalar_lea.vmem %s8801_s24, %s5510_s21  ;;  %s5679_s26 = sshll.u32 %s7199_s3, 4 }
  0x53   : > { %v7291_v1 = vld [vmem:[%s701_s28] sm:$0xff]  ;;  %s8849_s1 = sld [smem:[#allocation46_spill]]  ;;  %p8850_p12 = scmp.ne.s32.totalorder %s8790_s5, 0 }
  0x54   : > { %6023 = vmatpush3.msra.mxu0 %v7291_v1  ;;  %6028 = vmatpush3.msra.mxu1 %v7291_v1  ;;  %s7067_s3 = smov [#allocation8]  }
  0x55   : > { %v7298_v4 = vld [vmem:[%s8802_s0 + $0x78] sm:$0xff]  ;;  %6025 = vmatmul.mubr.msk.f32.vlgmr.msra.gmra.mxu0 %vm710_vm1, %v709_v2  ;;  %6030 = vmatmul.mubr.msk.f32.vlgmr.msra.gmra.mxu1 %vm710_vm1, %v793_v3  ;;  %v7312_v6 = vld [vmem:[%s8802_s0 + $0x70] sm:$0xff]  ;;  %v7326_v8 = vld [vmem:[%s8802_s0 + $0x68] sm:$0xff]  ;;  %s6993_s2 = sshll.u32 %s7067_s3, 4  ;;  %s6994_s2 = int_to_ptr.vmem [resolvable:$false] %s6993_s2 }
  0x56   : > { %v7303_v5 = vld [vmem:[%s8802_s0 + $0x38] sm:$0xff]  ;;  %6032 = vmatprep.subr.mxu0 %v8769_v0  ;;  %6051 = vmatprep.subr.mxu1 %v8769_v0  ;;  %v7317_v7 = vld [vmem:[%s8802_s0 + $0x30] sm:$0xff]  ;;  %v7331_v9 = vld [vmem:[%s8802_s0 + $0x28] sm:$0xff]  ;;  %s6995_s27 = scalar_lea.vmem %s6994_s2, 32 }
  0x57   : > { %6033 = vmatpush3.msra.mxu0 %v7298_v4  ;;  %6052 = vmatpush3.msra.mxu1 %v7303_v5  ;;  %v7340_v10 = vld [vmem:[%s8802_s0 + $0x60] sm:$0xff]  ;;  %v7354_v12 = vld [vmem:[%s8802_s0 + $0x58] sm:$0xff]  ;;  %v7368_v14 = vld [vmem:[%s8802_s0 + $0x50] sm:$0xff] }
  0x58   : > { %6034 = vmatprep.subr.mxu0 %v8769_v0  ;;  %6053 = vmatprep.subr.mxu1 %v8769_v0  ;;  %v7345_v11 = vld [vmem:[%s8802_s0 + $0x20] sm:$0xff]  ;;  %v7359_v13 = vld [vmem:[%s8802_s0 + $0x18] sm:$0xff]  ;;  %v7373_v15 = vld [vmem:[%s8802_s0 + $0x10] sm:$0xff] }
  0x59   : > { %6035 = vmatpush3.msra.mxu0 %v7312_v6  ;;  %6054 = vmatpush3.msra.mxu1 %v7317_v7  ;;  %v7382_v16 = vld [vmem:[%s8802_s0 + $0x48] sm:$0xff]  ;;  %v7404_v18 = vld [vmem:[%s8802_s0 + $0x40] sm:$0xff]  ;;  %v7418_v22 = vld [vmem:[%s8802_s0 + $0xb8] sm:$0xff]  ;;  %s8687_s19 = scalar_lea.hbm %s8849_s1, %s5679_s26 }
  0x5a   : > { %6036 = vmatprep.subr.mxu0 %v8769_v0  ;;  %6055 = vmatprep.subr.mxu1 %v8769_v0  ;;  %v7387_v17 = vld [vmem:[%s8802_s0 + $0x8] sm:$0xff]  ;;  %v7409_v19 = vld [vmem:[%s8802_s0] sm:$0xff]  ;;  %v7428_v26 = vld [vmem:[%s8802_s0 + $0xb0] sm:$0xff] }
  0x5b   : > { %6037 = vmatpush3.msra.mxu0 %v7326_v8  ;;  %6056 = vmatpush3.msra.mxu1 %v7331_v9  ;;  %v7440_v27 = vld [vmem:[%s8802_s0 + $0xa8] sm:$0xff]  ;;  %v7450_v29 = vld [vmem:[%s8802_s0 + $0xf8] sm:$0xff]  ;;  %v7455_v30 = vld [vmem:[%s8802_s0 + $0xa0] sm:$0xff] }
  0x5c   : > { %6038 = vmatprep.subr.mxu0 %v8769_v0  ;;  %6057 = vmatprep.subr.mxu1 %v8769_v0  ;;  %v7463_v31 = vld [vmem:[%s8802_s0 + $0xf0] sm:$0xff]  ;;  %v7468_v32 = vld [vmem:[%s8802_s0 + $0x98] sm:$0xff]  ;;  %v7477_v33 = vld [vmem:[%s8802_s0 + $0xe8] sm:$0xff] }
  0x5d   : > { %6039 = vmatpush3.msra.mxu0 %v7340_v10  ;;  %6058 = vmatpush3.msra.mxu1 %v7345_v11  ;;  %v7490_v34 = vld [vmem:[%s8802_s0 + $0x90] sm:$0xff]  ;;  %v7495_v35 = vld [vmem:[%s8802_s0 + $0xe0] sm:$0xff]  ;;  %v7504_v36 = vld [vmem:[%s8802_s0 + $0x88] sm:$0xff] }
  0x5e   : > { %6040 = vmatprep.subr.mxu0 %v8769_v0  ;;  %6059 = vmatprep.subr.mxu1 %v8769_v0  ;;  %v7509_v37 = vld [vmem:[%s8802_s0 + $0xd8] sm:$0xff]  ;;  %v7518_v38 = vld [vmem:[%s8802_s0 + $0x80] sm:$0xff]  ;;  %v7523_v39 = vld [vmem:[%s8802_s0 + $0xd0] sm:$0xff] }
  0x5f   : > { %6041 = vmatpush3.msra.mxu0 %v7354_v12  ;;  %6060 = vmatpush3.msra.mxu1 %v7359_v13  ;;  %v7531_v40 = vld [vmem:[%s8802_s0 + $0xc8] sm:$0xff]  ;;  %v7539_v41 = vld [vmem:[%s8802_s0 + $0xc0] sm:$0xff]  ;;  %v7553_v51 = vld [vmem:[%s8802_s0 + $0x138] sm:$0xff] }
  0x60   : > { %6042 = vmatprep.subr.mxu0 %v8769_v0  ;;  %6061 = vmatprep.subr.mxu1 %v8769_v0  ;;  %v7563_v53 = vld [vmem:[%s8802_s0 + $0x130] sm:$0xff]  ;;  %v7570_v55 = vld [vmem:[%s8802_s0 + $0x178] sm:$0xff]  ;;  %v7576_v56 = vld [vmem:[%s8802_s0 + $0x128] sm:$0xff] }
  0x61   : > { %6043 = vmatpush3.msra.mxu0 %v7368_v14  ;;  %6062 = vmatpush3.msra.mxu1 %v7373_v15  ;;  %v7585_v57 = vld [vmem:[%s8802_s0 + $0x170] sm:$0xff]  ;;  %v7592_v58 = vld [vmem:[%s8802_s0 + $0x120] sm:$0xff]  ;;  %v7599_v59 = vld [vmem:[%s8802_s0 + $0x168] sm:$0xff] }
  0x62   : > { %6044 = vmatprep.subr.mxu0 %v8769_v0  ;;  %6063 = vmatprep.subr.mxu1 %v8769_v0  ;;  %v7606_v60 = vld [vmem:[%s8802_s0 + $0x118] sm:$0xff]  ;;  %v7620_v61 = vld [vmem:[%s8802_s0 + $0x110] sm:$0xff]  ;;  %v7625_v62 = vld [vmem:[%s8802_s0 + $0x160] sm:$0xff] }
  0x63   : > { %6045 = vmatpush3.msra.mxu0 %v7382_v16  ;;  %6064 = vmatpush3.msra.mxu1 %v7387_v17  ;;  %v7634_v63 = vld [vmem:[%s8802_s0 + $0x108] sm:$0xff]  ;;  %v7639_v2 = vld [vmem:[%s8802_s0 + $0x158] sm:$0xff]  ;;  %v7648_v3 = vld [vmem:[%s8802_s0 + $0x100] sm:$0xff] }
  0x64   : > { %6046 = vmatprep.subr.mxu0 %v8769_v0  ;;  %6065 = vmatprep.subr.mxu1 %v8769_v0 }
  0x65   : > { %6048 = vmatprep.mubr.msk.f32.mxu0 %vm7065_vm0, %v8769_v0  ;;  %6067 = vmatprep.mubr.msk.f32.mxu1 %vm7065_vm0, %v8769_v0 }
  0x66   : > { %6047 = vmatpush3.msra.mxu0 %v7404_v18  ;;  %6066 = vmatpush3.msra.mxu1 %v7409_v19 }
  0x67   : > { %6070 = vmatprep.subr.mxu0 %v8769_v0  ;;  %6075 = vmatprep.subr.mxu1 %v8769_v0 }
 0x115   : > { %v780_v20 = vpop.f32.mrf.mxu0  ;;  %v863_v21 = vpop.f32.mrf.mxu1 }
 0x116   : > { %6049 = vmatmul.mubr.msk.f32.vlgmr.msra.gmra.mxu0 %vm876_vm2, %v863_v21  ;;  %6068 = vmatmul.mubr.msk.f32.vlgmr.msra.gmra.mxu1 %vm876_vm2, %v780_v20  ;;  %v7653_v20 = vld [vmem:[%s8802_s0 + $0x150] sm:$0xff]  ;;  %v7661_v21 = vld [vmem:[%s8802_s0 + $0x148] sm:$0xff] }
 0x117   : > { %v6031_v23 = vpop.f32.mrf.mxu1  ;;  %6071 = vmatpush3.msra.mxu0 %v7291_v1  ;;  %6072 = vmatprep.mubr.msk.f32.mxu0 %vm7065_vm0, %v8769_v0  ;;  %v6026_v25 = vpop.f32.mrf.mxu0 }
 0x118   : > { %6094 = vmatprep.subr.mxu0 %v8769_v0  ;;  %6076 = vmatpush3.msra.mxu1 %v7418_v22  ;;  %v7669_v23 = vld [vmem:[%s8802_s0 + $0x140] sm:$0xff] }
 0x119   : > { %6077 = vmatprep.subr.mxu1 %v8769_v0  ;;  %6091 = vmatprep.mubr.msk.f32.mxu1 %vm7065_vm0, %v8769_v0 }
 0x11a   : > { %6073 = vmatmul.mubr.msk.f32.vlgmr.msra.gmra.mxu0 %vm710_vm1, %v1024_v24  ;;  %6078 = vmatpush3.msra.mxu1 %v7428_v26 }
 0x11b   : > { %6095 = vmatpush3.msra.mxu0 %v7291_v1  ;;  %6096 = vmatprep.mubr.msk.f32.mxu0 %vm7065_vm0, %v8769_v0 }
 0x11c   : > { %6079 = vmatprep.subr.mxu1 %v8769_v0  ;;  %6099 = vmatprep.subr.mxu0 %v8769_v0 }
 0x11d   : > { %6080 = vmatpush3.msra.mxu1 %v7440_v27 }
 0x11e   : > { %6097 = vmatmul.mubr.msk.f32.vlgmr.msra.gmra.mxu0 %vm710_vm1, %v1182_v28  ;;  %6081 = vmatprep.subr.mxu1 %v8769_v0 }
 0x11f   : > { %6100 = vmatpush3.msra.mxu0 %v7450_v29  ;;  %6082 = vmatpush3.msra.mxu1 %v7455_v30 }
 0x120   : > { %6101 = vmatprep.subr.mxu0 %v8769_v0  ;;  %6083 = vmatprep.subr.mxu1 %v8769_v0 }
 0x121   : > { %6102 = vmatpush3.msra.mxu0 %v7463_v31  ;;  %6084 = vmatpush3.msra.mxu1 %v7468_v32 }
 0x122   : > { %6103 = vmatprep.subr.mxu0 %v8769_v0  ;;  %6085 = vmatprep.subr.mxu1 %v8769_v0 }
 0x123   : > { %6104 = vmatpush3.msra.mxu0 %v7477_v33  ;;  %6115 = vmatprep.mubr.msk.f32.mxu0 %vm7065_vm0, %v8769_v0 }
 0x124   : > { %6105 = vmatprep.subr.mxu0 %v8769_v0  ;;  %6086 = vmatpush3.msra.mxu1 %v7490_v34 }
 0x125   : > { %6106 = vmatpush3.msra.mxu0 %v7495_v35  ;;  %6087 = vmatprep.subr.mxu1 %v8769_v0 }
 0x126   : > { %6107 = vmatprep.subr.mxu0 %v8769_v0  ;;  %6088 = vmatpush3.msra.mxu1 %v7504_v36 }
 0x127   : > { %6108 = vmatpush3.msra.mxu0 %v7509_v37  ;;  %6089 = vmatprep.subr.mxu1 %v8769_v0 }
 0x128   : > { %6109 = vmatprep.subr.mxu0 %v8769_v0  ;;  %6090 = vmatpush3.msra.mxu1 %v7518_v38 }
 0x129   : > { %6110 = vmatpush3.msra.mxu0 %v7523_v39  ;;  %6118 = vmatprep.subr.mxu1 %v8769_v0 }
 0x12a   : > { %6111 = vmatprep.subr.mxu0 %v8769_v0 }
 0x12b   : > { %6112 = vmatpush3.msra.mxu0 %v7531_v40 }
 0x12c   : > { %6113 = vmatprep.subr.mxu0 %v8769_v0 }
 0x12d   : > { %6114 = vmatpush3.msra.mxu0 %v7539_v41 }
 0x12e   : > { %6142 = vmatprep.subr.mxu0 %v8769_v0 }
 0x1d6   : > { %v946_v42 = vpop.f32.mrf.mxu0  ;;  %v1019_v43 = vpop.f32.mrf.mxu1 }
 0x1d7   : > { %v7543_v44 = vadd.f32 %v1019_v43, %v946_v42 }
 0x1d8   : > { %v6050_v45 = vpop.f32.mrf.mxu0  ;;  %v6069_v46 = vpop.f32.mrf.mxu1 }
 0x1da   : > { %v1094_v47 = vpop.f32.mrf.mxu0 }
 0x1db   : > { %6092 = vmatmul.mubr.msk.f32.vlgmr.msra.gmra.mxu1 %vm876_vm2, %v1094_v47 }
 0x1dc   : > { %v6074_v48 = vpop.f32.mrf.mxu0  ;;  %6119 = vmatpush3.msra.mxu1 %v7291_v1  ;;  %6120 = vmatprep.mubr.msk.f32.mxu1 %vm7065_vm0, %v8769_v0 }
 0x1dd   : > { %6123 = vmatprep.subr.mxu1 %v8769_v0  ;;  %v1656_v48 = vld [vmem:[#allocation2 + $0x30] sm:$0x7f] }
 0x1de   : > { %v1252_v50 = vpop.f32.mrf.mxu0 }
 0x1df   : > { %6116 = vmatmul.mubr.msk.f32.vlgmr.msra.gmra.mxu0 %vm876_vm2, %v1252_v50  ;;  %6121 = vmatmul.mubr.msk.f32.vlgmr.msra.gmra.mxu1 %vm710_vm1, %v1340_v49  ;;  %v1814_v50 = vld [vmem:[#allocation2 + $0x38] sm:$0x7f] }
 0x1e0   : > { %6143 = vmatpush3.msra.mxu0 %v7291_v1  ;;  %6144 = vmatprep.mubr.msk.f32.mxu0 %vm7065_vm0, %v8769_v0  ;;  %v6098_v54 = vpop.f32.mrf.mxu0 }
 0x1e1   : > { %6124 = vmatpush3.msra.mxu1 %v7553_v51  ;;  %6147 = vmatprep.subr.mxu0 %v8769_v0 }
 0x1e2   : > { %6125 = vmatprep.subr.mxu1 %v8769_v0  ;;  %6139 = vmatprep.mubr.msk.f32.mxu1 %vm7065_vm0, %v8769_v0 }
 0x1e3   : > { %6145 = vmatmul.mubr.msk.f32.vlgmr.msra.gmra.mxu0 %vm710_vm1, %v1498_v52  ;;  %6126 = vmatpush3.msra.mxu1 %v7563_v53  ;;  %v7694_v52 = vld [vmem:[%s8802_s0 + $0x1b0] sm:$0xff] }
 0x1e4   : > { %6127 = vmatprep.subr.mxu1 %v8769_v0  ;;  %6148 = vmatpush3.msra.mxu0 %v7570_v55  ;;  %8803 = vst [vmem:[#allocation18_spill] sm:$0xff] %v7694_v52 }
 0x1e5   : > { %6128 = vmatpush3.msra.mxu1 %v7576_v56  ;;  %6149 = vmatprep.subr.mxu0 %v8769_v0 }
 0x1e6   : > { %6129 = vmatprep.subr.mxu1 %v8769_v0  ;;  %6150 = vmatpush3.msra.mxu0 %v7585_v57 }
 0x1e7   : > { %6130 = vmatpush3.msra.mxu1 %v7592_v58  ;;  %6151 = vmatprep.subr.mxu0 %v8769_v0 }
 0x1e8   : > { %6131 = vmatprep.subr.mxu1 %v8769_v0  ;;  %6152 = vmatpush3.msra.mxu0 %v7599_v59 }
 0x1e9   : > { %6132 = vmatpush3.msra.mxu1 %v7606_v60  ;;  %6153 = vmatprep.subr.mxu0 %v8769_v0 }
 0x1ea   : > { %6133 = vmatprep.subr.mxu1 %v8769_v0  ;;  %6163 = vmatprep.mubr.msk.f32.mxu0 %vm7065_vm0, %v8769_v0 }
 0x1eb   : > { %6134 = vmatpush3.msra.mxu1 %v7620_v61  ;;  %6154 = vmatpush3.msra.mxu0 %v7625_v62 }
 0x1ec   : > { %6135 = vmatprep.subr.mxu1 %v8769_v0  ;;  %6155 = vmatprep.subr.mxu0 %v8769_v0 }
 0x1ed   : > { %6136 = vmatpush3.msra.mxu1 %v7634_v63  ;;  %6156 = vmatpush3.msra.mxu0 %v7639_v2 }
 0x1ee   : > { %6137 = vmatprep.subr.mxu1 %v8769_v0  ;;  %6157 = vmatprep.subr.mxu0 %v8769_v0 }
 0x1ef   : > { %6138 = vmatpush3.msra.mxu1 %v7648_v3  ;;  %6158 = vmatpush3.msra.mxu0 %v7653_v20 }
 0x1f0   : > { %6159 = vmatprep.subr.mxu0 %v8769_v0  ;;  %6166 = vmatprep.subr.mxu1 %v8769_v0 }
 0x1f1   : > { %6160 = vmatpush3.msra.mxu0 %v7661_v21 }
 0x1f2   : > { %6161 = vmatprep.subr.mxu0 %v8769_v0 }
 0x1f3   : > { %6162 = vmatpush3.msra.mxu0 %v7669_v23 }
 0x1f4   : > { %6190 = vmatprep.subr.mxu0 %v8769_v0 }
 0x29b   : > { %v1176_v24 = vpop.f32.mrf.mxu1 }
 0x29c   : > { %v1180_v25 = vadd.f32 %v1176_v24, %v7543_v44  ;;  %v7684_v44 = vld [vmem:[%s8802_s0 + $0x1b8] sm:$0xff] }
 0x29d   : > { %v6093_v28 = vpop.f32.mrf.mxu1  ;;  %v7701_v24 = vld [vmem:[%s8802_s0 + $0x1f8] sm:$0xff] }
 0x29e   : > { %v7716_v28 = vld [vmem:[%s8802_s0 + $0x1f0] sm:$0xff] }
 0x29f   : > { %v1334_v42 = vpop.f32.mrf.mxu0  ;;  %v1410_v43 = vpop.f32.mrf.mxu1 }
 0x2a0   : > { %v7674_v45 = vadd.f32 %v1334_v42, %v1180_v25  ;;  %6140 = vmatmul.mubr.msk.f32.vlgmr.msra.gmra.mxu1 %vm876_vm2, %v1410_v43  ;;  %v7707_v25 = vld [vmem:[%s8802_s0 + $0x1a8] sm:$0xff]  ;;  %v7723_v42 = vld [vmem:[%s8802_s0 + $0x1a0] sm:$0xff] }
 0x2a1   : > { %v6117_v46 = vpop.f32.mrf.mxu0  ;;  %v6122_v47 = vpop.f32.mrf.mxu1  ;;  %6167 = vmatpush3.msra.mxu1 %v7291_v1  ;;  %6168 = vmatprep.mubr.msk.f32.mxu1 %vm7065_vm0, %v8769_v0  ;;  %8804 = vst [vmem:[#allocation19_spill] sm:$0xff] %v7707_v25  ;;  %8805 = vst [vmem:[#allocation20_spill] sm:$0xff] %v7723_v42  ;;  %v7730_v43 = vld [vmem:[%s8802_s0 + $0x1e8] sm:$0xff] }
 0x2a2   : > { %6171 = vmatprep.subr.mxu1 %v8769_v0  ;;  %8806 = vst [vmem:[#allocation21_spill] sm:$0xff] %v7730_v43  ;;  %v7737_v46 = vld [vmem:[%s8802_s0 + $0x198] sm:$0xff]  ;;  %v7751_v47 = vld [vmem:[%s8802_s0 + $0x190] sm:$0xff] }
 0x2a3   : > { %v1568_v49 = vpop.f32.mrf.mxu0  ;;  %8807 = vst [vmem:[#allocation22_spill] sm:$0xff] %v7737_v46  ;;  %8808 = vst [vmem:[#allocation23_spill] sm:$0xff] %v7751_v47 }
 0x2a4   : > { %6164 = vmatmul.mubr.msk.f32.vlgmr.msra.gmra.mxu0 %vm876_vm2, %v1568_v49  ;;  %6169 = vmatmul.mubr.msk.f32.vlgmr.msra.gmra.mxu1 %vm710_vm1, %v1656_v48  ;;  %v7756_v48 = vld [vmem:[%s8802_s0 + $0x1e0] sm:$0xff]  ;;  %v7765_v49 = vld [vmem:[%s8802_s0 + $0x188] sm:$0xff] }
 0x2a5   : > { %6191 = vmatpush3.msra.mxu0 %v7291_v1  ;;  %6192 = vmatprep.mubr.msk.f32.mxu0 %vm7065_vm0, %v8769_v0  ;;  %v6146_v54 = vpop.f32.mrf.mxu0  ;;  %8809 = vst [vmem:[#allocation24_spill] sm:$0xff] %v7756_v48  ;;  %8810 = vst [vmem:[#allocation25_spill] sm:$0xff] %v7765_v49 }
 0x2a6   : > { %6172 = vmatpush3.msra.mxu1 %v7684_v44  ;;  %6195 = vmatprep.subr.mxu0 %v8769_v0  ;;  %v7779_v54 = vld [vmem:[%s8802_s0 + $0x180] sm:$0xff] }
 0x2a7   : > { %6173 = vmatprep.subr.mxu1 %v8769_v0  ;;  %6187 = vmatprep.mubr.msk.f32.mxu1 %vm7065_vm0, %v8769_v0  ;;  %8812 = vst [vmem:[#allocation27_spill] sm:$0xff] %v7779_v54 }
 0x2a8   : > { %6193 = vmatmul.mubr.msk.f32.vlgmr.msra.gmra.mxu0 %vm710_vm1, %v1814_v50  ;;  %6174 = vmatpush3.msra.mxu1 %v7694_v52  ;;  %v7770_v50 = vld [vmem:[%s8802_s0 + $0x1d8] sm:$0xff] }
 0x2a9   : > { %6175 = vmatprep.subr.mxu1 %v8769_v0  ;;  %6196 = vmatpush3.msra.mxu0 %v7701_v24  ;;  %8811 = vst [vmem:[#allocation26_spill] sm:$0xff] %v7770_v50 }
 0x2aa   : > { %6176 = vmatpush3.msra.mxu1 %v7707_v25  ;;  %6197 = vmatprep.subr.mxu0 %v8769_v0 }
 0x2ab   : > { %6177 = vmatprep.subr.mxu1 %v8769_v0  ;;  %6198 = vmatpush3.msra.mxu0 %v7716_v28 }
 0x2ac   : > { %6178 = vmatpush3.msra.mxu1 %v7723_v42  ;;  %6199 = vmatprep.subr.mxu0 %v8769_v0 }
 0x2ad   : > { %6179 = vmatprep.subr.mxu1 %v8769_v0  ;;  %6200 = vmatpush3.msra.mxu0 %v7730_v43  ;;  %v1972_v43 = vld [vmem:[#allocation2 + $0x40] sm:$0x7f] }
 0x2ae   : > { %6180 = vmatpush3.msra.mxu1 %v7737_v46  ;;  %6201 = vmatprep.subr.mxu0 %v8769_v0  ;;  %v7800_v46 = vld [vmem:[%s8802_s0 + $0x1c0] sm:$0xff] }
 0x2af   : > { %6181 = vmatprep.subr.mxu1 %v8769_v0  ;;  %6211 = vmatprep.mubr.msk.f32.mxu0 %vm7065_vm0, %v8769_v0  ;;  %8815 = vst [vmem:[#allocation30_spill] sm:$0xff] %v7800_v46 }
 0x2b0   : > { %6182 = vmatpush3.msra.mxu1 %v7751_v47  ;;  %6202 = vmatpush3.msra.mxu0 %v7756_v48  ;;  %v7784_v47 = vld [vmem:[%s8802_s0 + $0x1d0] sm:$0xff] }
 0x2b1   : > { %6183 = vmatprep.subr.mxu1 %v8769_v0  ;;  %6203 = vmatprep.subr.mxu0 %v8769_v0  ;;  %8813 = vst [vmem:[#allocation28_spill] sm:$0xff] %v7784_v47 }
 0x2b2   : > { %6184 = vmatpush3.msra.mxu1 %v7765_v49  ;;  %6204 = vmatpush3.msra.mxu0 %v7770_v50  ;;  %v7792_v49 = vld [vmem:[%s8802_s0 + $0x1c8] sm:$0xff] }
 0x2b3   : > { %6185 = vmatprep.subr.mxu1 %v8769_v0  ;;  %6205 = vmatprep.subr.mxu0 %v8769_v0  ;;  %8814 = vst [vmem:[#allocation29_spill] sm:$0xff] %v7792_v49 }
 0x2b4   : > { %6186 = vmatpush3.msra.mxu1 %v7779_v54  ;;  %6206 = vmatpush3.msra.mxu0 %v7784_v47 }
 0x2b5   : > { %6207 = vmatprep.subr.mxu0 %v8769_v0  ;;  %6214 = vmatprep.subr.mxu1 %v8769_v0 }
 0x2b6   : > { %6208 = vmatpush3.msra.mxu0 %v7792_v49 }
 0x2b7   : > { %6209 = vmatprep.subr.mxu0 %v8769_v0 }
 0x2b8   : > { %6210 = vmatpush3.msra.mxu0 %v7800_v46  ;;  %v8826_v46 = vmov 0.0  }
 0x2b9   : > { %6238 = vmatprep.subr.mxu0 %v8769_v0 }
 0x360   : > { %v1492_v54 = vpop.f32.mrf.mxu1 }
 0x361   : > { %v1496_v47 = vadd.f32 %v1492_v54, %v7674_v45  ;;  %v7813_v45 = vld [vmem:[%s8802_s0 + $0x238] sm:$0xff]  ;;  %v7861_v54 = vld [vmem:[%s8802_s0 + $0x208] sm:$0xff] }
 0x362   : > { %v6141_v42 = vpop.f32.mrf.mxu1  ;;  %8816 = vst [vmem:[#allocation31_spill] sm:$0xff] %v7813_v45  ;;  %8822 = vst [vmem:[#allocation37_spill] sm:$0xff] %v7861_v54 }
 0x364   : > { %v1650_v50 = vpop.f32.mrf.mxu0  ;;  %v1726_v25 = vpop.f32.mrf.mxu1 }
 0x365   : > { %v1654_v48 = vadd.f32 %v1650_v50, %v1496_v47  ;;  %6188 = vmatmul.mubr.msk.f32.vlgmr.msra.gmra.mxu1 %vm876_vm2, %v1726_v25  ;;  %v7829_v47 = vld [vmem:[%s8802_s0 + $0x228] sm:$0xff]  ;;  %v7854_v50 = vld [vmem:[%s8802_s0 + $0x210] sm:$0xff] }
 0x366   : > { %v6165_v49 = vpop.f32.mrf.mxu0  ;;  %v6170_v52 = vpop.f32.mrf.mxu1  ;;  %6215 = vmatpush3.msra.mxu1 %v7291_v1  ;;  %6216 = vmatprep.mubr.msk.f32.mxu1 %vm7065_vm0, %v8769_v0  ;;  %8818 = vst [vmem:[#allocation33_spill] sm:$0xff] %v7829_v47  ;;  %8821 = vst [vmem:[#allocation36_spill] sm:$0xff] %v7854_v50 }
 0x367   : > { %6219 = vmatprep.subr.mxu1 %v8769_v0  ;;  %v7820_v52 = vld [vmem:[%s8802_s0 + $0x230] sm:$0xff]  ;;  %v7845_v49 = vld [vmem:[%s8802_s0 + $0x218] sm:$0xff] }
 0x368   : > { %v1884_v42 = vpop.f32.mrf.mxu0  ;;  %8817 = vst [vmem:[#allocation32_spill] sm:$0xff] %v7820_v52  ;;  %8820 = vst [vmem:[#allocation35_spill] sm:$0xff] %v7845_v49 }
 0x369   : > { %6212 = vmatmul.mubr.msk.f32.vlgmr.msra.gmra.mxu0 %vm876_vm2, %v1884_v42  ;;  %6217 = vmatmul.mubr.msk.f32.vlgmr.msra.gmra.mxu1 %vm710_vm1, %v1972_v43  ;;  %v7838_v43 = vld [vmem:[%s8802_s0 + $0x220] sm:$0xff] }
 0x36a   : > { %6220 = vmatpush3.msra.mxu1 %v7813_v45  ;;  %v6194_v25 = vpop.f32.mrf.mxu0  ;;  %6235 = vmatprep.mubr.msk.f32.mxu1 %vm7065_vm0, %v8769_v0  ;;  %8819 = vst [vmem:[#allocation34_spill] sm:$0xff] %v7838_v43  ;;  %v7868_v42 = vld [vmem:[%s8802_s0 + $0x200] sm:$0xff] }
 0x36b   : > { %6221 = vmatprep.subr.mxu1 %v8769_v0  ;;  %6240 = vmatprep.mubr.msk.f32.mxu0 %vm7065_vm0, %v8769_v0  ;;  %8823 = vst [vmem:[#allocation38_spill] sm:$0xff] %v7868_v42  ;;  %v707_v25 = vld [vmem:[%s8824_s29] sm:$0x7f]  ;;  %s696_s29 = sand.u32 1, %s7049_s25  }
 0x36c   : > { %6222 = vmatpush3.msra.mxu1 %v7820_v52  ;;  %s5375_s30 = scalar_lea.sflag [#allocation4], %s696_s29 }
 0x36d   : > { %6223 = vmatprep.subr.mxu1 %v8769_v0 }
 0x36e   : > { %6224 = vmatpush3.msra.mxu1 %v7829_v47 }
 0x36f   : > { %6225 = vmatprep.subr.mxu1 %v8769_v0 }
 0x370   : > { %6226 = vmatpush3.msra.mxu1 %v7838_v43 }
 0x371   : > { %6227 = vmatprep.subr.mxu1 %v8769_v0 }
 0x372   : > { %6228 = vmatpush3.msra.mxu1 %v7845_v49  ;;  %v3501_v49 = vld [vmem:[%s8731_s9] sm:$0x7f] }
 0x373   : > { %6229 = vmatprep.subr.mxu1 %v8769_v0 }
 0x374   : > { %6230 = vmatpush3.msra.mxu1 %v7854_v50  ;;  %v7066_v50 = vmov 0  }
 0x375   : > { %6231 = vmatprep.subr.mxu1 %v8769_v0  ;;  %6837 = vset.pattern.permute.xlu0 %v7066_v50 }
 0x376   : > { %6232 = vmatpush3.msra.mxu1 %v7861_v54  ;;  %6838 = vset.pattern.permute.xlu1 %v7066_v50  ;;  %v708_v54 = vld [vmem:[%s8825_s22] sm:$0x7f]  ;;  %s8848_s22 = sld [smem:[#allocation45_spill]] }
 0x377   : > { %6233 = vmatprep.subr.mxu1 %v8769_v0  ;;  %2131 = vperm.xlu0 %6837, %v707_v25  }
 0x378   : > { %6234 = vmatpush3.msra.mxu1 %v7868_v42 }
 0x379   : > { %6267 = vmatprep.subr.mxu1 %v8769_v0  ;;  %v4937_v0 = vld [vmem:[%s8734_s12] sm:$0xf] }
 0x37b   : > { %2137 = vperm.xlu0 %6837, %v708_v54  }
 0x37f   : > { %4846 = vperm.xlu0 %6837, %v3501_v49  }
 0x383   : > { %4940 = vperm.xlu0 %6837, %v4937_v0  }
 0x3f2   : > { %v2132_v0 = vpop.permute.xlu0 %2131 }
 0x425   : > { %v1808_v42 = vpop.f32.mrf.mxu1 }
 0x426   : > { %v1812_v43 = vadd.f32 %v1808_v42, %v1654_v48 }
 0x427   : > { %v6189_v47 = vpop.f32.mrf.mxu1 }
 0x428   : > { %v2145_v47 = vld [vmem:[#allocation5] sm:$0x7f] }
 0x429   : > { %v1966_v50 = vpop.f32.mrf.mxu0  ;;  %v2042_v25 = vpop.f32.mrf.mxu1 }
 0x42a   : > { %v1970_v52 = vadd.f32 %v1966_v50, %v1812_v43  ;;  %6236 = vmatmul.mubr.msk.f32.vlgmr.msra.gmra.mxu1 %vm876_vm2, %v2042_v25 }
 0x42b   : > { %v6218_v45 = vpop.f32.mrf.mxu1  ;;  %v6213_v54 = vpop.f32.mrf.mxu0  ;;  %6268 = vmatpush3.msra.mxu1 %v7303_v5  ;;  %6283 = vmatprep.mubr.msk.f32.mxu1 %vm7065_vm0, %v8826_v46 }
 0x42c   : > { %6269 = vmatprep.subr.mxu1 %v8826_v46 }
 0x42d   : > { %6270 = vmatpush3.msra.mxu1 %v7317_v7 }
 0x42e   : > { %6271 = vmatprep.subr.mxu1 %v8826_v46 }
 0x42f   : > { %6272 = vmatpush3.msra.mxu1 %v7331_v9 }
 0x430   : > { %6273 = vmatprep.subr.mxu1 %v8826_v46 }
 0x431   : > { %6274 = vmatpush3.msra.mxu1 %v7345_v11 }
 0x432   : > { %6275 = vmatprep.subr.mxu1 %v8826_v46 }
 0x433   : > { %6276 = vmatpush3.msra.mxu1 %v7359_v13  ;;  %v2138_v13 = vpop.permute.xlu0 %2137 }
 0x434   : > { %6277 = vmatprep.subr.mxu1 %v8826_v46 }
 0x435   : > { %6278 = vmatpush3.msra.mxu1 %v7373_v15 }
 0x436   : > { %6279 = vmatprep.subr.mxu1 %v8826_v46 }
 0x437   : > { %6280 = vmatpush3.msra.mxu1 %v7387_v17  ;;  %v2225_v17 = vld [vmem:[#allocation5 + $0x8] sm:$0x7f] }
 0x438   : > { %6281 = vmatprep.subr.mxu1 %v8826_v46 }
 0x439   : > { %6282 = vmatpush3.msra.mxu1 %v7409_v19 }
 0x43a   : > { %6310 = vmatprep.subr.mxu1 %v8826_v46 }
 0x4ea   : > { %v2124_v5 = vpop.f32.mrf.mxu1 }
 0x4eb   : > { %v2128_v7 = vadd.f32 %v2124_v5, %v1970_v52  ;;  %v8840_v5 = vld [vmem:[#allocation31_spill] sm:$0xff] }
 0x4ec   : > { %v6237_v9 = vpop.f32.mrf.mxu1 }
 0x4ed   : > { %v2134_v11 = vmul.f32 %v2132_v0, %v2128_v7  ;;  %v3340_v0 = vld [vmem:[#allocation5 + $0x40] sm:$0x7f]  ;;  %v8842_v9 = vld [vmem:[#allocation33_spill] sm:$0xff] }
 0x4ee   : > { %v8841_v7 = vld [vmem:[#allocation32_spill] sm:$0xff] }
 0x4ef   : > { %v2140_v48 = vadd.f32 %v2138_v13, %v2134_v11  ;;  %v8843_v11 = vld [vmem:[#allocation34_spill] sm:$0xff]  ;;  %v8844_v13 = vld [vmem:[#allocation35_spill] sm:$0xff] }
 0x4f1   : > { %v2141_v45 = vadd.f32 %v2140_v48, %v7291_v1  ;;  %v8845_v48 = vld [vmem:[#allocation36_spill] sm:$0xff] }
 0x4f3   : > { %v7904_v15 = vmax.f32 %v2141_v45, 0.0  ;;  %v8846_v45 = vld [vmem:[#allocation37_spill] sm:$0xff] }
 0x4f5   : > { %6239 = vmatpush3.msk.msra.mxu0 %vm2150_vm3, %v7904_v15 }
 0x4f6   : > { %6241 = vmatmul.mubr.msk.f32.vlgmr.msra.gmra.mxu0 %vm2146_vm4, %v2145_v47  ;;  %6243 = vmatprep.subr.mxu0 %v8826_v46  ;;  %v8847_v47 = vld [vmem:[#allocation38_spill] sm:$0xff] }
 0x4f7   : > { %6244 = vmatpush3.msk.msra.mxu0 %vm2150_vm3, %v7904_v15  ;;  %6245 = vmatprep.mubr.msk.f32.mxu0 %vm7065_vm0, %v8826_v46 }
 0x4f8   : > { %6248 = vmatprep.subr.mxu0 %v8826_v46 }
 0x4fa   : > { %6246 = vmatmul.mubr.msk.f32.vlgmr.msra.gmra.mxu0 %vm2146_vm4, %v2225_v17  ;;  %v2143_v17 = vld [vmem:[%s8728_s6] sm:$0x7f] }
 0x4fb   : > { %6249 = vmatpush3.msra.mxu0 %v7298_v4  ;;  %6264 = vmatprep.mubr.msk.f32.mxu0 %vm7065_vm0, %v8826_v46 }
 0x4fc   : > { %6250 = vmatprep.subr.mxu0 %v8826_v46  ;;  %3490 = vperm.xlu1 %6838, %v2143_v17  }
 0x4fd   : > { %6251 = vmatpush3.msra.mxu0 %v7312_v6  ;;  %v2595_v6 = vld [vmem:[#allocation5 + $0x18] sm:$0x7f] }
 0x4fe   : > { %6252 = vmatprep.subr.mxu0 %v8826_v46 }
 0x4ff   : > { %6253 = vmatpush3.msra.mxu0 %v7326_v8 }
 0x500   : > { %6254 = vmatprep.subr.mxu0 %v8826_v46 }
 0x501   : > { %6255 = vmatpush3.msra.mxu0 %v7340_v10 }
 0x502   : > { %6256 = vmatprep.subr.mxu0 %v8826_v46 }
 0x503   : > { %6257 = vmatpush3.msra.mxu0 %v7354_v12  ;;  %v2446_v12 = vld [vmem:[#allocation5 + $0x10] sm:$0x7f] }
 0x504   : > { %6258 = vmatprep.subr.mxu0 %v8826_v46 }
 0x505   : > { %6259 = vmatpush3.msra.mxu0 %v7368_v14 }
 0x506   : > { %6260 = vmatprep.subr.mxu0 %v8826_v46 }
 0x507   : > { %6261 = vmatpush3.msra.mxu0 %v7382_v16 }
 0x508   : > { %6262 = vmatprep.subr.mxu0 %v8826_v46 }
 0x509   : > { %6263 = vmatpush3.msra.mxu0 %v7404_v18 }
 0x50a   : > { %6286 = vmatprep.subr.mxu0 %v8826_v46 }
 0x5b6   : > { %v2220_v1 = vpop.f32.mrf.mxu0 }
 0x5b7   : > { %6284 = vmatmul.mubr.msk.f32.vlgmr.msra.gmra.mxu1 %vm876_vm2, %v2220_v1  ;;  %v2144_v1 = vld [vmem:[%s8729_s7] sm:$0x7f] }
 0x5b8   : > { %6311 = vmatpush3.msk.msra.mxu1 %vm2150_vm3, %v7904_v15  ;;  %v6242_v4 = vpop.f32.mrf.mxu0  ;;  %6312 = vmatprep.mubr.msk.f32.mxu1 %vm7065_vm0, %v8826_v46 }
 0x5b9   : > { %6315 = vmatprep.subr.mxu1 %v8826_v46  ;;  %3496 = vperm.xlu1 %6838, %v2144_v1   ;;  %v3502_v4 = vld [vmem:[%s8732_s10] sm:$0x7f] }
 0x5ba   : > { %v2295_v8 = vpop.f32.mrf.mxu0 }
 0x5bb   : > { %6265 = vmatmul.mubr.msk.f32.vlgmr.msra.gmra.mxu0 %vm876_vm2, %v2295_v8  ;;  %6313 = vmatmul.mubr.msk.f32.vlgmr.msra.gmra.mxu1 %vm2146_vm4, %v2595_v6  ;;  %v4944_v6 = vld [vmem:[%s8735_s13] sm:$0xf] }
 0x5bc   : > { %6287 = vmatpush3.msk.msra.mxu0 %vm2150_vm3, %v7904_v15  ;;  %v6247_v10 = vpop.f32.mrf.mxu0  ;;  %6288 = vmatprep.mubr.msk.f32.mxu0 %vm7065_vm0, %v8826_v46 }
 0x5bd   : > { %6316 = vmatpush3.msra.mxu1 %v7450_v29  ;;  %6291 = vmatprep.subr.mxu0 %v8826_v46 }
 0x5be   : > { %6317 = vmatprep.subr.mxu1 %v8826_v46  ;;  %6331 = vmatprep.mubr.msk.f32.mxu1 %vm7065_vm0, %v8826_v46 }
 0x5bf   : > { %6289 = vmatmul.mubr.msk.f32.vlgmr.msra.gmra.mxu0 %vm2146_vm4, %v2446_v12  ;;  %6318 = vmatpush3.msra.mxu1 %v7463_v31 }
 0x5c0   : > { %6319 = vmatprep.subr.mxu1 %v8826_v46  ;;  %6292 = vmatpush3.msra.mxu0 %v7418_v22 }
 0x5c1   : > { %6320 = vmatpush3.msra.mxu1 %v7477_v33  ;;  %6293 = vmatprep.subr.mxu0 %v8826_v46 }
 0x5c2   : > { %6321 = vmatprep.subr.mxu1 %v8826_v46  ;;  %6294 = vmatpush3.msra.mxu0 %v7428_v26 }
 0x5c3   : > { %6322 = vmatpush3.msra.mxu1 %v7495_v35  ;;  %6295 = vmatprep.subr.mxu0 %v8826_v46 }
 0x5c4   : > { %6323 = vmatprep.subr.mxu1 %v8826_v46  ;;  %6296 = vmatpush3.msra.mxu0 %v7440_v27  ;;  %v2893_v27 = vld [vmem:[#allocation5 + $0x28] sm:$0x7f] }
 0x5c5   : > { %6324 = vmatpush3.msra.mxu1 %v7509_v37  ;;  %6297 = vmatprep.subr.mxu0 %v8826_v46 }
 0x5c6   : > { %6325 = vmatprep.subr.mxu1 %v8826_v46  ;;  %6298 = vmatpush3.msra.mxu0 %v7455_v30 }
 0x5c7   : > { %6326 = vmatpush3.msra.mxu1 %v7523_v39  ;;  %6299 = vmatprep.subr.mxu0 %v8826_v46  ;;  %v3191_v39 = vld [vmem:[#allocation5 + $0x38] sm:$0x7f] }
 0x5c8   : > { %6327 = vmatprep.subr.mxu1 %v8826_v46  ;;  %6300 = vmatpush3.msra.mxu0 %v7468_v32  ;;  %v2744_v32 = vld [vmem:[#allocation5 + $0x20] sm:$0x7f] }
 0x5c9   : > { %6328 = vmatpush3.msra.mxu1 %v7531_v40  ;;  %6301 = vmatprep.subr.mxu0 %v8826_v46 }
 0x5ca   : > { %6329 = vmatprep.subr.mxu1 %v8826_v46  ;;  %6302 = vmatpush3.msra.mxu0 %v7490_v34 }
 0x5cb   : > { %6330 = vmatpush3.msra.mxu1 %v7539_v41  ;;  %6303 = vmatprep.subr.mxu0 %v8826_v46 }
 0x5cc   : > { %6358 = vmatprep.subr.mxu1 %v8826_v46  ;;  %6304 = vmatpush3.msra.mxu0 %v7504_v36 }
 0x5cd   : > { %6305 = vmatprep.subr.mxu0 %v8826_v46  ;;  %6307 = vmatprep.mubr.msk.f32.mxu0 %vm7065_vm0, %v8826_v46 }
 0x5ce   : > { %6306 = vmatpush3.msra.mxu0 %v7518_v38  ;;  %4852 = vperm.xlu1 %6838, %v3502_v4  }
 0x5cf   : > { %6334 = vmatprep.subr.mxu0 %v8826_v46 }
 0x5d2   : > { %4947 = vperm.xlu1 %6838, %v4944_v6  }
 0x677   : > { %v2441_v14 = vpop.f32.mrf.mxu1 }
 0x679   : > { %v6285_v16 = vpop.f32.mrf.mxu1 }
 0x67b   : > { %v2368_v18 = vpop.f32.mrf.mxu0  ;;  %v2665_v19 = vpop.f32.mrf.mxu1 }
 0x67c   : > { %v2442_v22 = vadd.f32 %v2441_v14, %v2368_v18  ;;  %6332 = vmatmul.mubr.msk.f32.vlgmr.msra.gmra.mxu1 %vm876_vm2, %v2665_v19 }
 0x67d   : > { %6359 = vmatpush3.msk.msra.mxu1 %vm2150_vm3, %v7904_v15  ;;  %v6266_v26 = vpop.f32.mrf.mxu0  ;;  %6360 = vmatprep.mubr.msk.f32.mxu1 %vm7065_vm0, %v8826_v46  ;;  %v6314_v29 = vpop.f32.mrf.mxu1 }
 0x67e   : > { %6363 = vmatprep.subr.mxu1 %v8826_v46  ;;  %v6839_v26 = vld [vmem:[%s8802_s0 + $0x38] sm:$0xff]  ;;  %v6841_v29 = vld [vmem:[%s8802_s0 + $0x28] sm:$0xff] }
 0x67f   : > { %v2516_v30 = vpop.f32.mrf.mxu0 }
 0x680   : > { %6308 = vmatmul.mubr.msk.f32.vlgmr.msra.gmra.mxu0 %vm876_vm2, %v2516_v30  ;;  %6361 = vmatmul.mubr.msk.f32.vlgmr.msra.gmra.mxu1 %vm2146_vm4, %v2893_v27  ;;  %v6840_v27 = vld [vmem:[%s8802_s0 + $0x30] sm:$0xff]  ;;  %v6842_v30 = vld [vmem:[%s8802_s0 + $0x20] sm:$0xff] }
 0x681   : > { %6335 = vmatpush3.msk.msra.mxu0 %vm2150_vm3, %v7904_v15  ;;  %v6290_v31 = vpop.f32.mrf.mxu0  ;;  %6336 = vmatprep.mubr.msk.f32.mxu0 %vm7065_vm0, %v8826_v46 }
 0x682   : > { %6364 = vmatpush3.msra.mxu1 %v7570_v55  ;;  %6339 = vmatprep.subr.mxu0 %v8826_v46  ;;  %v3042_v55 = vld [vmem:[#allocation5 + $0x30] sm:$0x7f] }
 0x683   : > { %6365 = vmatprep.subr.mxu1 %v8826_v46  ;;  %6379 = vmatprep.mubr.msk.f32.mxu1 %vm7065_vm0, %v8826_v46  ;;  %v6843_v31 = vld [vmem:[%s8802_s0 + $0x18] sm:$0xff] }
 0x684   : > { %6337 = vmatmul.mubr.msk.f32.vlgmr.msra.gmra.mxu0 %vm2146_vm4, %v2744_v32  ;;  %6366 = vmatpush3.msra.mxu1 %v7585_v57  ;;  %v8828_v57 = vld [vmem:[#allocation18_spill] sm:$0xff]  ;;  %v6844_v32 = vld [vmem:[%s8802_s0 + $0x10] sm:$0xff] }
 0x685   : > { %6367 = vmatprep.subr.mxu1 %v8826_v46  ;;  %6340 = vmatpush3.msra.mxu0 %v7553_v51 }
 0x686   : > { %6368 = vmatpush3.msra.mxu1 %v7599_v59  ;;  %6341 = vmatprep.subr.mxu0 %v8826_v46  ;;  %v8830_v59 = vld [vmem:[#allocation19_spill] sm:$0xff] }
 0x687   : > { %6369 = vmatprep.subr.mxu1 %v8826_v46  ;;  %6342 = vmatpush3.msra.mxu0 %v7563_v53 }
 0x688   : > { %6370 = vmatpush3.msra.mxu1 %v7625_v62  ;;  %6343 = vmatprep.subr.mxu0 %v8826_v46  ;;  %v8833_v62 = vld [vmem:[#allocation28_spill] sm:$0xff] }
 0x689   : > { %6371 = vmatprep.subr.mxu1 %v8826_v46  ;;  %6344 = vmatpush3.msra.mxu0 %v7576_v56  ;;  %v8827_v56 = vld [vmem:[#allocation21_spill] sm:$0xff] }
 0x68a   : > { %6372 = vmatpush3.msra.mxu1 %v7639_v2  ;;  %6345 = vmatprep.subr.mxu0 %v8826_v46  ;;  %v8835_v2 = vld [vmem:[#allocation23_spill] sm:$0xff] }
 0x68b   : > { %6373 = vmatprep.subr.mxu1 %v8826_v46  ;;  %6346 = vmatpush3.msra.mxu0 %v7592_v58  ;;  %v8829_v58 = vld [vmem:[#allocation24_spill] sm:$0xff] }
 0x68c   : > { %6374 = vmatpush3.msra.mxu1 %v7653_v20  ;;  %6347 = vmatprep.subr.mxu0 %v8826_v46  ;;  %v8837_v20 = vld [vmem:[#allocation25_spill] sm:$0xff] }
 0x68d   : > { %6375 = vmatprep.subr.mxu1 %v8826_v46  ;;  %6348 = vmatpush3.msra.mxu0 %v7606_v60  ;;  %v8831_v60 = vld [vmem:[#allocation26_spill] sm:$0xff] }
 0x68e   : > { %6376 = vmatpush3.msra.mxu1 %v7661_v21  ;;  %6349 = vmatprep.subr.mxu0 %v8826_v46  ;;  %v8838_v21 = vld [vmem:[#allocation30_spill] sm:$0xff] }
 0x68f   : > { %6377 = vmatprep.subr.mxu1 %v8826_v46  ;;  %6350 = vmatpush3.msra.mxu0 %v7620_v61  ;;  %v8832_v61 = vld [vmem:[#allocation20_spill] sm:$0xff] }
 0x690   : > { %6378 = vmatpush3.msra.mxu1 %v7669_v23  ;;  %6351 = vmatprep.subr.mxu0 %v8826_v46  ;;  %v8839_v23 = vld [vmem:[#allocation27_spill] sm:$0xff] }
 0x691   : > { %6406 = vmatprep.subr.mxu1 %v8826_v46  ;;  %6352 = vmatpush3.msra.mxu0 %v7634_v63  ;;  %v8834_v63 = vld [vmem:[#allocation22_spill] sm:$0xff] }
 0x692   : > { %6353 = vmatprep.subr.mxu0 %v8826_v46  ;;  %6355 = vmatprep.mubr.msk.f32.mxu0 %vm7065_vm0, %v8826_v46 }
 0x693   : > { %6354 = vmatpush3.msra.mxu0 %v7648_v3  ;;  %v8836_v3 = vld [vmem:[#allocation29_spill] sm:$0xff] }
 0x694   : > { %6382 = vmatprep.subr.mxu0 %v8826_v46 }
 0x73c   : > { %v2738_v33 = vpop.f32.mrf.mxu1 }
 0x73e   : > { %v6333_v34 = vpop.f32.mrf.mxu1 }
 0x73f   : > { %v6846_v34 = vld [vmem:[%s8802_s0] sm:$0xff] }
 0x740   : > { %v2589_v35 = vpop.f32.mrf.mxu0  ;;  %v2963_v36 = vpop.f32.mrf.mxu1 }
 0x741   : > { %v2593_v37 = vadd.f32 %v2589_v35, %v2442_v22  ;;  %6380 = vmatmul.mubr.msk.f32.vlgmr.msra.gmra.mxu1 %vm876_vm2, %v2963_v36  ;;  %v3491_v35 = vpop.permute.xlu1 %3490 }
 0x742   : > { %6407 = vmatpush3.msk.msra.mxu1 %vm2150_vm3, %v7904_v15  ;;  %v6309_v38 = vpop.f32.mrf.mxu0  ;;  %6408 = vmatprep.mubr.msk.f32.mxu1 %vm7065_vm0, %v8826_v46  ;;  %v6362_v40 = vpop.f32.mrf.mxu1 }
 0x743   : > { %6411 = vmatprep.subr.mxu1 %v8826_v46  ;;  %v2742_v41 = vadd.f32 %v2738_v33, %v2593_v37  ;;  %v6845_v33 = vld [vmem:[%s8802_s0 + $0x8] sm:$0xff] }
 0x744   : > { %v2814_v51 = vpop.f32.mrf.mxu0 }
 0x745   : > { %6356 = vmatmul.mubr.msk.f32.vlgmr.msra.gmra.mxu0 %vm876_vm2, %v2814_v51  ;;  %6409 = vmatmul.mubr.msk.f32.vlgmr.msra.gmra.mxu1 %vm2146_vm4, %v3191_v39  ;;  %v3497_v40 = vpop.permute.xlu1 %3496 }
 0x746   : > { %6383 = vmatpush3.msk.msra.mxu0 %vm2150_vm3, %v7904_v15  ;;  %v6338_v53 = vpop.f32.mrf.mxu0  ;;  %6384 = vmatprep.mubr.msk.f32.mxu0 %vm7065_vm0, %v8826_v46 }
 0x747   : > { %6387 = vmatprep.subr.mxu0 %v8826_v46  ;;  %6412 = vmatpush3.msra.mxu1 %v7701_v24  ;;  %v3503_v53 = vld [vmem:[#allocation7] sm:$0x7f] }
 0x748   : > { %6413 = vmatprep.subr.mxu1 %v8826_v46  ;;  %6427 = vmatprep.mubr.msk.f32.mxu1 %vm7065_vm0, %v8826_v46 }
 0x749   : > { %6385 = vmatmul.mubr.msk.f32.vlgmr.msra.gmra.mxu0 %vm2146_vm4, %v3042_v55  ;;  %6414 = vmatpush3.msra.mxu1 %v7716_v28  ;;  %v3581_v55 = vld [vmem:[#allocation7 + $0x8] sm:$0x7f] }
 0x74a   : > { %6388 = vmatpush3.msra.mxu0 %v7684_v44  ;;  %6415 = vmatprep.subr.mxu1 %v8826_v46 }
 0x74b   : > { %6389 = vmatprep.subr.mxu0 %v8826_v46  ;;  %6416 = vmatpush3.msra.mxu1 %v8827_v56  ;;  %v6847_v56 = vld [vmem:[%s8802_s0 + $0x78] sm:$0xff] }
 0x74c   : > { %6390 = vmatpush3.msra.mxu0 %v8828_v57  ;;  %6417 = vmatprep.subr.mxu1 %v8826_v46  ;;  %v6848_v57 = vld [vmem:[%s8802_s0 + $0x70] sm:$0xff] }
 0x74d   : > { %6391 = vmatprep.subr.mxu0 %v8826_v46  ;;  %6418 = vmatpush3.msra.mxu1 %v8829_v58  ;;  %v6849_v58 = vld [vmem:[%s8802_s0 + $0x68] sm:$0xff] }
 0x74e   : > { %6392 = vmatpush3.msra.mxu0 %v8830_v59  ;;  %6419 = vmatprep.subr.mxu1 %v8826_v46  ;;  %v6850_v59 = vld [vmem:[%s8802_s0 + $0x60] sm:$0xff] }
 0x74f   : > { %6393 = vmatprep.subr.mxu0 %v8826_v46  ;;  %6420 = vmatpush3.msra.mxu1 %v8831_v60  ;;  %v6851_v60 = vld [vmem:[%s8802_s0 + $0x58] sm:$0xff] }
 0x750   : > { %6394 = vmatpush3.msra.mxu0 %v8832_v61  ;;  %6421 = vmatprep.subr.mxu1 %v8826_v46  ;;  %v6852_v61 = vld [vmem:[%s8802_s0 + $0x50] sm:$0xff] }
 0x751   : > { %6395 = vmatprep.subr.mxu0 %v8826_v46  ;;  %6422 = vmatpush3.msra.mxu1 %v8833_v62  ;;  %v6853_v62 = vld [vmem:[%s8802_s0 + $0x48] sm:$0xff] }
 0x752   : > { %6396 = vmatpush3.msra.mxu0 %v8834_v63  ;;  %6423 = vmatprep.subr.mxu1 %v8826_v46  ;;  %v6854_v63 = vld [vmem:[%s8802_s0 + $0x40] sm:$0xff] }
 0x753   : > { %6397 = vmatprep.subr.mxu0 %v8826_v46  ;;  %6403 = vmatprep.mubr.msk.f32.mxu0 %vm7065_vm0, %v8826_v46 }
 0x754   : > { %6398 = vmatpush3.msra.mxu0 %v8835_v2  ;;  %6424 = vmatpush3.msra.mxu1 %v8836_v3 }
 0x755   : > { %6399 = vmatprep.subr.mxu0 %v8826_v46  ;;  %6425 = vmatprep.subr.mxu1 %v8826_v46 }
 0x756   : > { %6400 = vmatpush3.msra.mxu0 %v8837_v20  ;;  %6426 = vmatpush3.msra.mxu1 %v8838_v21  ;;  %v3951_v20 = vld [vmem:[#allocation7 + $0x18] sm:$0x7f] }
 0x757   : > { %6401 = vmatprep.subr.mxu0 %v8826_v46  ;;  %6454 = vmatprep.subr.mxu1 %v8826_v46 }
 0x758   : > { %6402 = vmatpush3.msra.mxu0 %v8839_v23 }
 0x759   : > { %6430 = vmatprep.subr.mxu0 %v8826_v46 }
 0x801   : > { %v3036_v44 = vpop.f32.mrf.mxu1 }
 0x803   : > { %v6381_v24 = vpop.f32.mrf.mxu1 }
 0x804   : > { %v6855_v24 = vld [vmem:[%s8802_s0 + $0xf8] sm:$0xff] }
 0x805   : > { %v2887_v28 = vpop.f32.mrf.mxu0  ;;  %v3261_v52 = vpop.f32.mrf.mxu1 }
 0x806   : > { %v2891_v43 = vadd.f32 %v2887_v28, %v2742_v41  ;;  %6428 = vmatmul.mubr.msk.f32.vlgmr.msra.gmra.mxu1 %vm876_vm2, %v3261_v52  ;;  %v6856_v28 = vld [vmem:[%s8802_s0 + $0xf0] sm:$0xff]  ;;  %v6857_v52 = vld [vmem:[%s8802_s0 + $0xb8] sm:$0xff] }
 0x807   : > { %v6357_v49 = vpop.f32.mrf.mxu0  ;;  %v6410_v42 = vpop.f32.mrf.mxu1  ;;  %6456 = vmatprep.mubr.msk.f32.mxu1 %vm7065_vm0, %v8826_v46 }
 0x808   : > { %v3040_v50 = vadd.f32 %v3036_v44, %v2891_v43  ;;  %v3802_v44 = vld [vmem:[#allocation7 + $0x10] sm:$0x7f]  ;;  %v6858_v43 = vld [vmem:[%s8802_s0 + $0xe8] sm:$0xff]  ;;  %v6859_v49 = vld [vmem:[%s8802_s0 + $0xb0] sm:$0xff] }
 0x809   : > { %v3112_v25 = vpop.f32.mrf.mxu0  ;;  %v6860_v42 = vld [vmem:[%s8802_s0 + $0xe0] sm:$0xff] }
 0x80a   : > { %6404 = vmatmul.mubr.msk.f32.vlgmr.msra.gmra.mxu0 %vm876_vm2, %v3112_v25  ;;  %v6862_v25 = vld [vmem:[%s8802_s0 + $0xd8] sm:$0xff] }
 0x80b   : > { %6431 = vmatpush3.msk.msra.mxu0 %vm2150_vm3, %v7904_v15  ;;  %v6386_v54 = vpop.f32.mrf.mxu0  ;;  %6432 = vmatprep.mubr.msk.f32.mxu0 %vm7065_vm0, %v8826_v46 }
 0x80c   : > { %6435 = vmatprep.subr.mxu0 %v8826_v46  ;;  %v6863_v54 = vld [vmem:[%s8802_s0 + $0xa0] sm:$0xff] }
 0x80e   : > { %6433 = vmatmul.mubr.msk.f32.vlgmr.msra.gmra.mxu0 %vm2146_vm4, %v3340_v0  ;;  %v6864_v0 = vld [vmem:[%s8802_s0 + $0xd0] sm:$0xff] }
 0x80f   : > { %6436 = vmatpush3.msra.mxu0 %v8840_v5  ;;  %6451 = vmatprep.mubr.msk.f32.mxu0 %vm7065_vm0, %v8826_v46  ;;  %v6865_v5 = vld [vmem:[%s8802_s0 + $0x98] sm:$0xff] }
 0x810   : > { %6437 = vmatprep.subr.mxu0 %v8826_v46 }
 0x811   : > { %6438 = vmatpush3.msra.mxu0 %v8841_v7  ;;  %v6866_v7 = vld [vmem:[%s8802_s0 + $0xc8] sm:$0xff] }
 0x812   : > { %6439 = vmatprep.subr.mxu0 %v8826_v46 }
 0x813   : > { %6440 = vmatpush3.msra.mxu0 %v8842_v9  ;;  %v6867_v9 = vld [vmem:[%s8802_s0 + $0x90] sm:$0xff] }
 0x814   : > { %6441 = vmatprep.subr.mxu0 %v8826_v46 }
 0x815   : > { %6442 = vmatpush3.msra.mxu0 %v8843_v11  ;;  %v6868_v11 = vld [vmem:[%s8802_s0 + $0xc0] sm:$0xff] }
 0x816   : > { %6443 = vmatprep.subr.mxu0 %v8826_v46 }
 0x817   : > { %6444 = vmatpush3.msra.mxu0 %v8844_v13  ;;  %v6869_v13 = vld [vmem:[%s8802_s0 + $0x88] sm:$0xff] }
 0x818   : > { %6445 = vmatprep.subr.mxu0 %v8826_v46 }
 0x819   : > { %6446 = vmatpush3.msra.mxu0 %v8845_v48  ;;  %v6870_v48 = vld [vmem:[%s8802_s0 + $0x80] sm:$0xff] }
 0x81a   : > { %6447 = vmatprep.subr.mxu0 %v8826_v46 }
 0x81b   : > { %6448 = vmatpush3.msra.mxu0 %v8846_v45 }
 0x81c   : > { %6449 = vmatprep.subr.mxu0 %v8826_v46 }
 0x81d   : > { %6450 = vmatpush3.msra.mxu0 %v8847_v47 }
 0x81e   : > { %6483 = vmatprep.subr.mxu0 %v8826_v46 }
 0x8c6   : > { %v3334_v8 = vpop.f32.mrf.mxu1 }
 0x8c8   : > { %v6429_v10 = vpop.f32.mrf.mxu1 }
 0x8ca   : > { %v3185_v12 = vpop.f32.mrf.mxu0 }
 0x8cb   : > { %v3189_v14 = vadd.f32 %v3185_v12, %v3040_v50  ;;  %v6861_v50 = vld [vmem:[%s8802_s0 + $0xa8] sm:$0xff] }
 0x8cc   : > { %v6405_v16 = vpop.f32.mrf.mxu0 }
 0x8cd   : > { %v3338_v18 = vadd.f32 %v3334_v8, %v3189_v14  ;;  %v4249_v8 = vld [vmem:[#allocation7 + $0x28] sm:$0x7f]  ;;  %v4100_v16 = vld [vmem:[#allocation7 + $0x20] sm:$0x7f] }
 0x8ce   : > { %v3410_v19 = vpop.f32.mrf.mxu0 }
 0x8cf   : > { %6452 = vmatmul.mubr.msk.f32.vlgmr.msra.gmra.mxu0 %vm876_vm2, %v3410_v19  ;;  %v6872_v19 = vld [vmem:[%s8802_s0 + $0x170] sm:$0xff] }
 0x8d0   : > { %v6434_v22 = vpop.f32.mrf.mxu0  ;;  %6484 = vmatpush3.msra.mxu0 %v6839_v26  ;;  %6499 = vmatprep.mubr.msk.f32.mxu0 %vm7065_vm0, %v8826_v46  ;;  %v6874_v26 = vld [vmem:[%s8802_s0 + $0x168] sm:$0xff] }
 0x8d1   : > { %6485 = vmatprep.subr.mxu0 %v8826_v46  ;;  %v6873_v22 = vld [vmem:[%s8802_s0 + $0x138] sm:$0xff] }
 0x8d2   : > { %6486 = vmatpush3.msra.mxu0 %v6840_v27  ;;  %v6875_v27 = vld [vmem:[%s8802_s0 + $0x130] sm:$0xff] }
 0x8d3   : > { %6487 = vmatprep.subr.mxu0 %v8826_v46 }
 0x8d4   : > { %6488 = vmatpush3.msra.mxu0 %v6841_v29  ;;  %v6876_v29 = vld [vmem:[%s8802_s0 + $0x160] sm:$0xff] }
 0x8d5   : > { %6489 = vmatprep.subr.mxu0 %v8826_v46 }
 0x8d6   : > { %6490 = vmatpush3.msra.mxu0 %v6842_v30  ;;  %v6877_v30 = vld [vmem:[%s8802_s0 + $0x128] sm:$0xff] }
 0x8d7   : > { %6491 = vmatprep.subr.mxu0 %v8826_v46 }
 0x8d8   : > { %6492 = vmatpush3.msra.mxu0 %v6843_v31  ;;  %v6878_v31 = vld [vmem:[%s8802_s0 + $0x158] sm:$0xff] }
 0x8d9   : > { %6493 = vmatprep.subr.mxu0 %v8826_v46 }
 0x8da   : > { %6494 = vmatpush3.msra.mxu0 %v6844_v32  ;;  %v6879_v32 = vld [vmem:[%s8802_s0 + $0x120] sm:$0xff] }
 0x8db   : > { %6495 = vmatprep.subr.mxu0 %v8826_v46 }
 0x8dc   : > { %6496 = vmatpush3.msra.mxu0 %v6845_v33  ;;  %v6880_v33 = vld [vmem:[%s8802_s0 + $0x150] sm:$0xff] }
 0x8dd   : > { %6497 = vmatprep.subr.mxu0 %v8826_v46 }
 0x8de   : > { %6498 = vmatpush3.msra.mxu0 %v6846_v34  ;;  %v6881_v34 = vld [vmem:[%s8802_s0 + $0x118] sm:$0xff] }
 0x8df   : > { %6526 = vmatprep.subr.mxu0 %v8826_v46 }
 0x98f   : > { %v3483_v36 = vpop.f32.mrf.mxu0 }
 0x990   : > { %v3487_v37 = vadd.f32 %v3483_v36, %v3338_v18  ;;  %v6871_v18 = vld [vmem:[%s8802_s0 + $0x178] sm:$0xff]  ;;  %v6883_v36 = vld [vmem:[%s8802_s0 + $0x110] sm:$0xff] }
 0x991   : > { %v6453_v38 = vpop.f32.mrf.mxu0 }
 0x992   : > { %v3493_v39 = vmul.f32 %v3491_v35, %v3487_v37  ;;  %v6882_v35 = vld [vmem:[%s8802_s0 + $0x148] sm:$0xff]  ;;  %v6884_v37 = vld [vmem:[%s8802_s0 + $0x140] sm:$0xff] }
 0x993   : > { %v6885_v38 = vld [vmem:[%s8802_s0 + $0x108] sm:$0xff] }
 0x994   : > { %v3499_v41 = vadd.f32 %v3497_v40, %v3493_v39  ;;  %v6886_v39 = vld [vmem:[%s8802_s0 + $0x100] sm:$0xff] }
 0x996   : > { %v8159_v51 = vmax.f32 %v3499_v41, 0.0 }
 0x998   : > { %6455 = vmatpush3.msk.msra.mxu1 %vm2150_vm3, %v8159_v51 }
 0x999   : > { %6457 = vmatmul.mubr.msk.f32.vlgmr.msra.gmra.mxu1 %vm2146_vm4, %v3503_v53  ;;  %6459 = vmatprep.subr.mxu1 %v8826_v46 }
 0x99a   : > { %6460 = vmatpush3.msk.msra.mxu1 %vm2150_vm3, %v8159_v51  ;;  %6461 = vmatprep.mubr.msk.f32.mxu1 %vm7065_vm0, %v8826_v46 }
 0x99b   : > { %6464 = vmatprep.subr.mxu1 %v8826_v46 }
 0x99d   : > { %6462 = vmatmul.mubr.msk.f32.vlgmr.msra.gmra.mxu1 %vm2146_vm4, %v3581_v55 }
 0x99e   : > { %6465 = vmatpush3.msra.mxu1 %v6847_v56  ;;  %6480 = vmatprep.mubr.msk.f32.mxu1 %vm7065_vm0, %v8826_v46 }
 0x99f   : > { %6466 = vmatprep.subr.mxu1 %v8826_v46 }
 0x9a0   : > { %6467 = vmatpush3.msra.mxu1 %v6848_v57 }
 0x9a1   : > { %6468 = vmatprep.subr.mxu1 %v8826_v46 }
 0x9a2   : > { %6469 = vmatpush3.msra.mxu1 %v6849_v58  ;;  %v4547_v58 = vld [vmem:[#allocation7 + $0x38] sm:$0x7f] }
 0x9a3   : > { %6470 = vmatprep.subr.mxu1 %v8826_v46 }
 0x9a4   : > { %6471 = vmatpush3.msra.mxu1 %v6850_v59 }
 0x9a5   : > { %6472 = vmatprep.subr.mxu1 %v8826_v46 }
 0x9a6   : > { %6473 = vmatpush3.msra.mxu1 %v6851_v60 }
 0x9a7   : > { %6474 = vmatprep.subr.mxu1 %v8826_v46 }
 0x9a8   : > { %6475 = vmatpush3.msra.mxu1 %v6852_v61 }
 0x9a9   : > { %6476 = vmatprep.subr.mxu1 %v8826_v46 }
 0x9aa   : > { %6477 = vmatpush3.msra.mxu1 %v6853_v62 }
 0x9ab   : > { %6478 = vmatprep.subr.mxu1 %v8826_v46 }
 0x9ac   : > { %6479 = vmatpush3.msra.mxu1 %v6854_v63  ;;  %v4398_v63 = vld [vmem:[#allocation7 + $0x30] sm:$0x7f] }
 0x9ad   : > { %6502 = vmatprep.subr.mxu1 %v8826_v46 }
 0xa59   : > { %v3576_v2 = vpop.f32.mrf.mxu1 }
 0xa5a   : > { %6500 = vmatmul.mubr.msk.f32.vlgmr.msra.gmra.mxu0 %vm876_vm2, %v3576_v2  ;;  %v6887_v2 = vld [vmem:[%s8802_s0 + $0x1f8] sm:$0xff] }
 0xa5b   : > { %6527 = vmatpush3.msk.msra.mxu0 %vm2150_vm3, %v8159_v51  ;;  %v6458_v3 = vpop.f32.mrf.mxu1  ;;  %6528 = vmatprep.mubr.msk.f32.mxu0 %vm7065_vm0, %v8826_v46 }
 0xa5c   : > { %6531 = vmatprep.subr.mxu0 %v8826_v46  ;;  %v6888_v3 = vld [vmem:[%s8802_s0 + $0x1f0] sm:$0xff] }
 0xa5d   : > { %v3651_v21 = vpop.f32.mrf.mxu1 }
 0xa5e   : > { %6481 = vmatmul.mubr.msk.f32.vlgmr.msra.gmra.mxu1 %vm876_vm2, %v3651_v21  ;;  %6529 = vmatmul.mubr.msk.f32.vlgmr.msra.gmra.mxu0 %vm2146_vm4, %v3951_v20  ;;  %v6889_v20 = vld [vmem:[%s8802_s0 + $0x1b8] sm:$0xff]  ;;  %v6890_v21 = vld [vmem:[%s8802_s0 + $0x1e8] sm:$0xff] }
 0xa5f   : > { %6503 = vmatpush3.msk.msra.mxu1 %vm2150_vm3, %v8159_v51  ;;  %v6463_v23 = vpop.f32.mrf.mxu1  ;;  %6504 = vmatprep.mubr.msk.f32.mxu1 %vm7065_vm0, %v8826_v46 }
 0xa60   : > { %6532 = vmatpush3.msra.mxu0 %v6855_v24  ;;  %6507 = vmatprep.subr.mxu1 %v8826_v46  ;;  %v6891_v23 = vld [vmem:[%s8802_s0 + $0x1b0] sm:$0xff]  ;;  %v6893_v24 = vld [vmem:[%s8802_s0 + $0x1a8] sm:$0xff] }
 0xa61   : > { %6533 = vmatprep.subr.mxu0 %v8826_v46  ;;  %6547 = vmatprep.mubr.msk.f32.mxu0 %vm7065_vm0, %v8826_v46 }
 0xa62   : > { %6505 = vmatmul.mubr.msk.f32.vlgmr.msra.gmra.mxu1 %vm2146_vm4, %v3802_v44  ;;  %6534 = vmatpush3.msra.mxu0 %v6856_v28  ;;  %v6892_v44 = vld [vmem:[%s8802_s0 + $0x1e0] sm:$0xff]  ;;  %v6894_v28 = vld [vmem:[%s8802_s0 + $0x1d8] sm:$0xff] }
 0xa63   : > { %6535 = vmatprep.subr.mxu0 %v8826_v46  ;;  %6508 = vmatpush3.msra.mxu1 %v6857_v52  ;;  %v6895_v52 = vld [vmem:[%s8802_s0 + $0x1a0] sm:$0xff] }
 0xa64   : > { %6536 = vmatpush3.msra.mxu0 %v6858_v43  ;;  %6509 = vmatprep.subr.mxu1 %v8826_v46  ;;  %v6896_v43 = vld [vmem:[%s8802_s0 + $0x1d0] sm:$0xff] }
 0xa65   : > { %6537 = vmatprep.subr.mxu0 %v8826_v46  ;;  %6510 = vmatpush3.msra.mxu1 %v6859_v49  ;;  %v6897_v49 = vld [vmem:[%s8802_s0 + $0x198] sm:$0xff] }
 0xa66   : > { %6538 = vmatpush3.msra.mxu0 %v6860_v42  ;;  %6511 = vmatprep.subr.mxu1 %v8826_v46  ;;  %v6898_v42 = vld [vmem:[%s8802_s0 + $0x190] sm:$0xff] }
 0xa67   : > { %6539 = vmatprep.subr.mxu0 %v8826_v46  ;;  %6512 = vmatpush3.msra.mxu1 %v6861_v50  ;;  %v6899_v50 = vld [vmem:[%s8802_s0 + $0x1c8] sm:$0xff] }
 0xa68   : > { %6540 = vmatpush3.msra.mxu0 %v6862_v25  ;;  %6513 = vmatprep.subr.mxu1 %v8826_v46  ;;  %v6900_v25 = vld [vmem:[%s8802_s0 + $0x188] sm:$0xff] }
 0xa69   : > { %6541 = vmatprep.subr.mxu0 %v8826_v46  ;;  %6514 = vmatpush3.msra.mxu1 %v6863_v54  ;;  %v6901_v54 = vld [vmem:[%s8802_s0 + $0x1c0] sm:$0xff] }
 0xa6a   : > { %6542 = vmatpush3.msra.mxu0 %v6864_v0  ;;  %6515 = vmatprep.subr.mxu1 %v8826_v46  ;;  %v6902_v0 = vld [vmem:[%s8802_s0 + $0x180] sm:$0xff] }
 0xa6b   : > { %6543 = vmatprep.subr.mxu0 %v8826_v46  ;;  %6516 = vmatpush3.msra.mxu1 %v6865_v5 }
 0xa6c   : > { %6544 = vmatpush3.msra.mxu0 %v6866_v7  ;;  %6517 = vmatprep.subr.mxu1 %v8826_v46 }
 0xa6d   : > { %6545 = vmatprep.subr.mxu0 %v8826_v46  ;;  %6518 = vmatpush3.msra.mxu1 %v6867_v9 }
 0xa6e   : > { %6546 = vmatpush3.msra.mxu0 %v6868_v11  ;;  %6519 = vmatprep.subr.mxu1 %v8826_v46 }
 0xa6f   : > { %6574 = vmatprep.subr.mxu0 %v8826_v46  ;;  %6520 = vmatpush3.msra.mxu1 %v6869_v13 }
 0xa70   : > { %6521 = vmatprep.subr.mxu1 %v8826_v46  ;;  %6523 = vmatprep.mubr.msk.f32.mxu1 %vm7065_vm0, %v8826_v46 }
 0xa71   : > { %6522 = vmatpush3.msra.mxu1 %v6870_v48 }
 0xa72   : > { %6550 = vmatprep.subr.mxu1 %v8826_v46 }
 0xb1a   : > { %v3797_v45 = vpop.f32.mrf.mxu0 }
 0xb1c   : > { %v6501_v47 = vpop.f32.mrf.mxu0 }
 0xb1e   : > { %v3724_v17 = vpop.f32.mrf.mxu1  ;;  %v4021_v1 = vpop.f32.mrf.mxu0 }
 0xb1f   : > { %v8287_v4 = vadd.f32 %v3797_v45, %v3724_v17  ;;  %6548 = vmatmul.mubr.msk.f32.vlgmr.msra.gmra.mxu0 %vm876_vm2, %v4021_v1 }
 0xb20   : > { %6575 = vmatpush3.msk.msra.mxu0 %vm2150_vm3, %v8159_v51  ;;  %v6482_v6 = vpop.f32.mrf.mxu1  ;;  %6576 = vmatprep.mubr.msk.f32.mxu0 %vm7065_vm0, %v8826_v46  ;;  %v6530_v10 = vpop.f32.mrf.mxu0 }
 0xb21   : > { %6579 = vmatprep.subr.mxu0 %v8826_v46  ;;  %v6903_v6 = vld [vmem:[%s8802_s0 + $0x238] sm:$0xff]  ;;  %v6906_v10 = vld [vmem:[%s8802_s0 + $0x220] sm:$0xff] }
 0xb22   : > { %v3872_v12 = vpop.f32.mrf.mxu1 }
 0xb23   : > { %6524 = vmatmul.mubr.msk.f32.vlgmr.msra.gmra.mxu1 %vm876_vm2, %v3872_v12  ;;  %6577 = vmatmul.mubr.msk.f32.vlgmr.msra.gmra.mxu0 %vm2146_vm4, %v4249_v8  ;;  %v6905_v8 = vld [vmem:[%s8802_s0 + $0x228] sm:$0xff]  ;;  %v6907_v12 = vld [vmem:[%s8802_s0 + $0x218] sm:$0xff] }
 0xb24   : > { %6551 = vmatpush3.msk.msra.mxu1 %vm2150_vm3, %v8159_v51  ;;  %v6506_v14 = vpop.f32.mrf.mxu1  ;;  %6552 = vmatprep.mubr.msk.f32.mxu1 %vm7065_vm0, %v8826_v46 }
 0xb25   : > { %6580 = vmatpush3.msra.mxu0 %v6871_v18  ;;  %6555 = vmatprep.subr.mxu1 %v8826_v46  ;;  %v6908_v14 = vld [vmem:[%s8802_s0 + $0x210] sm:$0xff]  ;;  %v6910_v18 = vld [vmem:[%s8802_s0 + $0x200] sm:$0xff] }
 0xb26   : > { %6581 = vmatprep.subr.mxu0 %v8826_v46  ;;  %6595 = vmatprep.mubr.msk.f32.mxu0 %vm7065_vm0, %v8826_v46 }
 0xb27   : > { %6553 = vmatmul.mubr.msk.f32.vlgmr.msra.gmra.mxu1 %vm2146_vm4, %v4100_v16  ;;  %6582 = vmatpush3.msra.mxu0 %v6872_v19  ;;  %v6909_v16 = vld [vmem:[%s8802_s0 + $0x208] sm:$0xff] }
 0xb28   : > { %6583 = vmatprep.subr.mxu0 %v8826_v46  ;;  %6556 = vmatpush3.msra.mxu1 %v6873_v22 }
 0xb29   : > { %6584 = vmatpush3.msra.mxu0 %v6874_v26  ;;  %6557 = vmatprep.subr.mxu1 %v8826_v46 }
 0xb2a   : > { %6585 = vmatprep.subr.mxu0 %v8826_v46  ;;  %6558 = vmatpush3.msra.mxu1 %v6875_v27 }
 0xb2b   : > { %6586 = vmatpush3.msra.mxu0 %v6876_v29  ;;  %6559 = vmatprep.subr.mxu1 %v8826_v46 }
 0xb2c   : > { %6587 = vmatprep.subr.mxu0 %v8826_v46  ;;  %6560 = vmatpush3.msra.mxu1 %v6877_v30 }
 0xb2d   : > { %6588 = vmatpush3.msra.mxu0 %v6878_v31  ;;  %6561 = vmatprep.subr.mxu1 %v8826_v46 }
 0xb2e   : > { %6589 = vmatprep.subr.mxu0 %v8826_v46  ;;  %6562 = vmatpush3.msra.mxu1 %v6879_v32 }
 0xb2f   : > { %6590 = vmatpush3.msra.mxu0 %v6880_v33  ;;  %6563 = vmatprep.subr.mxu1 %v8826_v46  ;;  %v5658_v33 = vld [vmem:[%s8736_s14 + $0x78] sm:$0xff] }
 0xb30   : > { %6591 = vmatprep.subr.mxu0 %v8826_v46  ;;  %6564 = vmatpush3.msra.mxu1 %v6881_v34  ;;  %v5657_v34 = vld [vmem:[%s8736_s14 + $0x70] sm:$0xff] }
 0xb31   : > { %6592 = vmatpush3.msra.mxu0 %v6882_v35  ;;  %6565 = vmatprep.subr.mxu1 %v8826_v46  ;;  %v5656_v35 = vld [vmem:[%s8736_s14 + $0x68] sm:$0xff] }
 0xb32   : > { %6593 = vmatprep.subr.mxu0 %v8826_v46  ;;  %6566 = vmatpush3.msra.mxu1 %v6883_v36  ;;  %v5655_v36 = vld [vmem:[%s8736_s14 + $0x60] sm:$0xff] }
 0xb33   : > { %6594 = vmatpush3.msra.mxu0 %v6884_v37  ;;  %6567 = vmatprep.subr.mxu1 %v8826_v46 }
 0xb34   : > { %6622 = vmatprep.subr.mxu0 %v8826_v46  ;;  %6568 = vmatpush3.msra.mxu1 %v6885_v38 }
 0xb35   : > { %6569 = vmatprep.subr.mxu1 %v8826_v46  ;;  %6571 = vmatprep.mubr.msk.f32.mxu1 %vm7065_vm0, %v8826_v46 }
 0xb36   : > { %6570 = vmatpush3.msra.mxu1 %v6886_v39  ;;  %v4847_v39 = vpop.permute.xlu0 %4846 }
 0xb37   : > { %6598 = vmatprep.subr.mxu1 %v8826_v46 }
 0xbdf   : > { %v4094_v40 = vpop.f32.mrf.mxu0 }
 0xbe1   : > { %v6549_v41 = vpop.f32.mrf.mxu0 }
 0xbe3   : > { %v3945_v53 = vpop.f32.mrf.mxu1  ;;  %v4319_v55 = vpop.f32.mrf.mxu0 }
 0xbe4   : > { %v3949_v56 = vadd.f32 %v3945_v53, %v8287_v4  ;;  %6596 = vmatmul.mubr.msk.f32.vlgmr.msra.gmra.mxu0 %vm876_vm2, %v4319_v55  ;;  %v4696_v4 = vld [vmem:[#allocation7 + $0x40] sm:$0x7f]  ;;  %v4853_v53 = vpop.permute.xlu1 %4852 }
 0xbe5   : > { %6623 = vmatpush3.msk.msra.mxu0 %vm2150_vm3, %v8159_v51  ;;  %v6525_v57 = vpop.f32.mrf.mxu1  ;;  %6624 = vmatprep.mubr.msk.f32.mxu0 %vm7065_vm0, %v8826_v46  ;;  %v6578_v59 = vpop.f32.mrf.mxu0 }
 0xbe6   : > { %6627 = vmatprep.subr.mxu0 %v8826_v46  ;;  %v8378_v60 = vadd.f32 %v4094_v40, %v3949_v56  ;;  %v4960_v59 = vld [vmem:[%s8736_s14 + $0x38] sm:$0xff] }
 0xbe7   : > { %v4170_v61 = vpop.f32.mrf.mxu1 }
 0xbe8   : > { %6572 = vmatmul.mubr.msk.f32.vlgmr.msra.gmra.mxu1 %vm876_vm2, %v4170_v61  ;;  %6625 = vmatmul.mubr.msk.f32.vlgmr.msra.gmra.mxu0 %vm2146_vm4, %v4547_v58  ;;  %v4860_v58 = vld [vmem:[%s8733_s11] sm:$0xf] }
 0xbe9   : > { %6599 = vmatpush3.msk.msra.mxu1 %vm2150_vm3, %v8159_v51  ;;  %v6554_v62 = vpop.f32.mrf.mxu1  ;;  %6600 = vmatprep.mubr.msk.f32.mxu1 %vm7065_vm0, %v8826_v46  ;;  %v4957_v61 = vld [vmem:[%s8736_s14 + $0x20] sm:$0xff] }
 0xbea   : > { %6603 = vmatprep.subr.mxu1 %v8826_v46  ;;  %6628 = vmatpush3.msra.mxu0 %v6887_v2  ;;  %v4956_v62 = vld [vmem:[%s8736_s14 + $0x18] sm:$0xff] }
 0xbeb   : > { %6629 = vmatprep.subr.mxu0 %v8826_v46  ;;  %6643 = vmatprep.mubr.msk.f32.mxu0 %vm7065_vm0, %v8826_v46  ;;  %v5654_v2 = vld [vmem:[%s8736_s14 + $0x58] sm:$0xff] }
 0xbec   : > { %6601 = vmatmul.mubr.msk.f32.vlgmr.msra.gmra.mxu1 %vm2146_vm4, %v4398_v63  ;;  %6630 = vmatpush3.msra.mxu0 %v6888_v3  ;;  %v4955_v63 = vld [vmem:[%s8736_s14 + $0x10] sm:$0xff]  ;;  %v4954_v3 = vld [vmem:[%s8736_s14 + $0x8] sm:$0xff] }
 0xbed   : > { %6604 = vmatpush3.msra.mxu1 %v6889_v20  ;;  %6631 = vmatprep.subr.mxu0 %v8826_v46  ;;  %v5653_v20 = vld [vmem:[%s8736_s14 + $0x50] sm:$0xff] }
 0xbee   : > { %6605 = vmatprep.subr.mxu1 %v8826_v46  ;;  %6632 = vmatpush3.msra.mxu0 %v6890_v21  ;;  %v4953_v21 = vld [vmem:[%s8736_s14] sm:$0xff] }
 0xbef   : > { %6606 = vmatpush3.msra.mxu1 %v6891_v23  ;;  %6633 = vmatprep.subr.mxu0 %v8826_v46  ;;  %v5652_v23 = vld [vmem:[%s8736_s14 + $0x48] sm:$0xff] }
 0xbf0   : > { %6607 = vmatprep.subr.mxu1 %v8826_v46  ;;  %6634 = vmatpush3.msra.mxu0 %v6892_v44  ;;  %v5651_v44 = vld [vmem:[%s8736_s14 + $0x40] sm:$0xff] }
 0xbf1   : > { %6608 = vmatpush3.msra.mxu1 %v6893_v24  ;;  %6635 = vmatprep.subr.mxu0 %v8826_v46  ;;  %v4941_v24 = vpop.permute.xlu0 %4940 }
 0xbf2   : > { %6609 = vmatprep.subr.mxu1 %v8826_v46  ;;  %6636 = vmatpush3.msra.mxu0 %v6894_v28 }
 0xbf3   : > { %6610 = vmatpush3.msra.mxu1 %v6895_v52  ;;  %6637 = vmatprep.subr.mxu0 %v8826_v46 }
 0xbf4   : > { %6611 = vmatprep.subr.mxu1 %v8826_v46  ;;  %6638 = vmatpush3.msra.mxu0 %v6896_v43  ;;  %v4948_v43 = vpop.permute.xlu1 %4947 }
 0xbf5   : > { %6612 = vmatpush3.msra.mxu1 %v6897_v49  ;;  %6639 = vmatprep.subr.mxu0 %v8826_v46 }
 0xbf6   : > { %6613 = vmatprep.subr.mxu1 %v8826_v46  ;;  %6619 = vmatprep.mubr.msk.f32.mxu1 %vm7065_vm0, %v8826_v46 }
 0xbf7   : > { %6614 = vmatpush3.msra.mxu1 %v6898_v42  ;;  %6640 = vmatpush3.msra.mxu0 %v6899_v50 }
 0xbf8   : > { %6615 = vmatprep.subr.mxu1 %v8826_v46  ;;  %6641 = vmatprep.subr.mxu0 %v8826_v46 }
 0xbf9   : > { %6616 = vmatpush3.msra.mxu1 %v6900_v25  ;;  %6642 = vmatpush3.msra.mxu0 %v6901_v54  ;;  %v5667_v25 = vld [vmem:[%s8736_s14 + $0xb8] sm:$0xff] }
 0xbfa   : > { %6617 = vmatprep.subr.mxu1 %v8826_v46  ;;  %6670 = vmatprep.subr.mxu0 %v8826_v46 }
 0xbfb   : > { %6618 = vmatpush3.msra.mxu1 %v6902_v0  ;;  %v5666_v0 = vld [vmem:[%s8736_s14 + $0xb0] sm:$0xff] }
 0xbfc   : > { %6646 = vmatprep.subr.mxu1 %v8826_v46 }
 0xca4   : > { %v4392_v5 = vpop.f32.mrf.mxu0 }
 0xca6   : > { %v6597_v7 = vpop.f32.mrf.mxu0 }
 0xca7   : > { %v5665_v7 = vld [vmem:[%s8736_s14 + $0xa8] sm:$0xff] }
 0xca8   : > { %v4243_v9 = vpop.f32.mrf.mxu1  ;;  %v4617_v11 = vpop.f32.mrf.mxu0 }
 0xca9   : > { %v4247_v13 = vadd.f32 %v4243_v9, %v8378_v60  ;;  %6644 = vmatmul.mubr.msk.f32.vlgmr.msra.gmra.mxu0 %vm876_vm2, %v4617_v11  ;;  %v4958_v60 = vld [vmem:[%s8736_s14 + $0x28] sm:$0xff]  ;;  %v5675_v9 = vld [vmem:[%s8736_s14 + $0xf0] sm:$0xff]  ;;  %v5664_v11 = vld [vmem:[%s8736_s14 + $0xa0] sm:$0xff] }
 0xcaa   : > { %v6573_v48 = vpop.f32.mrf.mxu1  ;;  %v6626_v45 = vpop.f32.mrf.mxu0  ;;  %6672 = vmatprep.mubr.msk.f32.mxu0 %vm7065_vm0, %v8826_v46 }
 0xcab   : > { %v4396_v47 = vadd.f32 %v4392_v5, %v4247_v13  ;;  %v5676_v5 = vld [vmem:[%s8736_s14 + $0xf8] sm:$0xff]  ;;  %v5674_v13 = vld [vmem:[%s8736_s14 + $0xe8] sm:$0xff]  ;;  %v5673_v45 = vld [vmem:[%s8736_s14 + $0xe0] sm:$0xff] }
 0xcac   : > { %v4468_v17 = vpop.f32.mrf.mxu1  ;;  %v5663_v48 = vld [vmem:[%s8736_s14 + $0x98] sm:$0xff] }
 0xcad   : > { %6620 = vmatmul.mubr.msk.f32.vlgmr.msra.gmra.mxu1 %vm876_vm2, %v4468_v17  ;;  %v5672_v17 = vld [vmem:[%s8736_s14 + $0xd8] sm:$0xff] }
 0xcae   : > { %6647 = vmatpush3.msk.msra.mxu1 %vm2150_vm3, %v8159_v51  ;;  %v6602_v1 = vpop.f32.mrf.mxu1  ;;  %6648 = vmatprep.mubr.msk.f32.mxu1 %vm7065_vm0, %v8826_v46  ;;  %v6904_v51 = vld [vmem:[%s8802_s0 + $0x230] sm:$0xff] }
 0xcaf   : > { %6651 = vmatprep.subr.mxu1 %v8826_v46  ;;  %v5661_v1 = vld [vmem:[%s8736_s14 + $0x88] sm:$0xff] }
 0xcb1   : > { %6649 = vmatmul.mubr.msk.f32.vlgmr.msra.gmra.mxu1 %vm2146_vm4, %v4696_v4  ;;  %v5671_v4 = vld [vmem:[%s8736_s14 + $0xd0] sm:$0xff] }
 0xcb2   : > { %6652 = vmatpush3.msra.mxu1 %v6903_v6  ;;  %6667 = vmatprep.mubr.msk.f32.mxu1 %vm7065_vm0, %v8826_v46  ;;  %v5660_v6 = vld [vmem:[%s8736_s14 + $0x80] sm:$0xff] }
 0xcb3   : > { %6653 = vmatprep.subr.mxu1 %v8826_v46 }
 0xcb4   : > { %6654 = vmatpush3.msra.mxu1 %v6904_v51  ;;  %v5670_v51 = vld [vmem:[%s8736_s14 + $0xc8] sm:$0xff] }
 0xcb5   : > { %6655 = vmatprep.subr.mxu1 %v8826_v46 }
 0xcb6   : > { %6656 = vmatpush3.msra.mxu1 %v6905_v8 }
 0xcb7   : > { %6657 = vmatprep.subr.mxu1 %v8826_v46 }
 0xcb8   : > { %6658 = vmatpush3.msra.mxu1 %v6906_v10  ;;  %v5669_v10 = vld [vmem:[%s8736_s14 + $0xc0] sm:$0xff] }
 0xcb9   : > { %6659 = vmatprep.subr.mxu1 %v8826_v46 }
 0xcba   : > { %6660 = vmatpush3.msra.mxu1 %v6907_v12 }
 0xcbb   : > { %6661 = vmatprep.subr.mxu1 %v8826_v46 }
 0xcbc   : > { %6662 = vmatpush3.msra.mxu1 %v6908_v14  ;;  %v5292_v14 = vld [vmem:[%s8740_s18 + $0x18] sm:$0xff] }
 0xcbd   : > { %6663 = vmatprep.subr.mxu1 %v8826_v46 }
 0xcbe   : > { %6664 = vmatpush3.msra.mxu1 %v6909_v16  ;;  %v5291_v16 = vld [vmem:[%s8740_s18 + $0x10] sm:$0xff] }
 0xcbf   : > { %6665 = vmatprep.subr.mxu1 %v8826_v46 }
 0xcc0   : > { %6666 = vmatpush3.msra.mxu1 %v6910_v18  ;;  %v5290_v18 = vld [vmem:[%s8740_s18 + $0x8] sm:$0xff] }
 0xcc1   : > { %6694 = vmatprep.subr.mxu1 %v8826_v46 }
 0xd69   : > { %v4690_v19 = vpop.f32.mrf.mxu0 }
 0xd6b   : > { %v6645_v22 = vpop.f32.mrf.mxu0 }
 0xd6d   : > { %v4541_v26 = vpop.f32.mrf.mxu1 }
 0xd6e   : > { %v4545_v27 = vadd.f32 %v4541_v26, %v4396_v47  ;;  %v5662_v47 = vld [vmem:[%s8736_s14 + $0x90] sm:$0xff] }
 0xd6f   : > { %v6621_v29 = vpop.f32.mrf.mxu1 }
 0xd70   : > { %v4694_v30 = vadd.f32 %v4690_v19, %v4545_v27  ;;  %v5289_v19 = vld [vmem:[%s8740_s18] sm:$0xff] }
 0xd71   : > { %v4766_v31 = vpop.f32.mrf.mxu1 }
 0xd72   : > { %6668 = vmatmul.mubr.msk.f32.vlgmr.msra.gmra.mxu1 %vm876_vm2, %v4766_v31 }
 0xd73   : > { %v6650_v32 = vpop.f32.mrf.mxu1  ;;  %6710 = vmatprep.mubr.msk.f32.mxu1 %vm7065_vm0, %v8826_v46  ;;  %6695 = vmatpush3.msra.mxu1 %v5658_v33 }
 0xd74   : > { %6696 = vmatprep.subr.mxu1 %v8826_v46 }
 0xd75   : > { %6697 = vmatpush3.msra.mxu1 %v5657_v34 }
 0xd76   : > { %6698 = vmatprep.subr.mxu1 %v8826_v46 }
 0xd77   : > { %6699 = vmatpush3.msra.mxu1 %v5656_v35 }
 0xd78   : > { %6700 = vmatprep.subr.mxu1 %v8826_v46 }
 0xd79   : > { %6701 = vmatpush3.msra.mxu1 %v5655_v36  ;;  %v5284_v36 = vld [vmem:[%s8738_s16] sm:$0x1] }
 0xd7a   : > { %6702 = vmatprep.subr.mxu1 %v8826_v46 }
 0xd7b   : > { %6703 = vmatpush3.msra.mxu1 %v5654_v2 }
 0xd7c   : > { %6704 = vmatprep.subr.mxu1 %v8826_v46 }
 0xd7d   : > { %6705 = vmatpush3.msra.mxu1 %v5653_v20 }
 0xd7e   : > { %6706 = vmatprep.subr.mxu1 %v8826_v46 }
 0xd7f   : > { %6707 = vmatpush3.msra.mxu1 %v5652_v23 }
 0xd80   : > { %6708 = vmatprep.subr.mxu1 %v8826_v46 }
 0xd81   : > { %6709 = vmatpush3.msra.mxu1 %v5651_v44 }
 0xd82   : > { %6732 = vmatprep.subr.mxu1 %v8826_v46 }
 0xe32   : > { %v4839_v37 = vpop.f32.mrf.mxu1 }
 0xe33   : > { %v4843_v38 = vadd.f32 %v4839_v37, %v4694_v30  ;;  %v4952_v30 = vld [vmem:[%s8737_s15] sm:$0x1] }
 0xe34   : > { %v6669_v40 = vpop.f32.mrf.mxu1 }
 0xe35   : > { %v4849_v41 = vmul.f32 %v4847_v39, %v4843_v38  ;;  %v5286_v38 = vld [vmem:[%s8739_s17] sm:$0x1] }
 0xe37   : > { %v4855_v55 = vadd.f32 %v4853_v53, %v4849_v41 }
 0xe39   : > { %v4856_v56 = vadd.f32 %v4855_v55, %v7904_v15  ;;  %v4959_v15 = vld [vmem:[%s8736_s14 + $0x30] sm:$0xff]  ;;  %v5293_v55 = vld [vmem:[%s8848_s22] sm:$0x1] }
 0xe3b   : > { %v4857_v57 = vmax.f32 %v4856_v56, 0.0 }
 0xe3d   : > { %4859 = vst.msk [vmem:[%s705_s23] sm:$0x7f] %vm4858_vm5, %v4857_v57  ;;  %6671 = vmatpush3.msk.msra.mxu0 %vm2150_vm3, %v4857_v57  ;;  %s697_s23 = scalar_lea.vmem [#allocation8], %s696_s29 }
 0xe3e   : > { %6673 = vmatmul.mubr.msk.f32.vlgmr.msra.gmra.mxu0 %vm2146_vm4, %v4860_v58  ;;  %6675 = vmatprep.subr.mxu0 %v8826_v46  ;;  %s5390_s24 = sshll.u32 %s697_s23, 4  ;;  %s5391_s24 = int_to_ptr.vmem [resolvable:$true] %s5390_s24 }
 0xe3f   : > { %6676 = vmatpush3.msra.mxu0 %v4960_v59  ;;  %6691 = vmatprep.mubr.msk.f32.mxu0 %vm7065_vm0, %v8826_v46  ;;  %s6989_s21 = scalar_lea.vmem %s5391_s24, 16  ;;  %p6996_p7 = scmp.lt.s32.totalorder %s5391_s24, %s6994_s2 }
 0xe40   : > { %6677 = vmatprep.subr.mxu0 %v8826_v46  ;;  %p6990_p10 = scmp.ne.s32.totalorder %s5391_s24, %s6989_s21  ;;  %p6997_p8 = scmp.lt.s32.totalorder %s6995_s27, %s6989_s21 }
 0xe41   : > { %6678 = vmatpush3.msra.mxu0 %v4959_v15 }
 0xe42   : > { %6679 = vmatprep.subr.mxu0 %v8826_v46  ;;  %p6991_p2 = pnand %p6990_p10, %p8850_p12  ;;  %p6998_p11 = por %p6997_p8, %p6996_p7 }
 0xe43   : > { %6680 = vmatpush3.msra.mxu0 %v4958_v60 }
 0xe44   : > { %6681 = vmatprep.subr.mxu0 %v8826_v46  ;;  %p6992_p4 = pneg %p6991_p2 }
 0xe45   : > { %6682 = vmatpush3.msra.mxu0 %v4957_v61 }
 0xe46   : > { %6683 = vmatprep.subr.mxu0 %v8826_v46  ;;  %p6999_p0 = pnand %p6998_p11, %p6992_p4 }
 0xe47   : > { %6684 = vmatpush3.msra.mxu0 %v4956_v62 }
 0xe48   : > { %6685 = vmatprep.subr.mxu0 %v8826_v46 }
 0xe49   : > { %6686 = vmatpush3.msra.mxu0 %v4955_v63 }
 0xe4a   : > { %6687 = vmatprep.subr.mxu0 %v8826_v46 }
 0xe4b   : > { %6688 = vmatpush3.msra.mxu0 %v4954_v3 }
 0xe4c   : > { %6689 = vmatprep.subr.mxu0 %v8826_v46 }
 0xe4d   : > { %6690 = vmatpush3.msra.mxu0 %v4953_v21 }
 0xe4e   : > { %6713 = vmatprep.subr.mxu0 %v8826_v46 }
 0xefe   : > { %v4933_v28 = vpop.f32.mrf.mxu0 }
 0xeff   : > { %v4943_v52 = vmul.f32 %v4941_v24, %v4933_v28 }
 0xf00   : > { %v6674_v49 = vpop.f32.mrf.mxu0 }
 0xf01   : > { %v4950_v42 = vadd.f32 %v4948_v43, %v4943_v52 }
 0xf03   : > { %v4951_v50 = vmax.f32 %v4950_v42, 0.0 }
 0xf05   : > { %v5044_v54 = vrot.slane %v4951_v50, 1  ;;  %6692 = vmatmul.mubr.msk.f32.vlgmr.msra.gmra.mxu0 %vm876_vm2, %v4951_v50  ;;  %v5127_v8 = vrot.slane %v4951_v50, 2  ;;  %v5210_v12 = vrot.slane %v4951_v50, 3 }
 0xf06   : > { %6714 = vmatpush3.msra.mxu0 %v5667_v25  ;;  %6729 = vmatprep.mubr.msk.f32.mxu0 %vm7065_vm0, %v8826_v46 }
 0xf07   : > { %6715 = vmatprep.subr.mxu0 %v8826_v46  ;;  %6711 = vmatmul.mubr.msk.f32.vlgmr.msra.gmra.mxu1 %vm876_vm2, %v5044_v54 }
 0xf08   : > { %6716 = vmatpush3.msra.mxu0 %v5666_v0  ;;  %6733 = vmatpush3.msra.mxu1 %v5676_v5 }
 0xf09   : > { %6717 = vmatprep.subr.mxu0 %v8826_v46  ;;  %6734 = vmatprep.subr.mxu1 %v8826_v46 }
 0xf0a   : > { %6718 = vmatpush3.msra.mxu0 %v5665_v7  ;;  %6735 = vmatpush3.msra.mxu1 %v5675_v9 }
 0xf0b   : > { %6719 = vmatprep.subr.mxu0 %v8826_v46  ;;  %6736 = vmatprep.subr.mxu1 %v8826_v46 }
 0xf0c   : > { %6720 = vmatpush3.msra.mxu0 %v5664_v11  ;;  %6737 = vmatpush3.msra.mxu1 %v5674_v13 }
 0xf0d   : > { %6721 = vmatprep.subr.mxu0 %v8826_v46  ;;  %6738 = vmatprep.subr.mxu1 %v8826_v46 }
 0xf0e   : > { %6722 = vmatpush3.msra.mxu0 %v5663_v48  ;;  %6739 = vmatpush3.msra.mxu1 %v5673_v45 }
 0xf0f   : > { %6723 = vmatprep.subr.mxu0 %v8826_v46  ;;  %6740 = vmatprep.subr.mxu1 %v8826_v46 }
 0xf10   : > { %6724 = vmatpush3.msra.mxu0 %v5662_v47  ;;  %6741 = vmatpush3.msra.mxu1 %v5672_v17 }
 0xf11   : > { %6725 = vmatprep.subr.mxu0 %v8826_v46  ;;  %6742 = vmatprep.subr.mxu1 %v8826_v46 }
 0xf12   : > { %6726 = vmatpush3.msra.mxu0 %v5661_v1  ;;  %6743 = vmatpush3.msra.mxu1 %v5671_v4 }
 0xf13   : > { %6727 = vmatprep.subr.mxu0 %v8826_v46  ;;  %6744 = vmatprep.subr.mxu1 %v8826_v46 }
 0xf14   : > { %6728 = vmatpush3.msra.mxu0 %v5660_v6  ;;  %6745 = vmatpush3.msra.mxu1 %v5670_v51 }
 0xf15   : > { %6730 = vmatmul.mubr.msk.f32.vlgmr.msra.gmra.mxu0 %vm876_vm2, %v5127_v8  ;;  %6746 = vmatprep.subr.mxu1 %v8826_v46 }
 0xf16   : > { %6747 = vmatpush3.msra.mxu1 %v5669_v10  ;;  %6748 = vmatprep.mubr.msk.f32.mxu1 %vm7065_vm0, %v8826_v46 }
 0xf17   : > { %6749 = vmatmul.mubr.msk.f32.vlgmr.msra.gmra.mxu1 %vm876_vm2, %v5210_v12  ;;  %6751 = vmatprep.subr.mxu0 %v8826_v46 }
 0xf18   : > { %6759 = vmatprep.mubr.msk.f32.mxu0 %vm7065_vm0, %v8826_v46  ;;  %6752 = vmatpush3.msra.mxu0 %v5292_v14 }
 0xf19   : > { %6753 = vmatprep.subr.mxu0 %v8826_v46 }
 0xf1a   : > { %6754 = vmatpush3.msra.mxu0 %v5291_v16 }
 0xf1b   : > { %6755 = vmatprep.subr.mxu0 %v8826_v46 }
 0xf1c   : > { %6756 = vmatpush3.msra.mxu0 %v5290_v18 }
 0xf1d   : > { %6757 = vmatprep.subr.mxu0 %v8826_v46 }
 0xf1e   : > { %6758 = vmatpush3.msra.mxu0 %v5289_v19 }
 0xfc5   : > { %v5030_v22 = vpop.f32.mrf.mxu0 }
 0xfc6   : > { %v5034_v31 = vadd.f32 %v5030_v22, %v4952_v30 }
 0xfc7   : > { %v6693_v26 = vpop.f32.mrf.mxu0  ;;  %v5113_v27 = vpop.f32.mrf.mxu1 }
 0xfc8   : > { %v5117_v32 = vadd.f32 %v5113_v27, %v5034_v31 }
 0xfc9   : > { %v6712_v29 = vpop.f32.mrf.mxu1 }
 0xfd5   : > { %v5196_v33 = vpop.f32.mrf.mxu0 }
 0xfd6   : > { %v5200_v34 = vadd.f32 %v5196_v33, %v5117_v32 }
 0xfd7   : > { %v6731_v46 = vpop.f32.mrf.mxu0  ;;  %v5279_v35 = vpop.f32.mrf.mxu1 }
 0xfd8   : > { %v5283_v37 = vadd.f32 %v5279_v35, %v5200_v34 }
 0xfd9   : > { %v6750_v39 = vpop.f32.mrf.mxu1 }
 0xfda   : > { %v5285_v40 = vmul.f32 %v5284_v36, %v5283_v37 }
 0xfdc   : > { %v5287_v41 = vadd.f32 %v5286_v38, %v5285_v40 }
 0xfde   : > { %v5288_v53 = vmax.f32 %v5287_v41, 0.0 }
 0xfe0   : > { %6760 = vmatmul.mubr.msk.f32.vlgmr.msra.gmra.mxu0 %vm5294_vm6, %v5288_v53 }
0x10a0   : > { %v5364_v56 = vpop.f32.mrf.mxu0 }
0x10a1   : > { %v5365_v57 = vadd.f32 %v5364_v56, %v5293_v55 }
0x10a2   : > { %v6761_v58 = vpop.f32.mrf.mxu0 }
0x10a3   : > { %5369 = vst.msk [vmem:[%s697_s23] sm:$0x1] %vm5368_vm7, %v5365_v57 }
0x10a4   : > { %7002 = shalt.err (!%p6999_p0)
}
0x10a5   : > { %s7003_s22 = scalar_lea.hbm %s8687_s19, 16  ;;  %s7007_s23 = scalar_lea.hbm %s8849_s1, 32 }
0x10a6   : > { %p7004_p6 = scmp.ne.s32.totalorder %s8687_s19, %s7003_s22  ;;  %p7008_p1 = scmp.lt.s32.totalorder %s8687_s19, %s8849_s1 }
0x10a7   : > { %p7009_p5 = scmp.lt.s32.totalorder %s7007_s23, %s7003_s22 }
0x10a8   : > { %p7005_p9 = pnand %p7004_p6, %p8850_p12 }
0x10a9   : > { %p7010_p3 = por %p7009_p5, %p7008_p1 }
0x10aa   : > { %p7006_p13 = pneg %p7005_p9 }
0x10ac   : > { %p7011_p10 = pnand %p7010_p3, %p7006_p13 }
0x10ae   : > { %7014 = shalt.err (!%p7011_p10)
}
0x10af   : > { %6774 = dma.vmem_to_hbm [thread:$0]  (%p8850_p12), %s5391_s24, 16, %s8687_s19, %s5375_s30  }
0x10b0 PF: > { %s8851_s21 = sld [smem:[#allocation14_spill]] }
0x10b1   : > { %s8852_s3 = sld [smem:[#allocation12_spill]] }
0x10b2   : > { %s8853_s2 = sld [smem:[#allocation17_spill]] }
0x10b6   : > { %p6796_p2 = scmp.ge.s32.totalorder %s8851_s21, 2 }
0x10b7   : > { %s5409_s27 = sand.u32 1, %s8852_s3  }
0x10b8   : > { %p8854_p4 = scmp.ne.s32.totalorder %s8853_s2, 0  ;;  %s5410_s29 = scalar_lea.sflag [#allocation4], %s5409_s27 }
0x10ba   : > { %p6787_p7 = pnand %p6796_p2, %p8854_p4 }
0x10bc   : > { %p6788_p8 = pneg %p6787_p7 }
0x10be   : > { %7040 = dma.done.wait (%p6788_p8), %s5410_s29, 16  }
0x10bf   : > { %7042 = vsyncadd (%p6788_p8), %s5410_s29, 4294967280  ;;  %s8855_s27 = sld [smem:[#allocation15_spill]]  ;;  %s8858_s2 = smov %s7049_s25 }
0x10c0   : > { %s8856_s22 = sld [smem:[#allocation13_spill]] }
0x10c1   : > { %s8857_s26 = sld [smem:[#allocation16_spill]] }
0x10c5   : > { %p34_p11 = scmp.ge.s32.totalorder %s8855_s27, 4  }
0x10c6   : > { %s8859_s25 = smov %s8856_s22 }
0x10c7   :  { %36 = sbr.rel (!%p34_p11) target bundleno = 14 (0xe), region = 195 }
0x10cc   :  { %5414 = vsyncpa [#allocation3], 1 }
0x10cd   :  { %5416 = vsyncpa [#allocation3 + $0x1], 1 }
0x10ce   :  { %5417 = vsyncpa [#allocation6], 1 }
0x10cf   :  { %5418 = vsyncpa [#allocation4], 1 }
0x10d0   :  { %5420 = vsyncpa [#allocation4 + $0x1], 1 }

</bundles_post_ra>
